<compile_context>
chip_gen: v7x
topology: tpu7x:2x2x1
jax: 0.10.0
libtpu: 0.0.40
codegen_flags: <defaults>
</compile_context>

<pallas_src>
import functools

import jax
import jax.numpy as jnp
from jax.experimental import pallas as pl
from jax.experimental.pallas import tpu as pltpu

LN_EPS = 1e-5  # PyTorch nn.LayerNorm default eps
MXU_DTYPE = jnp.bfloat16


# ---------------------------------------------------------------------------
# Pallas kernel: full DecoderLayer forward (whole batch, or one batch element
# per grid step when the batch-parallel grid path is used).
# ---------------------------------------------------------------------------
def decoder_layer_kernel(x_ref, enc_ref, tgt_valid_ref, src_valid_ref,
                         wqkv1_ref, bqkv1_ref, wo1_ref, bo1_ref,
                         ln1g_ref, ln1b_ref,
                         wq2_ref, bq2_ref, wkv2_ref, bkv2_ref, wo2_ref, bo2_ref,
                         ln2g_ref, ln2b_ref,
                         w1_ref, b1_ref, w2_ref, b2_ref,
                         ln3g_ref, ln3b_ref,
                         out_ref, *, num_head):
    bs, sd, hidden = x_ref.shape
    se = enc_ref.shape[1]
    hd = hidden // num_head
    mxu = wqkv1_ref.dtype                      # bf16 MXU operand dtype

    x3 = x_ref[...]                            # (bs, sd, H) f32
    xf = x3.reshape(bs * sd, hidden)           # row-dense slab for proj / LN

    # In-kernel mask construction from validity rows (no dense-mask DMA).
    q_idx = jax.lax.broadcasted_iota(jnp.int32, (sd, sd), 0)
    k_idx = jax.lax.broadcasted_iota(jnp.int32, (sd, sd), 1)
    causal = q_idx >= k_idx                                     # (sd, sd)
    la_keep = jnp.logical_and(causal[None, :, :],
                              tgt_valid_ref[...] != 0.0)        # (bs, sd, sd)
    pad_keep = src_valid_ref[...] != 0.0                        # (bs, 1, se)

    def layer_norm(zf, g_ref, b_ref):                           # f32 math
        mu = jnp.mean(zf, axis=-1, keepdims=True)
        var = jnp.mean((zf - mu) * (zf - mu), axis=-1, keepdims=True)
        return (zf - mu) * jax.lax.rsqrt(var + LN_EPS) * g_ref[...] + b_ref[...]

    def mha_proj(q3, k3, v3, keep, wo_ref, bo_ref):
        # NOTE: matches the PyTorch reference -- NO 1/sqrt(head_dim) scaling
        # (self.scale is an empty tensor and never applied).
        sq = q3.shape[1]
        acc = jnp.zeros((bs * sq, hidden), jnp.float32)
        # TODO(synk): if hidden // num_head is not a multiple of 128, replace the
        # per-head lane slices with a single batched 'bqhd,bkhd->bhqk' einsum to
        # avoid per-head relayouts; with hd=128 here the slices are lane-aligned.
        for h in range(num_head):                 # small static loop
            sl = slice(h * hd, (h + 1) * hd)
            qh = q3[..., sl].astype(mxu)
            kh = k3[..., sl].astype(mxu)
            vh = v3[..., sl].astype(mxu)
            s = jnp.einsum("bqd,bkd->bqk", qh, kh,
                           preferred_element_type=jnp.float32)
            # masked_fill(score, mask == 0, -10000.0)
            s = jnp.where(keep, s, -10000.0)
            s = s - jnp.max(s, axis=-1, keepdims=True)
            p = jnp.exp(s)
            # exact reciprocal: lands on the EUP slot, off the VALU critical path
            p = p * pl.reciprocal(jnp.sum(p, axis=-1, keepdims=True))
            oh = jnp.einsum("bqk,bkd->bqd", p.astype(mxu), vh,
                            preferred_element_type=jnp.float32)
            # Per-head K-chunked output projection (no head concat, no extra
            # (bs*sq, H) temporary).
            acc = acc + jnp.dot(oh.reshape(bs * sq, hd).astype(mxu),
                                wo_ref[sl, :],
                                preferred_element_type=jnp.float32)
        return acc + bo_ref[...]

    # ---- masked self-attention + residual + LayerNorm1 --------------------
    qkv1 = (jnp.dot(xf.astype(mxu), wqkv1_ref[...],
                    preferred_element_type=jnp.float32) + bqkv1_ref[...])
    q1 = qkv1[:, :hidden].reshape(bs, sd, hidden)
    k1 = qkv1[:, hidden:2 * hidden].reshape(bs, sd, hidden)
    v1 = qkv1[:, 2 * hidden:].reshape(bs, sd, hidden)
    a1 = mha_proj(q1, k1, v1, la_keep, wo1_ref, bo1_ref)
    y1 = layer_norm(a1 + xf, ln1g_ref, ln1b_ref)      # dropout = identity (eval)

    # ---- cross-attention (Q from decoder, K/V from encoder) + LayerNorm2 --
    encf = enc_ref[...].reshape(bs * se, hidden)
    kv2 = (jnp.dot(encf.astype(mxu), wkv2_ref[...],
                   preferred_element_type=jnp.float32) + bkv2_ref[...])
    k2 = kv2[:, :hidden].reshape(bs, se, hidden)
    v2 = kv2[:, hidden:].reshape(bs, se, hidden)
    q2 = (jnp.dot(y1.astype(mxu), wq2_ref[...],
                  preferred_element_type=jnp.float32) + bq2_ref[...]
          ).reshape(bs, sd, hidden)
    a2 = mha_proj(q2, k2, v2, pad_keep, wo2_ref, bo2_ref)
    y2 = layer_norm(a2 + y1, ln2g_ref, ln2b_ref)

    # ---- FFN + residual + LayerNorm3 ---------------------------------------
    h1 = jnp.maximum(jnp.dot(y2.astype(mxu), w1_ref[...],
                             preferred_element_type=jnp.float32) + b1_ref[...],
                     0.0)
    h2 = (jnp.dot(h1.astype(mxu), w2_ref[...],
                  preferred_element_type=jnp.float32) + b2_ref[...])
    y3 = layer_norm(y2 + h2, ln3g_ref, ln3b_ref)

    out_ref[...] = y3.reshape(bs, sd, hidden)


# ---------------------------------------------------------------------------
# One-time parameter preprocessing: fuse QKV / KV projections and cast MXU
# weights to bf16 (biases / LN affine stay f32). Do this ONCE, not per call.
# ---------------------------------------------------------------------------
def prepare_params(params, mxu_dtype=MXU_DTYPE):
    a1, a2 = params["attn1"], params["attn2"]
    cast = lambda w: w.astype(mxu_dtype)
    return {
        "wqkv1": cast(jnp.concatenate([a1["wq"], a1["wk"], a1["wv"]], axis=1)),
        "bqkv1": jnp.concatenate([a1["bq"], a1["bk"], a1["bv"]], axis=1),
        "wo1": cast(a1["wo"]), "bo1": a1["bo"],
        "ln1_g": params["ln1_g"], "ln1_b": params["ln1_b"],
        "wq2": cast(a2["wq"]), "bq2": a2["bq"],
        "wkv2": cast(jnp.concatenate([a2["wk"], a2["wv"]], axis=1)),
        "bkv2": jnp.concatenate([a2["bk"], a2["bv"]], axis=1),
        "wo2": cast(a2["wo"]), "bo2": a2["bo"],
        "ln2_g": params["ln2_g"], "ln2_b": params["ln2_b"],
        "w1": cast(params["w1"]), "b1": params["b1"],
        "w2": cast(params["w2"]), "b2": params["b2"],
        "ln3_g": params["ln3_g"], "ln3_b": params["ln3_b"],
    }


def _num_tensorcores() -> int:
    try:
        dev = jax.devices()[0]
        n = getattr(dev, "num_cores", None)
        if n is None:
            n = getattr(dev, "core_count", 1)
        return max(int(n or 1), 1)
    except Exception:
        return 1


def _vmem_limit_bytes(resident_estimate: int) -> int:
    phys = 128 * 1024 * 1024
    try:  # config-derived cap: never ask for more than half of physical VMEM
        phys = int(pltpu.get_tpu_info().vmem_capacity_bytes)
    except Exception:
        pass
    want = max(4 * int(resident_estimate), 32 * 1024 * 1024)
    return int(min(want, phys // 2))


def _estimate_resident_bytes(bs, sd, se, hidden, inner, args):
    arg_bytes = sum(int(a.size) * a.dtype.itemsize for a in args)
    inter = 4 * (bs * sd * (3 * hidden + 6 * hidden + inner)
                 + bs * se * 2 * hidden
                 + 2 * bs * sd * max(sd, se))
    return arg_bytes + inter + 4 * bs * sd * hidden


# ---------------------------------------------------------------------------
# Wrapper: one pallas_call, grid-free (single-TC chips) or batch-parallel grid
# (multi-TC chips, dimension_semantics=("parallel",)).
# ---------------------------------------------------------------------------
def decoder_layer(x, enc_output, src_valid, tgt_valid, fast_params, num_head,
                  *, batch_parallel=None):
    """Pallas forward of DecoderLayer.

    x:          (bs, dec_seq, hidden)   decoder input activations (f32)
    enc_output: (bs, enc_seq, hidden)   encoder output (f32)
    src_valid:  (bs, enc_seq)           True/nonzero = real token (padding mask row)
    tgt_valid:  (bs, dec_seq)           True/nonzero = real token (lookahead mask
                                         is causal & tgt_valid, built in-kernel)
    fast_params: output of prepare_params(params)   (fused + bf16 weights)
    """
    bs, sd, hidden = x.shape
    se = enc_output.shape[1]
    fp = fast_params

    if batch_parallel is None:
        batch_parallel = bs > 1 and _num_tensorcores() > 1

    # Tiny validity rows only (no dense O(seq^2) masks are materialized).
    tv3 = tgt_valid.astype(jnp.float32).reshape(bs, 1, sd)
    sv3 = src_valid.astype(jnp.float32).reshape(bs, 1, se)

    param_args = (fp["wqkv1"], fp["bqkv1"], fp["wo1"], fp["bo1"],
                  fp["ln1_g"], fp["ln1_b"],
                  fp["wq2"], fp["bq2"], fp["wkv2"], fp["bkv2"],
                  fp["wo2"], fp["bo2"], fp["ln2_g"], fp["ln2_b"],
                  fp["w1"], fp["b1"], fp["w2"], fp["b2"],
                  fp["ln3_g"], fp["ln3_b"])
    all_args = (x, enc_output, tv3, sv3) + param_args

    vlim = _vmem_limit_bytes(
        _estimate_resident_bytes(bs, sd, se, hidden, fp["w1"].shape[1], all_args))

    kernel = functools.partial(decoder_layer_kernel, num_head=num_head)
    out_shape = jax.ShapeDtypeStruct((bs, sd, hidden), jnp.float32)

    if not batch_parallel:
        # Grid-free: whole (small) problem in one invocation; weights and
        # activations are single-copy resident in VMEM (no per-step pipeline
        # overhead, no double buffering of constant-index blocks).
        call = pl.pallas_call(
            kernel, out_shape=out_shape,
            compiler_params=pltpu.CompilerParams(vmem_limit_bytes=vlim))
        return call(*all_args)

    # Batch-parallel grid: one batch element per grid step, sharded across
    # TensorCores on multi-TC chips (v7x megacore).
    act_specs = [
        pl.BlockSpec((1, sd, hidden), lambda b: (b, 0, 0)),   # x
        pl.BlockSpec((1, se, hidden), lambda b: (b, 0, 0)),   # enc_output
        pl.BlockSpec((1, 1, sd), lambda b: (b, 0, 0)),        # tgt_valid
        pl.BlockSpec((1, 1, se), lambda b: (b, 0, 0)),        # src_valid
    ]
    wgt_specs = [pl.BlockSpec(p.shape, lambda b: (0, 0)) for p in param_args]
    grid_spec = pltpu.PrefetchScalarGridSpec(
        num_scalar_prefetch=0, grid=(bs,),
        in_specs=act_specs + wgt_specs,
        out_specs=pl.BlockSpec((1, sd, hidden), lambda b: (b, 0, 0)))
    call = pl.pallas_call(
        kernel, out_shape=out_shape, grid_spec=grid_spec,
        compiler_params=pltpu.CompilerParams(
            dimension_semantics=("parallel",), vmem_limit_bytes=vlim))
    return call(*all_args)


# ---------------------------------------------------------------------------
# Pure-JAX f32 reference (mirrors the PyTorch DecoderLayer forward exactly).
# ---------------------------------------------------------------------------
def _mha_ref(q_in, k_in, v_in, p, mask, num_head):
    bs, sq, hidden = q_in.shape
    sk = k_in.shape[1]
    hd = hidden // num_head
    q = q_in @ p["wq"] + p["bq"][0]
    k = k_in @ p["wk"] + p["bk"][0]
    v = v_in @ p["wv"] + p["bv"][0]
    q = q.reshape(bs, sq, num_head, hd).transpose(0, 2, 1, 3)
    k = k.reshape(bs, sk, num_head, hd).transpose(0, 2, 1, 3)
    v = v.reshape(bs, sk, num_head, hd).transpose(0, 2, 1, 3)
    s = jnp.einsum("bhqd,bhkd->bhqk", q, k)            # no 1/sqrt(d) scaling
    s = jnp.where(mask == 0.0, -10000.0, s)
    a = jax.nn.softmax(s, axis=-1)
    o = jnp.einsum("bhqk,bhkd->bhqd", a, v).transpose(0, 2, 1, 3).reshape(bs, sq, hidden)
    return o @ p["wo"] + p["bo"][0]


def _ln_ref(z, g, b):
    mu = z.mean(-1, keepdims=True)
    var = ((z - mu) ** 2).mean(-1, keepdims=True)
    return (z - mu) / jnp.sqrt(var + LN_EPS) * g[0] + b[0]


def decoder_layer_ref(x, enc_output, padding_mask, lookahead_mask, params, num_head):
    out = _mha_ref(x, x, x, params["attn1"], lookahead_mask, num_head)
    out = _ln_ref(out + x, params["ln1_g"], params["ln1_b"])
    out_ = _mha_ref(out, enc_output, enc_output, params["attn2"], padding_mask, num_head)
    out = _ln_ref(out_ + out, params["ln2_g"], params["ln2_b"])
    out_ = jnp.maximum(out @ params["w1"] + params["b1"][0], 0.0) @ params["w2"] + params["b2"][0]
    out = _ln_ref(out + out_, params["ln3_g"], params["ln3_b"])
    return out


# ---------------------------------------------------------------------------
# Deterministic parameter init (f32 master params).
# ---------------------------------------------------------------------------
def init_params(key, hidden, inner):
    keys = iter(jax.random.split(key, 24))

    def nrm(shape, scale=0.02):
        return (scale * jax.random.normal(next(keys), shape)).astype(jnp.float32)

    def attn():
        return {
            "wq": nrm((hidden, hidden)), "bq": nrm((1, hidden)),
            "wk": nrm((hidden, hidden)), "bk": nrm((1, hidden)),
            "wv": nrm((hidden, hidden)), "bv": nrm((1, hidden)),
            "wo": nrm((hidden, hidden)), "bo": nrm((1, hidden)),
        }

    ones = lambda: jnp.ones((1, hidden), jnp.float32)
    zeros = lambda: jnp.zeros((1, hidden), jnp.float32)
    return {
        "attn1": attn(), "ln1_g": ones(), "ln1_b": zeros(),
        "attn2": attn(), "ln2_g": ones(), "ln2_b": zeros(),
        "w1": nrm((hidden, inner)), "b1": nrm((1, inner)),
        "w2": nrm((inner, hidden)), "b2": nrm((1, hidden)),
        "ln3_g": ones(), "ln3_b": zeros(),
    }


if __name__ == "__main__":
    BATCH = 2
    DEC_SEQ = 16
    ENC_SEQ = 24
    HIDDEN = 256      # multiple of 128 -> lane-dense operands and output slab
    NUM_HEAD = 2      # head_dim = 128 -> lane-aligned per-head slices
    INNER = 512

    key = jax.random.PRNGKey(0)
    kp, kx, ke = jax.random.split(key, 3)
    params = init_params(kp, HIDDEN, INNER)
    fast_params = prepare_params(params)   # one-time fuse + bf16 cast

    x = jax.random.normal(kx, (BATCH, DEC_SEQ, HIDDEN), jnp.float32)
    enc_output = jax.random.normal(ke, (BATCH, ENC_SEQ, HIDDEN), jnp.float32)

    # Token-validity rows (the PyTorch masks are the standard construction:
    # lookahead = causal & tgt_valid, padding = src_valid).
    tgt_valid = jnp.ones((BATCH, DEC_SEQ), bool).at[:, -2:].set(False)
    src_valid = jnp.ones((BATCH, ENC_SEQ), bool).at[:, -3:].set(False)

    # Both execution paths (grid-free and batch-parallel grid) are exercised.
    out = decoder_layer(x, enc_output, src_valid, tgt_valid, fast_params,
                        NUM_HEAD, batch_parallel=False)
    out = jax.block_until_ready(out)
    out_par = decoder_layer(x, enc_output, src_valid, tgt_valid, fast_params,
                            NUM_HEAD, batch_parallel=True)
    out_par = jax.block_until_ready(out_par)

    # f32 reference with PyTorch-shaped masks built from the same validity rows.
    causal = jnp.tril(jnp.ones((DEC_SEQ, DEC_SEQ), bool))
    lookahead_mask = (causal[None, None, :, :]
                      & tgt_valid[:, None, None, :]).astype(jnp.float32)
    padding_mask = src_valid[:, None, None, :].astype(jnp.float32)
    ref = decoder_layer_ref(x, enc_output, padding_mask, lookahead_mask,
                            params, NUM_HEAD)

    assert out.shape == (BATCH, DEC_SEQ, HIDDEN)
    assert out_par.shape == (BATCH, DEC_SEQ, HIDDEN)
    err1 = float(jnp.max(jnp.abs(out - ref)))
    err2 = float(jnp.max(jnp.abs(out_par - ref)))
    # Tolerance accounts for bf16 MXU operands (accumulation stays f32).
    assert jnp.allclose(out, ref, atol=6e-2, rtol=6e-2), err1
    assert jnp.allclose(out_par, ref, atol=6e-2, rtol=6e-2), err2

    print("KERNEL_OK")
</pallas_src>

<mosaic_0001>
module attributes {stable_mosaic.version = 11 : i64} {
  func.func @decoder_layer_kernel(%arg0: memref<2x16x256xf32, #tpu.memory_space<vmem>>, %arg1: memref<2x24x256xf32, #tpu.memory_space<vmem>>, %arg2: memref<2x1x16xf32, #tpu.memory_space<vmem>>, %arg3: memref<2x1x24xf32, #tpu.memory_space<vmem>>, %arg4: memref<256x768xbf16, #tpu.memory_space<vmem>>, %arg5: memref<1x768xf32, #tpu.memory_space<vmem>>, %arg6: memref<256x256xbf16, #tpu.memory_space<vmem>>, %arg7: memref<1x256xf32, #tpu.memory_space<vmem>>, %arg8: memref<1x256xf32, #tpu.memory_space<vmem>>, %arg9: memref<1x256xf32, #tpu.memory_space<vmem>>, %arg10: memref<256x256xbf16, #tpu.memory_space<vmem>>, %arg11: memref<1x256xf32, #tpu.memory_space<vmem>>, %arg12: memref<256x512xbf16, #tpu.memory_space<vmem>>, %arg13: memref<1x512xf32, #tpu.memory_space<vmem>>, %arg14: memref<256x256xbf16, #tpu.memory_space<vmem>>, %arg15: memref<1x256xf32, #tpu.memory_space<vmem>>, %arg16: memref<1x256xf32, #tpu.memory_space<vmem>>, %arg17: memref<1x256xf32, #tpu.memory_space<vmem>>, %arg18: memref<256x512xbf16, #tpu.memory_space<vmem>>, %arg19: memref<1x512xf32, #tpu.memory_space<vmem>>, %arg20: memref<512x256xbf16, #tpu.memory_space<vmem>>, %arg21: memref<1x256xf32, #tpu.memory_space<vmem>>, %arg22: memref<1x256xf32, #tpu.memory_space<vmem>>, %arg23: memref<1x256xf32, #tpu.memory_space<vmem>>, %arg24: memref<2x16x256xf32, #tpu.memory_space<vmem>>) attributes {dimension_semantics = [], scalar_prefetch = 0 : i64, scratch_operands = 0 : i64, tpu.core_type = #tpu.core_type<tc>} {
    %c0 = arith.constant 0 : index
    %c0_0 = arith.constant 0 : index
    %c0_1 = arith.constant 0 : index
    %0 = vector.load %arg0[%c0, %c0_0, %c0_1] : memref<2x16x256xf32, #tpu.memory_space<vmem>>, vector<2x16x256xf32>
    %1 = vector.shape_cast %0 : vector<2x16x256xf32> to vector<32x256xf32>
    %2 = tpu.iota {dimensions = array<i32: 0>} : vector<16x16xi32>
    %3 = tpu.iota {dimensions = array<i32: 1>} : vector<16x16xi32>
    %4 = arith.cmpi sge, %2, %3 : vector<16x16xi32>
    %5 = vector.shape_cast %4 : vector<16x16xi1> to vector<1x16x16xi1>
    %c0_2 = arith.constant 0 : index
    %c0_3 = arith.constant 0 : index
    %c0_4 = arith.constant 0 : index
    %6 = vector.load %arg2[%c0_2, %c0_3, %c0_4] : memref<2x1x16xf32, #tpu.memory_space<vmem>>, vector<2x1x16xf32>
    %cst = arith.constant 0.000000e+00 : f32
    %7 = vector.broadcast %cst : f32 to vector<2x1x16xf32>
    %8 = arith.cmpf one, %6, %7 : vector<2x1x16xf32>
    %9 = vector.broadcast %5 : vector<1x16x16xi1> to vector<2x16x16xi1>
    %10 = vector.broadcast %8 : vector<2x1x16xi1> to vector<2x16x16xi1>
    %11 = arith.andi %9, %10 : vector<2x16x16xi1>
    %c0_5 = arith.constant 0 : index
    %c0_6 = arith.constant 0 : index
    %c0_7 = arith.constant 0 : index
    %12 = vector.load %arg3[%c0_5, %c0_6, %c0_7] : memref<2x1x24xf32, #tpu.memory_space<vmem>>, vector<2x1x24xf32>
    %cst_8 = arith.constant 0.000000e+00 : f32
    %13 = vector.broadcast %cst_8 : f32 to vector<2x1x24xf32>
    %14 = arith.cmpf one, %12, %13 : vector<2x1x24xf32>
    %15 = arith.truncf %1 : vector<32x256xf32> to vector<32x256xbf16>
    %c0_9 = arith.constant 0 : index
    %c0_10 = arith.constant 0 : index
    %16 = vector.load %arg4[%c0_9, %c0_10] : memref<256x768xbf16, #tpu.memory_space<vmem>>, vector<256x768xbf16>
    %cst_11 = arith.constant dense<0.000000e+00> : vector<32x768xf32>
    %17 = tpu.matmul %15, %16, %cst_11 {dimension_numbers = #tpu.dot_dimension_numbers<[1], [0], [0], [1], [0, 0, 1, 1], [], []>} : vector<32x256xbf16>, vector<256x768xbf16>, vector<32x768xf32> -> vector<32x768xf32>
    %c0_12 = arith.constant 0 : index
    %c0_13 = arith.constant 0 : index
    %18 = vector.load %arg5[%c0_12, %c0_13] : memref<1x768xf32, #tpu.memory_space<vmem>>, vector<1x768xf32>
    %19 = vector.broadcast %18 : vector<1x768xf32> to vector<32x768xf32>
    %20 = arith.addf %17, %19 : vector<32x768xf32>
    %21 = vector.extract_strided_slice %20 {offsets = [0, 0], sizes = [32, 256], strides = [1, 1]} : vector<32x768xf32> to vector<32x256xf32>
    %22 = vector.shape_cast %21 : vector<32x256xf32> to vector<2x16x256xf32>
    %23 = vector.extract_strided_slice %20 {offsets = [0, 256], sizes = [32, 256], strides = [1, 1]} : vector<32x768xf32> to vector<32x256xf32>
    %24 = vector.shape_cast %23 : vector<32x256xf32> to vector<2x16x256xf32>
    %25 = vector.extract_strided_slice %20 {offsets = [0, 512], sizes = [32, 256], strides = [1, 1]} : vector<32x768xf32> to vector<32x256xf32>
    %26 = vector.shape_cast %25 : vector<32x256xf32> to vector<2x16x256xf32>
    %cst_14 = arith.constant 0.000000e+00 : f32
    %27 = vector.broadcast %cst_14 : f32 to vector<32x256xf32>
    %28 = vector.extract_strided_slice %22 {offsets = [0, 0, 0], sizes = [2, 16, 128], strides = [1, 1, 1]} : vector<2x16x256xf32> to vector<2x16x128xf32>
    %29 = arith.truncf %28 : vector<2x16x128xf32> to vector<2x16x128xbf16>
    %30 = vector.extract_strided_slice %24 {offsets = [0, 0, 0], sizes = [2, 16, 128], strides = [1, 1, 1]} : vector<2x16x256xf32> to vector<2x16x128xf32>
    %31 = arith.truncf %30 : vector<2x16x128xf32> to vector<2x16x128xbf16>
    %32 = vector.extract_strided_slice %26 {offsets = [0, 0, 0], sizes = [2, 16, 128], strides = [1, 1, 1]} : vector<2x16x256xf32> to vector<2x16x128xf32>
    %33 = arith.truncf %32 : vector<2x16x128xf32> to vector<2x16x128xbf16>
    "tpu.trace_start"() <{level = 10 : i32, message = "bqd,bkd->bqk"}> : () -> ()
    %cst_15 = arith.constant dense<0.000000e+00> : vector<2x16x16xf32>
    %34 = tpu.matmul %29, %31, %cst_15 {dimension_numbers = #tpu.dot_dimension_numbers<[2], [2], [1], [1], [0, 0, 0, 1, 1, 1], [0], [0]>} : vector<2x16x128xbf16>, vector<2x16x128xbf16>, vector<2x16x16xf32> -> vector<2x16x16xf32>
    %cst_16 = arith.constant -1.000000e+04 : f32
    "tpu.trace_stop"() : () -> ()
    %35 = vector.broadcast %cst_16 : f32 to vector<2x16x16xf32>
    %36 = arith.select %11, %34, %35 : vector<2x16x16xi1>, vector<2x16x16xf32>
    %cst_17 = arith.constant dense<0xFF800000> : vector<2x16xf32>
    %37 = vector.multi_reduction <maximumf>, %36, %cst_17 [2] : vector<2x16x16xf32> to vector<2x16xf32>
    %38 = vector.shape_cast %37 : vector<2x16xf32> to vector<2x16x1xf32>
    %39 = vector.broadcast %38 : vector<2x16x1xf32> to vector<2x16x16xf32>
    %40 = arith.subf %36, %39 : vector<2x16x16xf32>
    %41 = math.exp %40 : vector<2x16x16xf32>
    %cst_18 = arith.constant dense<0.000000e+00> : vector<2x16xf32>
    %42 = vector.multi_reduction <add>, %41, %cst_18 [2] : vector<2x16x16xf32> to vector<2x16xf32>
    %43 = vector.shape_cast %42 : vector<2x16xf32> to vector<2x16x1xf32>
    %44 = tpu.reciprocal %43 : vector<2x16x1xf32> -> vector<2x16x1xf32>
    %45 = vector.broadcast %44 : vector<2x16x1xf32> to vector<2x16x16xf32>
    %46 = arith.mulf %41, %45 : vector<2x16x16xf32>
    %47 = arith.truncf %46 : vector<2x16x16xf32> to vector<2x16x16xbf16>
    "tpu.trace_start"() <{level = 10 : i32, message = "bqk,bkd->bqd"}> : () -> ()
    %cst_19 = arith.constant dense<0.000000e+00> : vector<2x16x128xf32>
    %48 = tpu.matmul %47, %33, %cst_19 {dimension_numbers = #tpu.dot_dimension_numbers<[2], [1], [1], [2], [0, 0, 0, 1, 1, 2], [0], [0]>} : vector<2x16x16xbf16>, vector<2x16x128xbf16>, vector<2x16x128xf32> -> vector<2x16x128xf32>
    "tpu.trace_stop"() : () -> ()
    %49 = vector.shape_cast %48 : vector<2x16x128xf32> to vector<32x128xf32>
    %50 = arith.truncf %49 : vector<32x128xf32> to vector<32x128xbf16>
    %c0_20 = arith.constant 0 : index
    %c0_21 = arith.constant 0 : index
    %51 = vector.load %arg6[%c0_20, %c0_21] : memref<256x256xbf16, #tpu.memory_space<vmem>>, vector<128x256xbf16>
    %cst_22 = arith.constant dense<0.000000e+00> : vector<32x256xf32>
    %52 = tpu.matmul %50, %51, %cst_22 {dimension_numbers = #tpu.dot_dimension_numbers<[1], [0], [0], [1], [0, 0, 1, 1], [], []>} : vector<32x128xbf16>, vector<128x256xbf16>, vector<32x256xf32> -> vector<32x256xf32>
    %53 = arith.addf %27, %52 : vector<32x256xf32>
    %54 = vector.extract_strided_slice %22 {offsets = [0, 0, 128], sizes = [2, 16, 128], strides = [1, 1, 1]} : vector<2x16x256xf32> to vector<2x16x128xf32>
    %55 = arith.truncf %54 : vector<2x16x128xf32> to vector<2x16x128xbf16>
    %56 = vector.extract_strided_slice %24 {offsets = [0, 0, 128], sizes = [2, 16, 128], strides = [1, 1, 1]} : vector<2x16x256xf32> to vector<2x16x128xf32>
    %57 = arith.truncf %56 : vector<2x16x128xf32> to vector<2x16x128xbf16>
    %58 = vector.extract_strided_slice %26 {offsets = [0, 0, 128], sizes = [2, 16, 128], strides = [1, 1, 1]} : vector<2x16x256xf32> to vector<2x16x128xf32>
    %59 = arith.truncf %58 : vector<2x16x128xf32> to vector<2x16x128xbf16>
    "tpu.trace_start"() <{level = 10 : i32, message = "bqd,bkd->bqk"}> : () -> ()
    %cst_23 = arith.constant dense<0.000000e+00> : vector<2x16x16xf32>
    %60 = tpu.matmul %55, %57, %cst_23 {dimension_numbers = #tpu.dot_dimension_numbers<[2], [2], [1], [1], [0, 0, 0, 1, 1, 1], [0], [0]>} : vector<2x16x128xbf16>, vector<2x16x128xbf16>, vector<2x16x16xf32> -> vector<2x16x16xf32>
    %cst_24 = arith.constant -1.000000e+04 : f32
    "tpu.trace_stop"() : () -> ()
    %61 = vector.broadcast %cst_24 : f32 to vector<2x16x16xf32>
    %62 = arith.select %11, %60, %61 : vector<2x16x16xi1>, vector<2x16x16xf32>
    %cst_25 = arith.constant dense<0xFF800000> : vector<2x16xf32>
    %63 = vector.multi_reduction <maximumf>, %62, %cst_25 [2] : vector<2x16x16xf32> to vector<2x16xf32>
    %64 = vector.shape_cast %63 : vector<2x16xf32> to vector<2x16x1xf32>
    %65 = vector.broadcast %64 : vector<2x16x1xf32> to vector<2x16x16xf32>
    %66 = arith.subf %62, %65 : vector<2x16x16xf32>
    %67 = math.exp %66 : vector<2x16x16xf32>
    %cst_26 = arith.constant dense<0.000000e+00> : vector<2x16xf32>
    %68 = vector.multi_reduction <add>, %67, %cst_26 [2] : vector<2x16x16xf32> to vector<2x16xf32>
    %69 = vector.shape_cast %68 : vector<2x16xf32> to vector<2x16x1xf32>
    %70 = tpu.reciprocal %69 : vector<2x16x1xf32> -> vector<2x16x1xf32>
    %71 = vector.broadcast %70 : vector<2x16x1xf32> to vector<2x16x16xf32>
    %72 = arith.mulf %67, %71 : vector<2x16x16xf32>
    %73 = arith.truncf %72 : vector<2x16x16xf32> to vector<2x16x16xbf16>
    "tpu.trace_start"() <{level = 10 : i32, message = "bqk,bkd->bqd"}> : () -> ()
    %cst_27 = arith.constant dense<0.000000e+00> : vector<2x16x128xf32>
    %74 = tpu.matmul %73, %59, %cst_27 {dimension_numbers = #tpu.dot_dimension_numbers<[2], [1], [1], [2], [0, 0, 0, 1, 1, 2], [0], [0]>} : vector<2x16x16xbf16>, vector<2x16x128xbf16>, vector<2x16x128xf32> -> vector<2x16x128xf32>
    "tpu.trace_stop"() : () -> ()
    %75 = vector.shape_cast %74 : vector<2x16x128xf32> to vector<32x128xf32>
    %76 = arith.truncf %75 : vector<32x128xf32> to vector<32x128xbf16>
    %c128 = arith.constant 128 : index
    %c0_28 = arith.constant 0 : index
    %77 = vector.load %arg6[%c128, %c0_28] : memref<256x256xbf16, #tpu.memory_space<vmem>>, vector<128x256xbf16>
    %cst_29 = arith.constant dense<0.000000e+00> : vector<32x256xf32>
    %78 = tpu.matmul %76, %77, %cst_29 {dimension_numbers = #tpu.dot_dimension_numbers<[1], [0], [0], [1], [0, 0, 1, 1], [], []>} : vector<32x128xbf16>, vector<128x256xbf16>, vector<32x256xf32> -> vector<32x256xf32>
    %79 = arith.addf %53, %78 : vector<32x256xf32>
    %c0_30 = arith.constant 0 : index
    %c0_31 = arith.constant 0 : index
    %80 = vector.load %arg7[%c0_30, %c0_31] : memref<1x256xf32, #tpu.memory_space<vmem>>, vector<1x256xf32>
    %81 = vector.broadcast %80 : vector<1x256xf32> to vector<32x256xf32>
    %82 = arith.addf %79, %81 : vector<32x256xf32>
    %83 = arith.addf %82, %1 : vector<32x256xf32>
    %cst_32 = arith.constant dense<0.000000e+00> : vector<32xf32>
    %84 = vector.multi_reduction <add>, %83, %cst_32 [1] : vector<32x256xf32> to vector<32xf32>
    %85 = vector.shape_cast %84 : vector<32xf32> to vector<32x1xf32>
    %cst_33 = arith.constant 2.560000e+02 : f32
    %86 = vector.broadcast %cst_33 : f32 to vector<32x1xf32>
    %87 = arith.divf %85, %86 : vector<32x1xf32>
    %88 = vector.broadcast %87 : vector<32x1xf32> to vector<32x256xf32>
    %89 = arith.subf %83, %88 : vector<32x256xf32>
    %90 = vector.broadcast %87 : vector<32x1xf32> to vector<32x256xf32>
    %91 = arith.subf %83, %90 : vector<32x256xf32>
    %92 = arith.mulf %89, %91 : vector<32x256xf32>
    %cst_34 = arith.constant dense<0.000000e+00> : vector<32xf32>
    %93 = vector.multi_reduction <add>, %92, %cst_34 [1] : vector<32x256xf32> to vector<32xf32>
    %94 = vector.shape_cast %93 : vector<32xf32> to vector<32x1xf32>
    %cst_35 = arith.constant 2.560000e+02 : f32
    %95 = vector.broadcast %cst_35 : f32 to vector<32x1xf32>
    %96 = arith.divf %94, %95 : vector<32x1xf32>
    %97 = vector.broadcast %87 : vector<32x1xf32> to vector<32x256xf32>
    %98 = arith.subf %83, %97 : vector<32x256xf32>
    %cst_36 = arith.constant 9.99999974E-6 : f32
    %99 = vector.broadcast %cst_36 : f32 to vector<32x1xf32>
    %100 = arith.addf %96, %99 : vector<32x1xf32>
    %101 = math.rsqrt %100 : vector<32x1xf32>
    %102 = vector.broadcast %101 : vector<32x1xf32> to vector<32x256xf32>
    %103 = arith.mulf %98, %102 : vector<32x256xf32>
    %c0_37 = arith.constant 0 : index
    %c0_38 = arith.constant 0 : index
    %104 = vector.load %arg8[%c0_37, %c0_38] : memref<1x256xf32, #tpu.memory_space<vmem>>, vector<1x256xf32>
    %105 = vector.broadcast %104 : vector<1x256xf32> to vector<32x256xf32>
    %106 = arith.mulf %103, %105 : vector<32x256xf32>
    %c0_39 = arith.constant 0 : index
    %c0_40 = arith.constant 0 : index
    %107 = vector.load %arg9[%c0_39, %c0_40] : memref<1x256xf32, #tpu.memory_space<vmem>>, vector<1x256xf32>
    %108 = vector.broadcast %107 : vector<1x256xf32> to vector<32x256xf32>
    %109 = arith.addf %106, %108 : vector<32x256xf32>
    %c0_41 = arith.constant 0 : index
    %c0_42 = arith.constant 0 : index
    %c0_43 = arith.constant 0 : index
    %110 = vector.load %arg1[%c0_41, %c0_42, %c0_43] : memref<2x24x256xf32, #tpu.memory_space<vmem>>, vector<2x24x256xf32>
    %111 = vector.shape_cast %110 : vector<2x24x256xf32> to vector<48x256xf32>
    %112 = arith.truncf %111 : vector<48x256xf32> to vector<48x256xbf16>
    %c0_44 = arith.constant 0 : index
    %c0_45 = arith.constant 0 : index
    %113 = vector.load %arg12[%c0_44, %c0_45] : memref<256x512xbf16, #tpu.memory_space<vmem>>, vector<256x512xbf16>
    %cst_46 = arith.constant dense<0.000000e+00> : vector<48x512xf32>
    %114 = tpu.matmul %112, %113, %cst_46 {dimension_numbers = #tpu.dot_dimension_numbers<[1], [0], [0], [1], [0, 0, 1, 1], [], []>} : vector<48x256xbf16>, vector<256x512xbf16>, vector<48x512xf32> -> vector<48x512xf32>
    %c0_47 = arith.constant 0 : index
    %c0_48 = arith.constant 0 : index
    %115 = vector.load %arg13[%c0_47, %c0_48] : memref<1x512xf32, #tpu.memory_space<vmem>>, vector<1x512xf32>
    %116 = vector.broadcast %115 : vector<1x512xf32> to vector<48x512xf32>
    %117 = arith.addf %114, %116 : vector<48x512xf32>
    %118 = vector.extract_strided_slice %117 {offsets = [0, 0], sizes = [48, 256], strides = [1, 1]} : vector<48x512xf32> to vector<48x256xf32>
    %119 = vector.shape_cast %118 : vector<48x256xf32> to vector<2x24x256xf32>
    %120 = vector.extract_strided_slice %117 {offsets = [0, 256], sizes = [48, 256], strides = [1, 1]} : vector<48x512xf32> to vector<48x256xf32>
    %121 = vector.shape_cast %120 : vector<48x256xf32> to vector<2x24x256xf32>
    %122 = arith.truncf %109 : vector<32x256xf32> to vector<32x256xbf16>
    %c0_49 = arith.constant 0 : index
    %c0_50 = arith.constant 0 : index
    %123 = vector.load %arg10[%c0_49, %c0_50] : memref<256x256xbf16, #tpu.memory_space<vmem>>, vector<256x256xbf16>
    %cst_51 = arith.constant dense<0.000000e+00> : vector<32x256xf32>
    %124 = tpu.matmul %122, %123, %cst_51 {dimension_numbers = #tpu.dot_dimension_numbers<[1], [0], [0], [1], [0, 0, 1, 1], [], []>} : vector<32x256xbf16>, vector<256x256xbf16>, vector<32x256xf32> -> vector<32x256xf32>
    %c0_52 = arith.constant 0 : index
    %c0_53 = arith.constant 0 : index
    %125 = vector.load %arg11[%c0_52, %c0_53] : memref<1x256xf32, #tpu.memory_space<vmem>>, vector<1x256xf32>
    %126 = vector.broadcast %125 : vector<1x256xf32> to vector<32x256xf32>
    %127 = arith.addf %124, %126 : vector<32x256xf32>
    %128 = vector.shape_cast %127 : vector<32x256xf32> to vector<2x16x256xf32>
    %cst_54 = arith.constant 0.000000e+00 : f32
    %129 = vector.broadcast %cst_54 : f32 to vector<32x256xf32>
    %130 = vector.extract_strided_slice %128 {offsets = [0, 0, 0], sizes = [2, 16, 128], strides = [1, 1, 1]} : vector<2x16x256xf32> to vector<2x16x128xf32>
    %131 = arith.truncf %130 : vector<2x16x128xf32> to vector<2x16x128xbf16>
    %132 = vector.extract_strided_slice %119 {offsets = [0, 0, 0], sizes = [2, 24, 128], strides = [1, 1, 1]} : vector<2x24x256xf32> to vector<2x24x128xf32>
    %133 = arith.truncf %132 : vector<2x24x128xf32> to vector<2x24x128xbf16>
    %134 = vector.extract_strided_slice %121 {offsets = [0, 0, 0], sizes = [2, 24, 128], strides = [1, 1, 1]} : vector<2x24x256xf32> to vector<2x24x128xf32>
    %135 = arith.truncf %134 : vector<2x24x128xf32> to vector<2x24x128xbf16>
    "tpu.trace_start"() <{level = 10 : i32, message = "bqd,bkd->bqk"}> : () -> ()
    %cst_55 = arith.constant dense<0.000000e+00> : vector<2x16x24xf32>
    %136 = tpu.matmul %131, %133, %cst_55 {dimension_numbers = #tpu.dot_dimension_numbers<[2], [2], [1], [1], [0, 0, 0, 1, 1, 1], [0], [0]>} : vector<2x16x128xbf16>, vector<2x24x128xbf16>, vector<2x16x24xf32> -> vector<2x16x24xf32>
    %cst_56 = arith.constant -1.000000e+04 : f32
    "tpu.trace_stop"() : () -> ()
    %137 = vector.shape_cast %14 : vector<2x1x24xi1> to vector<2x1x24xi1>
    %138 = vector.broadcast %137 : vector<2x1x24xi1> to vector<2x16x24xi1>
    %139 = vector.broadcast %cst_56 : f32 to vector<2x16x24xf32>
    %140 = arith.select %138, %136, %139 : vector<2x16x24xi1>, vector<2x16x24xf32>
    %cst_57 = arith.constant dense<0xFF800000> : vector<2x16xf32>
    %141 = vector.multi_reduction <maximumf>, %140, %cst_57 [2] : vector<2x16x24xf32> to vector<2x16xf32>
    %142 = vector.shape_cast %141 : vector<2x16xf32> to vector<2x16x1xf32>
    %143 = vector.broadcast %142 : vector<2x16x1xf32> to vector<2x16x24xf32>
    %144 = arith.subf %140, %143 : vector<2x16x24xf32>
    %145 = math.exp %144 : vector<2x16x24xf32>
    %cst_58 = arith.constant dense<0.000000e+00> : vector<2x16xf32>
    %146 = vector.multi_reduction <add>, %145, %cst_58 [2] : vector<2x16x24xf32> to vector<2x16xf32>
    %147 = vector.shape_cast %146 : vector<2x16xf32> to vector<2x16x1xf32>
    %148 = tpu.reciprocal %147 : vector<2x16x1xf32> -> vector<2x16x1xf32>
    %149 = vector.broadcast %148 : vector<2x16x1xf32> to vector<2x16x24xf32>
    %150 = arith.mulf %145, %149 : vector<2x16x24xf32>
    %151 = arith.truncf %150 : vector<2x16x24xf32> to vector<2x16x24xbf16>
    "tpu.trace_start"() <{level = 10 : i32, message = "bqk,bkd->bqd"}> : () -> ()
    %cst_59 = arith.constant dense<0.000000e+00> : vector<2x16x128xf32>
    %152 = tpu.matmul %151, %135, %cst_59 {dimension_numbers = #tpu.dot_dimension_numbers<[2], [1], [1], [2], [0, 0, 0, 1, 1, 2], [0], [0]>} : vector<2x16x24xbf16>, vector<2x24x128xbf16>, vector<2x16x128xf32> -> vector<2x16x128xf32>
    "tpu.trace_stop"() : () -> ()
    %153 = vector.shape_cast %152 : vector<2x16x128xf32> to vector<32x128xf32>
    %154 = arith.truncf %153 : vector<32x128xf32> to vector<32x128xbf16>
    %c0_60 = arith.constant 0 : index
    %c0_61 = arith.constant 0 : index
    %155 = vector.load %arg14[%c0_60, %c0_61] : memref<256x256xbf16, #tpu.memory_space<vmem>>, vector<128x256xbf16>
    %cst_62 = arith.constant dense<0.000000e+00> : vector<32x256xf32>
    %156 = tpu.matmul %154, %155, %cst_62 {dimension_numbers = #tpu.dot_dimension_numbers<[1], [0], [0], [1], [0, 0, 1, 1], [], []>} : vector<32x128xbf16>, vector<128x256xbf16>, vector<32x256xf32> -> vector<32x256xf32>
    %157 = arith.addf %129, %156 : vector<32x256xf32>
    %158 = vector.extract_strided_slice %128 {offsets = [0, 0, 128], sizes = [2, 16, 128], strides = [1, 1, 1]} : vector<2x16x256xf32> to vector<2x16x128xf32>
    %159 = arith.truncf %158 : vector<2x16x128xf32> to vector<2x16x128xbf16>
    %160 = vector.extract_strided_slice %119 {offsets = [0, 0, 128], sizes = [2, 24, 128], strides = [1, 1, 1]} : vector<2x24x256xf32> to vector<2x24x128xf32>
    %161 = arith.truncf %160 : vector<2x24x128xf32> to vector<2x24x128xbf16>
    %162 = vector.extract_strided_slice %121 {offsets = [0, 0, 128], sizes = [2, 24, 128], strides = [1, 1, 1]} : vector<2x24x256xf32> to vector<2x24x128xf32>
    %163 = arith.truncf %162 : vector<2x24x128xf32> to vector<2x24x128xbf16>
    "tpu.trace_start"() <{level = 10 : i32, message = "bqd,bkd->bqk"}> : () -> ()
    %cst_63 = arith.constant dense<0.000000e+00> : vector<2x16x24xf32>
    %164 = tpu.matmul %159, %161, %cst_63 {dimension_numbers = #tpu.dot_dimension_numbers<[2], [2], [1], [1], [0, 0, 0, 1, 1, 1], [0], [0]>} : vector<2x16x128xbf16>, vector<2x24x128xbf16>, vector<2x16x24xf32> -> vector<2x16x24xf32>
    %cst_64 = arith.constant -1.000000e+04 : f32
    "tpu.trace_stop"() : () -> ()
    %165 = vector.shape_cast %14 : vector<2x1x24xi1> to vector<2x1x24xi1>
    %166 = vector.broadcast %165 : vector<2x1x24xi1> to vector<2x16x24xi1>
    %167 = vector.broadcast %cst_64 : f32 to vector<2x16x24xf32>
    %168 = arith.select %166, %164, %167 : vector<2x16x24xi1>, vector<2x16x24xf32>
    %cst_65 = arith.constant dense<0xFF800000> : vector<2x16xf32>
    %169 = vector.multi_reduction <maximumf>, %168, %cst_65 [2] : vector<2x16x24xf32> to vector<2x16xf32>
    %170 = vector.shape_cast %169 : vector<2x16xf32> to vector<2x16x1xf32>
    %171 = vector.broadcast %170 : vector<2x16x1xf32> to vector<2x16x24xf32>
    %172 = arith.subf %168, %171 : vector<2x16x24xf32>
    %173 = math.exp %172 : vector<2x16x24xf32>
    %cst_66 = arith.constant dense<0.000000e+00> : vector<2x16xf32>
    %174 = vector.multi_reduction <add>, %173, %cst_66 [2] : vector<2x16x24xf32> to vector<2x16xf32>
    %175 = vector.shape_cast %174 : vector<2x16xf32> to vector<2x16x1xf32>
    %176 = tpu.reciprocal %175 : vector<2x16x1xf32> -> vector<2x16x1xf32>
    %177 = vector.broadcast %176 : vector<2x16x1xf32> to vector<2x16x24xf32>
    %178 = arith.mulf %173, %177 : vector<2x16x24xf32>
    %179 = arith.truncf %178 : vector<2x16x24xf32> to vector<2x16x24xbf16>
    "tpu.trace_start"() <{level = 10 : i32, message = "bqk,bkd->bqd"}> : () -> ()
    %cst_67 = arith.constant dense<0.000000e+00> : vector<2x16x128xf32>
    %180 = tpu.matmul %179, %163, %cst_67 {dimension_numbers = #tpu.dot_dimension_numbers<[2], [1], [1], [2], [0, 0, 0, 1, 1, 2], [0], [0]>} : vector<2x16x24xbf16>, vector<2x24x128xbf16>, vector<2x16x128xf32> -> vector<2x16x128xf32>
    "tpu.trace_stop"() : () -> ()
    %181 = vector.shape_cast %180 : vector<2x16x128xf32> to vector<32x128xf32>
    %182 = arith.truncf %181 : vector<32x128xf32> to vector<32x128xbf16>
    %c128_68 = arith.constant 128 : index
    %c0_69 = arith.constant 0 : index
    %183 = vector.load %arg14[%c128_68, %c0_69] : memref<256x256xbf16, #tpu.memory_space<vmem>>, vector<128x256xbf16>
    %cst_70 = arith.constant dense<0.000000e+00> : vector<32x256xf32>
    %184 = tpu.matmul %182, %183, %cst_70 {dimension_numbers = #tpu.dot_dimension_numbers<[1], [0], [0], [1], [0, 0, 1, 1], [], []>} : vector<32x128xbf16>, vector<128x256xbf16>, vector<32x256xf32> -> vector<32x256xf32>
    %185 = arith.addf %157, %184 : vector<32x256xf32>
    %c0_71 = arith.constant 0 : index
    %c0_72 = arith.constant 0 : index
    %186 = vector.load %arg15[%c0_71, %c0_72] : memref<1x256xf32, #tpu.memory_space<vmem>>, vector<1x256xf32>
    %187 = vector.broadcast %186 : vector<1x256xf32> to vector<32x256xf32>
    %188 = arith.addf %185, %187 : vector<32x256xf32>
    %189 = arith.addf %188, %109 : vector<32x256xf32>
    %cst_73 = arith.constant dense<0.000000e+00> : vector<32xf32>
    %190 = vector.multi_reduction <add>, %189, %cst_73 [1] : vector<32x256xf32> to vector<32xf32>
    %191 = vector.shape_cast %190 : vector<32xf32> to vector<32x1xf32>
    %cst_74 = arith.constant 2.560000e+02 : f32
    %192 = vector.broadcast %cst_74 : f32 to vector<32x1xf32>
    %193 = arith.divf %191, %192 : vector<32x1xf32>
    %194 = vector.broadcast %193 : vector<32x1xf32> to vector<32x256xf32>
    %195 = arith.subf %189, %194 : vector<32x256xf32>
    %196 = vector.broadcast %193 : vector<32x1xf32> to vector<32x256xf32>
    %197 = arith.subf %189, %196 : vector<32x256xf32>
    %198 = arith.mulf %195, %197 : vector<32x256xf32>
    %cst_75 = arith.constant dense<0.000000e+00> : vector<32xf32>
    %199 = vector.multi_reduction <add>, %198, %cst_75 [1] : vector<32x256xf32> to vector<32xf32>
    %200 = vector.shape_cast %199 : vector<32xf32> to vector<32x1xf32>
    %cst_76 = arith.constant 2.560000e+02 : f32
    %201 = vector.broadcast %cst_76 : f32 to vector<32x1xf32>
    %202 = arith.divf %200, %201 : vector<32x1xf32>
    %203 = vector.broadcast %193 : vector<32x1xf32> to vector<32x256xf32>
    %204 = arith.subf %189, %203 : vector<32x256xf32>
    %cst_77 = arith.constant 9.99999974E-6 : f32
    %205 = vector.broadcast %cst_77 : f32 to vector<32x1xf32>
    %206 = arith.addf %202, %205 : vector<32x1xf32>
    %207 = math.rsqrt %206 : vector<32x1xf32>
    %208 = vector.broadcast %207 : vector<32x1xf32> to vector<32x256xf32>
    %209 = arith.mulf %204, %208 : vector<32x256xf32>
    %c0_78 = arith.constant 0 : index
    %c0_79 = arith.constant 0 : index
    %210 = vector.load %arg16[%c0_78, %c0_79] : memref<1x256xf32, #tpu.memory_space<vmem>>, vector<1x256xf32>
    %211 = vector.broadcast %210 : vector<1x256xf32> to vector<32x256xf32>
    %212 = arith.mulf %209, %211 : vector<32x256xf32>
    %c0_80 = arith.constant 0 : index
    %c0_81 = arith.constant 0 : index
    %213 = vector.load %arg17[%c0_80, %c0_81] : memref<1x256xf32, #tpu.memory_space<vmem>>, vector<1x256xf32>
    %214 = vector.broadcast %213 : vector<1x256xf32> to vector<32x256xf32>
    %215 = arith.addf %212, %214 : vector<32x256xf32>
    %216 = arith.truncf %215 : vector<32x256xf32> to vector<32x256xbf16>
    %c0_82 = arith.constant 0 : index
    %c0_83 = arith.constant 0 : index
    %217 = vector.load %arg18[%c0_82, %c0_83] : memref<256x512xbf16, #tpu.memory_space<vmem>>, vector<256x512xbf16>
    %cst_84 = arith.constant dense<0.000000e+00> : vector<32x512xf32>
    %218 = tpu.matmul %216, %217, %cst_84 {dimension_numbers = #tpu.dot_dimension_numbers<[1], [0], [0], [1], [0, 0, 1, 1], [], []>} : vector<32x256xbf16>, vector<256x512xbf16>, vector<32x512xf32> -> vector<32x512xf32>
    %c0_85 = arith.constant 0 : index
    %c0_86 = arith.constant 0 : index
    %219 = vector.load %arg19[%c0_85, %c0_86] : memref<1x512xf32, #tpu.memory_space<vmem>>, vector<1x512xf32>
    %220 = vector.broadcast %219 : vector<1x512xf32> to vector<32x512xf32>
    %221 = arith.addf %218, %220 : vector<32x512xf32>
    %cst_87 = arith.constant 0.000000e+00 : f32
    %222 = vector.broadcast %cst_87 : f32 to vector<32x512xf32>
    %223 = arith.maximumf %221, %222 : vector<32x512xf32>
    %224 = arith.truncf %223 : vector<32x512xf32> to vector<32x512xbf16>
    %c0_88 = arith.constant 0 : index
    %c0_89 = arith.constant 0 : index
    %225 = vector.load %arg20[%c0_88, %c0_89] : memref<512x256xbf16, #tpu.memory_space<vmem>>, vector<512x256xbf16>
    %cst_90 = arith.constant dense<0.000000e+00> : vector<32x256xf32>
    %226 = tpu.matmul %224, %225, %cst_90 {dimension_numbers = #tpu.dot_dimension_numbers<[1], [0], [0], [1], [0, 0, 1, 1], [], []>} : vector<32x512xbf16>, vector<512x256xbf16>, vector<32x256xf32> -> vector<32x256xf32>
    %c0_91 = arith.constant 0 : index
    %c0_92 = arith.constant 0 : index
    %227 = vector.load %arg21[%c0_91, %c0_92] : memref<1x256xf32, #tpu.memory_space<vmem>>, vector<1x256xf32>
    %228 = vector.broadcast %227 : vector<1x256xf32> to vector<32x256xf32>
    %229 = arith.addf %226, %228 : vector<32x256xf32>
    %230 = arith.addf %215, %229 : vector<32x256xf32>
    %cst_93 = arith.constant dense<0.000000e+00> : vector<32xf32>
    %231 = vector.multi_reduction <add>, %230, %cst_93 [1] : vector<32x256xf32> to vector<32xf32>
    %232 = vector.shape_cast %231 : vector<32xf32> to vector<32x1xf32>
    %cst_94 = arith.constant 2.560000e+02 : f32
    %233 = vector.broadcast %cst_94 : f32 to vector<32x1xf32>
    %234 = arith.divf %232, %233 : vector<32x1xf32>
    %235 = vector.broadcast %234 : vector<32x1xf32> to vector<32x256xf32>
    %236 = arith.subf %230, %235 : vector<32x256xf32>
    %237 = vector.broadcast %234 : vector<32x1xf32> to vector<32x256xf32>
    %238 = arith.subf %230, %237 : vector<32x256xf32>
    %239 = arith.mulf %236, %238 : vector<32x256xf32>
    %cst_95 = arith.constant dense<0.000000e+00> : vector<32xf32>
    %240 = vector.multi_reduction <add>, %239, %cst_95 [1] : vector<32x256xf32> to vector<32xf32>
    %241 = vector.shape_cast %240 : vector<32xf32> to vector<32x1xf32>
    %cst_96 = arith.constant 2.560000e+02 : f32
    %242 = vector.broadcast %cst_96 : f32 to vector<32x1xf32>
    %243 = arith.divf %241, %242 : vector<32x1xf32>
    %244 = vector.broadcast %234 : vector<32x1xf32> to vector<32x256xf32>
    %245 = arith.subf %230, %244 : vector<32x256xf32>
    %cst_97 = arith.constant 9.99999974E-6 : f32
    %246 = vector.broadcast %cst_97 : f32 to vector<32x1xf32>
    %247 = arith.addf %243, %246 : vector<32x1xf32>
    %248 = math.rsqrt %247 : vector<32x1xf32>
    %249 = vector.broadcast %248 : vector<32x1xf32> to vector<32x256xf32>
    %250 = arith.mulf %245, %249 : vector<32x256xf32>
    %c0_98 = arith.constant 0 : index
    %c0_99 = arith.constant 0 : index
    %251 = vector.load %arg22[%c0_98, %c0_99] : memref<1x256xf32, #tpu.memory_space<vmem>>, vector<1x256xf32>
    %252 = vector.broadcast %251 : vector<1x256xf32> to vector<32x256xf32>
    %253 = arith.mulf %250, %252 : vector<32x256xf32>
    %c0_100 = arith.constant 0 : index
    %c0_101 = arith.constant 0 : index
    %254 = vector.load %arg23[%c0_100, %c0_101] : memref<1x256xf32, #tpu.memory_space<vmem>>, vector<1x256xf32>
    %255 = vector.broadcast %254 : vector<1x256xf32> to vector<32x256xf32>
    %256 = arith.addf %253, %255 : vector<32x256xf32>
    %257 = vector.shape_cast %256 : vector<32x256xf32> to vector<2x16x256xf32>
    %c0_102 = arith.constant 0 : index
    %c0_103 = arith.constant 0 : index
    %c0_104 = arith.constant 0 : index
    %258 = vector.load %arg24[%c0_102, %c0_103, %c0_104] : memref<2x16x256xf32, #tpu.memory_space<vmem>>, vector<2x16x256xf32>
    tpu.vector_store %arg24[%c0_102, %c0_103, %c0_104], %257 {strides = array<i32>} : memref<2x16x256xf32, #tpu.memory_space<vmem>>, vector<2x16x256xf32>,
    return
  }
}

</mosaic_0001>

<bundles_post_ra>
// kernel: tpu_custom_call.1
= control target key start
LH: loop header
LB: loop body
LE: loop exit
PB: predicated region body
PF: predicated region fallthrough
CT: control target
= control target key end

     0   :  { %s7466_s0 = inlined_call_operand.hbm [shape: f32[2,16,256], index: 0, kind: input, shape index: {}]   ;;  %s7467_s1 = inlined_call_operand.hbm [shape: f32[2,24,256], index: 1, kind: input, shape index: {}]   ;;  %s7468_s2 = inlined_call_operand.hbm [shape: f32[2,1,16], index: 2, kind: input, shape index: {}]   ;;  %s7469_s3 = inlined_call_operand.hbm [shape: f32[2,1,24], index: 3, kind: input, shape index: {}]   ;;  %s7470_s4 = inlined_call_operand.hbm [shape: bf16[256,768], index: 4, kind: input, shape index: {}]   ;;  %s7471_s5 = inlined_call_operand.vmem [shape: f32[1,768], index: 5, kind: input, shape index: {}]   ;;  %s7472_s6 = inlined_call_operand.hbm [shape: bf16[256,256], index: 6, kind: input, shape index: {}]   ;;  %s7473_s7 = inlined_call_operand.vmem [shape: f32[1,256], index: 7, kind: input, shape index: {}]   ;;  %s7474_s8 = inlined_call_operand.vmem [shape: f32[1,256], index: 8, kind: input, shape index: {}]   ;;  %s7475_s9 = inlined_call_operand.vmem [shape: f32[1,256], index: 9, kind: input, shape index: {}]   ;;  %s7476_s10 = inlined_call_operand.hbm [shape: bf16[256,256], index: 10, kind: input, shape index: {}]   ;;  %s7477_s11 = inlined_call_operand.vmem [shape: f32[1,256], index: 11, kind: input, shape index: {}]   ;;  %s7478_s12 = inlined_call_operand.hbm [shape: bf16[256,512], index: 12, kind: input, shape index: {}]   ;;  %s7479_s13 = inlined_call_operand.vmem [shape: f32[1,512], index: 13, kind: input, shape index: {}]   ;;  %s7480_s14 = inlined_call_operand.hbm [shape: bf16[256,256], index: 14, kind: input, shape index: {}]   ;;  %s7481_s15 = inlined_call_operand.vmem [shape: f32[1,256], index: 15, kind: input, shape index: {}]   ;;  %s7482_s16 = inlined_call_operand.vmem [shape: f32[1,256], index: 16, kind: input, shape index: {}]   ;;  %s7483_s17 = inlined_call_operand.vmem [shape: f32[1,256], index: 17, kind: input, shape index: {}]   ;;  %s7484_s18 = inlined_call_operand.hbm [shape: bf16[256,512], index: 18, kind: input, shape index: {}]   ;;  %s7485_s19 = inlined_call_operand.vmem [shape: f32[1,512], index: 19, kind: input, shape index: {}]   ;;  %s7486_s20 = inlined_call_operand.hbm [shape: bf16[512,256], index: 20, kind: input, shape index: {}]   ;;  %s7487_s21 = inlined_call_operand.vmem [shape: f32[1,256], index: 21, kind: input, shape index: {}]   ;;  %s7488_s22 = inlined_call_operand.vmem [shape: f32[1,256], index: 22, kind: input, shape index: {}]   ;;  %s7489_s23 = inlined_call_operand.vmem [shape: f32[1,256], index: 23, kind: input, shape index: {}]   ;;  %s7490_s24 = inlined_call_operand.hbm [shape: f32[2,16,256], index: 24, kind: output, shape index: {}]  }
   0x1   :  { %7507 = sst [smem:[#allocation28_spill]] %s7466_s0 }
   0x2   :  { %7508 = sst [smem:[#allocation29_spill]] %s7467_s1 }
   0x3   :  { %7509 = sst [smem:[#allocation30_spill]] %s7468_s2 }
   0x4   :  { %7510 = sst [smem:[#allocation31_spill]] %s7469_s3 }
   0x5   :  { %7511 = sst [smem:[#allocation32_spill]] %s7470_s4 }
   0x6   :  { %7512 = sst [smem:[#allocation33_spill]] %s7471_s5 }
   0x7   :  { %7513 = sst [smem:[#allocation34_spill]] %s7472_s6 }
   0x8   :  { %7514 = sst [smem:[#allocation35_spill]] %s7473_s7 }
   0x9   :  { %7515 = sst [smem:[#allocation36_spill]] %s7474_s8 }
   0xa   :  { %7516 = sst [smem:[#allocation37_spill]] %s7489_s23 }
   0xb   :  { %7517 = sst [smem:[#allocation38_spill]] %s7490_s24 }
   0xc   :  { %29 = vsyncpa [#allocation3], 0 }
   0xd   :  { %30 = vsyncpa [#allocation6], 0 }
   0xe   :  { %31 = vsyncpa [#allocation9], 0 }
   0xf   :  { %32 = vsyncpa [#allocation12], 0 }
  0x10   :  { %33 = vsyncpa [#allocation15], 0 }
  0x11   :  { %34 = vsyncpa [#allocation18], 0 }
  0x12   :  { %35 = vsyncpa [#allocation4], 0  ;;  %s6393_s5 = smov [#allocation5]   ;;  %s6394_s27 = smov [#allocation8]  }
  0x13   :  { %s53_s26 = sshll.u32 %s6393_s5, 4  ;;  %s77_s28 = sshll.u32 %s6394_s27, 4  ;;  %s54_s26 = int_to_ptr.vmem [resolvable:$true] %s53_s26  ;;  %s78_s28 = int_to_ptr.vmem [resolvable:$true] %s77_s28 }
  0x14   :  { %s7518_s29 = sld [smem:[#allocation29_spill]] }
  0x1a   :  { %s6115_s0 = scalar_lea.hbm %s7518_s29, 1536 }
  0x1b   :  { %p6116_p0 = scmp.ne.s32.totalorder %s7518_s29, %s6115_s0  ;;  %p6119_p1 = scmp.lt.u32.totalorder %s6115_s0, %s7518_s29 }
  0x1d   :  { %p6121_p2 = pnand %p6119_p1, %p6116_p0 }
  0x1f   :  { %6124 = shalt.err (!%p6121_p2)
}
  0x20   :  { %s6125_s8 = scalar_lea.vmem %s54_s26, 1536  ;;  %p6130_p4 = scmp.lt.s32.totalorder %s54_s26, %s54_s26 }
  0x21   :  { %p6126_p3 = scmp.ne.s32.totalorder %s54_s26, %s6125_s8  ;;  %p6131_p5 = scmp.lt.s32.totalorder %s6125_s8, %s6125_s8 }
  0x23   :  { %p6132_p6 = por %p6131_p5, %p6130_p4 }
  0x25   :  { %p6133_p7 = pnand %p6132_p6, %p6126_p3 }
  0x27   :  { %6136 = shalt.err (!%p6133_p7)
}
  0x28   :  { %s7498_s4 = smov 256   ;;  %s7501_s1 = smov 16  }
  0x29   :  { %59 = dma.hbm_to_vmem [thread:$0]  %s7518_s29, 1536, %s54_s26, [#allocation6], %s7498_s4, %s7498_s4, %s7501_s1  }
  0x2a   :  { %s7519_s0 = sld [smem:[#allocation31_spill]] }
  0x30   :  { %s6137_s7 = scalar_lea.hbm %s7519_s0, 32 }
  0x31   :  { %p6138_p8 = scmp.ne.s32.totalorder %s7519_s0, %s6137_s7  ;;  %p6141_p9 = scmp.lt.u32.totalorder %s6137_s7, %s7519_s0 }
  0x33   :  { %p6143_p10 = pnand %p6141_p9, %p6138_p8 }
  0x35   :  { %6146 = shalt.err (!%p6143_p10)
}
  0x36   :  { %s6147_s24 = scalar_lea.vmem %s78_s28, 32  ;;  %p6152_p12 = scmp.lt.s32.totalorder %s78_s28, %s78_s28 }
  0x37   :  { %p6148_p11 = scmp.ne.s32.totalorder %s78_s28, %s6147_s24  ;;  %p6153_p13 = scmp.lt.s32.totalorder %s6147_s24, %s6147_s24 }
  0x39   :  { %p6154_p0 = por %p6153_p13, %p6152_p12 }
  0x3b   :  { %p6155_p1 = pnand %p6154_p0, %p6148_p11 }
  0x3d   :  { %6158 = shalt.err (!%p6155_p1)
}
  0x3e   :  { %s7500_s26 = smov 1   ;;  %s6398_s27 = smov [#allocation11]  }
  0x3f   :  { %83 = dma.hbm_to_vmem [thread:$0]  %s7519_s0, 32, %s78_s28, [#allocation9], %s7501_s1, %s7501_s1, %s7500_s26  }
  0x40   :  { %s103_s6 = sshll.u32 %s6398_s27, 4  ;;  %s7520_s30 = sld [smem:[#allocation34_spill]]  ;;  %s104_s6 = int_to_ptr.vmem [resolvable:$true] %s103_s6 }
  0x46   :  { %s6159_s3 = scalar_lea.hbm %s7520_s30, 4096 }
  0x47   :  { %p6160_p2 = scmp.ne.s32.totalorder %s7520_s30, %s6159_s3  ;;  %p6163_p3 = scmp.lt.u32.totalorder %s6159_s3, %s7520_s30 }
  0x49   :  { %p6165_p4 = pnand %p6163_p3, %p6160_p2 }
  0x4b   :  { %6168 = shalt.err (!%p6165_p4)
}
  0x4c   :  { %s6169_s23 = scalar_lea.vmem %s104_s6, 4096  ;;  %p6174_p6 = scmp.lt.s32.totalorder %s104_s6, %s104_s6 }
  0x4d   :  { %p6170_p5 = scmp.ne.s32.totalorder %s104_s6, %s6169_s23  ;;  %p6175_p7 = scmp.lt.s32.totalorder %s6169_s23, %s6169_s23 }
  0x4f   :  { %p6176_p8 = por %p6175_p7, %p6174_p6 }
  0x51   :  { %p6177_p9 = pnand %p6176_p8, %p6170_p5 }
  0x53   :  { %6180 = shalt.err (!%p6177_p9)
}
  0x54   :  { %s7503_s28 = smov 128   ;;  %s7505_s0 = smov 8  }
  0x55   :  { %109 = dma.hbm_to_vmem [thread:$0]  %s7520_s30, 4096, %s104_s6, [#allocation12], %s7503_s28, %s7503_s28, %s7505_s0  }
  0x56   :  { %s6401_s4 = smov [#allocation14]   ;;  %s6402_s2 = smov [#allocation17]  }
  0x57   :  { %s135_s27 = sshll.u32 %s6401_s4, 4  ;;  %s167_s7 = sshll.u32 %s6402_s2, 4  ;;  %s136_s27 = int_to_ptr.vmem [resolvable:$true] %s135_s27  ;;  %s6585_s7 = int_to_ptr.vmem [resolvable:$true] %s167_s7 }
  0x58   :  { %s6181_s25 = scalar_lea.hbm %s7478_s12, 8192 }
  0x59   :  { %p6182_p10 = scmp.ne.s32.totalorder %s7478_s12, %s6181_s25  ;;  %p6185_p11 = scmp.lt.u32.totalorder %s6181_s25, %s7478_s12 }
  0x5b   :  { %p6187_p12 = pnand %p6185_p11, %p6182_p10 }
  0x5d   :  { %6190 = shalt.err (!%p6187_p12)
}
  0x5e   :  { %s6191_s6 = scalar_lea.vmem %s136_s27, 8192  ;;  %p6196_p0 = scmp.lt.s32.totalorder %s136_s27, %s136_s27 }
  0x5f   :  { %p6192_p13 = scmp.ne.s32.totalorder %s136_s27, %s6191_s6  ;;  %p6197_p1 = scmp.lt.s32.totalorder %s6191_s6, %s6191_s6 }
  0x61   :  { %p6198_p2 = por %p6197_p1, %p6196_p0 }
  0x63   :  { %p6199_p3 = pnand %p6198_p2, %p6192_p13 }
  0x65   :  { %6202 = shalt.err (!%p6199_p3)
}
  0x66   :  { %s7521_s30 = smov 16   ;;  %s7522_s29 = smov 256  }
  0x67   :  { %141 = dma.hbm_to_vmem [thread:$0]  %s7478_s12, 8192, %s136_s27, [#allocation15], %s7522_s29, %s7522_s29, %s7521_s30  }
  0x68   :  { %s6203_s1 = scalar_lea.hbm %s7484_s18, 8192 }
  0x69   :  { %p6204_p4 = scmp.ne.s32.totalorder %s7484_s18, %s6203_s1  ;;  %p6207_p5 = scmp.lt.u32.totalorder %s6203_s1, %s7484_s18 }
  0x6b   :  { %p6209_p6 = pnand %p6207_p5, %p6204_p4 }
  0x6d   :  { %6212 = shalt.err (!%p6209_p6)
}
  0x6e   :  { %s6213_s8 = scalar_lea.vmem %s6585_s7, 8192  ;;  %p6218_p8 = scmp.lt.s32.totalorder %s6585_s7, %s6585_s7 }
  0x6f   :  { %p6214_p7 = scmp.ne.s32.totalorder %s6585_s7, %s6213_s8  ;;  %p6219_p9 = scmp.lt.s32.totalorder %s6213_s8, %s6213_s8 }
  0x71   :  { %p6220_p10 = por %p6219_p9, %p6218_p8 }
  0x73   :  { %p6221_p11 = pnand %p6220_p10, %p6214_p7 }
  0x75   :  { %6224 = shalt.err (!%p6221_p11)
}
  0x76   :  { %173 = dma.hbm_to_vmem [thread:$0]  %s7484_s18, 8192, %s6585_s7, [#allocation18], %s7522_s29, %s7522_s29, %s7521_s30  }
  0x77   :  { %s6403_s6 = smov [#allocation2]   ;;  %s6404_s4 = smov [#allocation7]  }
  0x78   :  { %s41_s5 = sshll.u32 %s6403_s6, 4  ;;  %s65_s2 = sshll.u32 %s6404_s4, 4  ;;  %s42_s5 = int_to_ptr.vmem [resolvable:$true] %s41_s5  ;;  %s6622_s2 = int_to_ptr.vmem [resolvable:$true] %s65_s2 }
  0x79   :  { %s7523_s26 = sld [smem:[#allocation28_spill]] }
  0x7f   :  { %s6225_s3 = scalar_lea.hbm %s7523_s26, 1024 }
  0x80   :  { %p6226_p12 = scmp.ne.s32.totalorder %s7523_s26, %s6225_s3  ;;  %p6229_p13 = scmp.lt.u32.totalorder %s6225_s3, %s7523_s26 }
  0x82   :  { %p6231_p0 = pnand %p6229_p13, %p6226_p12 }
  0x84   :  { %6234 = shalt.err (!%p6231_p0)
}
  0x85   :  { %s6235_s18 = scalar_lea.vmem %s42_s5, 1024  ;;  %p6240_p2 = scmp.lt.s32.totalorder %s42_s5, %s42_s5 }
  0x86   :  { %p6236_p1 = scmp.ne.s32.totalorder %s42_s5, %s6235_s18  ;;  %p6241_p3 = scmp.lt.s32.totalorder %s6235_s18, %s6235_s18 }
  0x88   :  { %p6242_p4 = por %p6241_p3, %p6240_p2 }
  0x8a   :  { %p6243_p5 = pnand %p6242_p4, %p6236_p1 }
  0x8c   :  { %6246 = shalt.err (!%p6243_p5)
}
  0x8d   :  { %47 = dma.hbm_to_vmem [thread:$0]  %s7523_s26, 1024, %s42_s5, [#allocation3], %s7522_s29, %s7522_s29, %s7521_s30  }
  0x8e   :  { %s7524_s28 = sld [smem:[#allocation30_spill]] }
  0x94   :  { %s6247_s4 = scalar_lea.hbm %s7524_s28, 32 }
  0x95   :  { %p6248_p6 = scmp.ne.s32.totalorder %s7524_s28, %s6247_s4  ;;  %p6251_p7 = scmp.lt.u32.totalorder %s6247_s4, %s7524_s28 }
  0x97   :  { %p6253_p8 = pnand %p6251_p7, %p6248_p6 }
  0x99   :  { %6256 = shalt.err (!%p6253_p8)
}
  0x9a   :  { %s6257_s24 = scalar_lea.vmem %s6622_s2, 32  ;;  %p6262_p10 = scmp.lt.s32.totalorder %s6622_s2, %s6622_s2 }
  0x9b   :  { %p6258_p9 = scmp.ne.s32.totalorder %s6622_s2, %s6257_s24  ;;  %p6263_p11 = scmp.lt.s32.totalorder %s6257_s24, %s6257_s24 }
  0x9d   :  { %p6264_p12 = por %p6263_p11, %p6262_p10 }
  0x9f   :  { %p6265_p13 = pnand %p6264_p12, %p6258_p9 }
  0xa1   :  { %6268 = shalt.err (!%p6265_p13)
}
  0xa2   :  { %s7525_s5 = smov 1   ;;  %s6405_s18 = smov [#allocation10]  }
  0xa3   :  { %71 = dma.hbm_to_vmem [thread:$0]  %s7524_s28, 32, %s6622_s2, [#allocation6], %s7521_s30, %s7521_s30, %s7525_s5  }
  0xa4   :  { %s89_s7 = sshll.u32 %s6405_s18, 4  ;;  %s7526_s6 = sld [smem:[#allocation32_spill]]  ;;  %s90_s7 = int_to_ptr.vmem [resolvable:$true] %s89_s7 }
  0xaa   :  { %s6269_s4 = scalar_lea.hbm %s7526_s6, 12288 }
  0xab   :  { %p6270_p0 = scmp.ne.s32.totalorder %s7526_s6, %s6269_s4  ;;  %p6273_p1 = scmp.lt.u32.totalorder %s6269_s4, %s7526_s6 }
  0xad   :  { %p6275_p2 = pnand %p6273_p1, %p6270_p0 }
  0xaf   :  { %6278 = shalt.err (!%p6275_p2)
}
  0xb0   :  { %s6279_s24 = scalar_lea.vmem %s90_s7, 12288  ;;  %p6284_p4 = scmp.lt.s32.totalorder %s90_s7, %s90_s7 }
  0xb1   :  { %p6280_p3 = scmp.ne.s32.totalorder %s90_s7, %s6279_s24  ;;  %p6285_p5 = scmp.lt.s32.totalorder %s6279_s24, %s6279_s24 }
  0xb3   :  { %p6286_p6 = por %p6285_p5, %p6284_p4 }
  0xb5   :  { %p6287_p7 = pnand %p6286_p6, %p6280_p3 }
  0xb7   :  { %6290 = shalt.err (!%p6287_p7)
}
  0xb8   :  { %s6406_s2 = smov 384   ;;  %s6407_s28 = smov 24  }
  0xb9   :  { %95 = dma.hbm_to_vmem [thread:$0]  %s7526_s6, 12288, %s90_s7, [#allocation9], %s6406_s2, %s6406_s2, %s6407_s28  }
  0xba   :  { %s6408_s8 = smov [#allocation13]   ;;  %s6409_s12 = smov [#allocation16]  }
  0xbb   :  { %s121_s18 = sshll.u32 %s6408_s8, 4  ;;  %s149_s27 = sshll.u32 %s6409_s12, 4  ;;  %s122_s18 = int_to_ptr.vmem [resolvable:$true] %s121_s18  ;;  %s150_s27 = int_to_ptr.vmem [resolvable:$true] %s149_s27 }
  0xbc   :  { %s6291_s1 = scalar_lea.hbm %s7476_s10, 4096 }
  0xbd   :  { %p6292_p8 = scmp.ne.s32.totalorder %s7476_s10, %s6291_s1  ;;  %p6295_p9 = scmp.lt.u32.totalorder %s6291_s1, %s7476_s10 }
  0xbf   :  { %p6297_p10 = pnand %p6295_p9, %p6292_p8 }
  0xc1   :  { %6300 = shalt.err (!%p6297_p10)
}
  0xc2   :  { %s6301_s7 = scalar_lea.vmem %s122_s18, 4096  ;;  %p6306_p12 = scmp.lt.s32.totalorder %s122_s18, %s122_s18 }
  0xc3   :  { %p6302_p11 = scmp.ne.s32.totalorder %s122_s18, %s6301_s7  ;;  %p6307_p13 = scmp.lt.s32.totalorder %s6301_s7, %s6301_s7 }
  0xc5   :  { %p6308_p0 = por %p6307_p13, %p6306_p12 }
  0xc7   :  { %p6309_p1 = pnand %p6308_p0, %p6302_p11 }
  0xc9   :  { %6312 = shalt.err (!%p6309_p1)
}
  0xca   :  { %s7527_s6 = smov 8   ;;  %s7528_s2 = smov 128  }
  0xcb   :  { %127 = dma.hbm_to_vmem [thread:$0]  %s7476_s10, 4096, %s122_s18, [#allocation12], %s7528_s2, %s7528_s2, %s7527_s6  }
  0xcc   :  { %s6313_s8 = scalar_lea.hbm %s7480_s14, 4096 }
  0xcd   :  { %p6314_p2 = scmp.ne.s32.totalorder %s7480_s14, %s6313_s8  ;;  %p6317_p3 = scmp.lt.u32.totalorder %s6313_s8, %s7480_s14 }
  0xcf   :  { %p6319_p4 = pnand %p6317_p3, %p6314_p2 }
  0xd1   :  { %6322 = shalt.err (!%p6319_p4)
}
  0xd2   :  { %s6323_s3 = scalar_lea.vmem %s150_s27, 4096  ;;  %p6328_p6 = scmp.lt.s32.totalorder %s150_s27, %s150_s27 }
  0xd3   :  { %p6324_p5 = scmp.ne.s32.totalorder %s150_s27, %s6323_s3  ;;  %p6329_p7 = scmp.lt.s32.totalorder %s6323_s3, %s6323_s3 }
  0xd5   :  { %p6330_p8 = por %p6329_p7, %p6328_p6 }
  0xd7   :  { %p6331_p9 = pnand %p6330_p8, %p6324_p5 }
  0xd9   :  { %6334 = shalt.err (!%p6331_p9)
}
  0xda   :  { %155 = dma.hbm_to_vmem [thread:$0]  %s7480_s14, 4096, %s150_s27, [#allocation15], %s7528_s2, %s7528_s2, %s7527_s6  }
  0xdb   :  { %s6410_s25 = smov [#allocation19]   ;;  %s6335_s5 = scalar_lea.hbm %s7486_s20, 8192 }
  0xdc   :  { %s181_s24 = sshll.u32 %s6410_s25, 4  ;;  %p6336_p10 = scmp.ne.s32.totalorder %s7486_s20, %s6335_s5  ;;  %s182_s24 = int_to_ptr.vmem [resolvable:$true] %s181_s24 }
  0xdd   :  { %p6339_p11 = scmp.lt.u32.totalorder %s6335_s5, %s7486_s20 }
  0xdf   :  { %p6341_p12 = pnand %p6339_p11, %p6336_p10 }
  0xe1   :  { %6344 = shalt.err (!%p6341_p12)
}
  0xe2   :  { %s6345_s4 = scalar_lea.vmem %s182_s24, 8192  ;;  %p6350_p0 = scmp.lt.s32.totalorder %s182_s24, %s182_s24 }
  0xe3   :  { %p6346_p13 = scmp.ne.s32.totalorder %s182_s24, %s6345_s4  ;;  %p6351_p1 = scmp.lt.s32.totalorder %s6345_s4, %s6345_s4 }
  0xe5   :  { %p6352_p2 = por %p6351_p1, %p6350_p0 }
  0xe7   :  { %p6353_p3 = pnand %p6352_p2, %p6346_p13 }
  0xe9   :  { %6356 = shalt.err (!%p6353_p3)
}
  0xea   :  { %187 = dma.hbm_to_vmem [thread:$0]  %s7486_s20, 8192, %s182_s24, [#allocation18], %s7528_s2, %s7528_s2, %s7527_s6  }
  0xeb   :  { %6379 = dma.done.wait [#allocation3], 1024  }
  0xec   :  { %6380 = vsyncadd [#allocation3], 4294966272 }
  0xed   :  { %6381 = dma.done.wait [#allocation6], 1568  }
  0xee   :  { %6382 = vsyncadd [#allocation6], 4294965728 }
  0xef   :  { %6383 = dma.done.wait [#allocation9], 12320  }
  0xf0   :  { %6384 = vsyncadd [#allocation9], 4294954976 }
  0xf1   :  { %6385 = dma.done.wait [#allocation12], 8192  }
  0xf2   :  { %6386 = vsyncadd [#allocation12], 4294959104 }
  0xf3   :  { %6387 = dma.done.wait [#allocation15], 12288  }
  0xf4   :  { %6388 = vsyncadd [#allocation15], 4294955008 }
  0xf5   :  { %6389 = dma.done.wait [#allocation18], 16384  }
  0xf6   :  { %6390 = vsyncadd [#allocation18], 4294950912  ;;  %v5443_v0 = vld [vmem:[#allocation10 + $0xc] ss:$24 sps:$4 sm:$0xff]   ;;  %v5445_v1 = vld [vmem:[#allocation10 + $0x8] ss:$24 sps:$4 sm:$0xff]  }
  0xf7   :  { %936 = vmatprep.subr.bf16.mxu1 %v5443_v0  ;;  %v5446_v2 = vld [vmem:[#allocation10 + $0x3c] ss:$24 sps:$4 sm:$0xff]   ;;  %v5448_v3 = vld [vmem:[#allocation10 + $0x38] ss:$24 sps:$4 sm:$0xff]   ;;  %v5452_v6 = vld [vmem:[#allocation10 + $0x6c] ss:$24 sps:$4 sm:$0xff]  }
  0xf8   :  { %937 = vmatpush1.bf16.msra.mxu1 %v5445_v1  ;;  %v5449_v4 = vld [vmem:[#allocation10 + $0x4] ss:$24 sps:$4 sm:$0xff]   ;;  %v5451_v5 = vld [vmem:[#allocation10] ss:$24 sps:$4 sm:$0xff]   ;;  %v5455_v7 = vld [vmem:[#allocation10 + $0x34] ss:$24 sps:$4 sm:$0xff]  }
  0xf9   :  { %938 = vmatprep.subr.bf16.mxu1 %v5446_v2  ;;  %883 = vmatprep.subr.bf16.mxu0 %v5449_v4  ;;  %v5457_v8 = vld [vmem:[#allocation10 + $0x30] ss:$24 sps:$4 sm:$0xff]   ;;  %v5458_v10 = vld [vmem:[#allocation10 + $0x9c] ss:$24 sps:$4 sm:$0xff]   ;;  %v5463_v12 = vld [vmem:[#allocation10 + $0x60] ss:$24 sps:$4 sm:$0xff]  }
  0xfa   :  { %884 = vmatpush1.bf16.msra.mxu0 %v5451_v5  ;;  %v5454_v9 = vld [vmem:[#allocation10 + $0x68] ss:$24 sps:$4 sm:$0xff]   ;;  %v5461_v11 = vld [vmem:[#allocation10 + $0x64] ss:$24 sps:$4 sm:$0xff]   ;;  %v5460_v13 = vld [vmem:[#allocation10 + $0x98] ss:$24 sps:$4 sm:$0xff]  }
  0xfb   :  { %885 = vmatprep.subr.bf16.mxu0 %v5455_v7  ;;  %v5467_v14 = vld [vmem:[#allocation10 + $0x94] ss:$24 sps:$4 sm:$0xff]   ;;  %v5469_v16 = vld [vmem:[#allocation10 + $0x90] ss:$24 sps:$4 sm:$0xff]   ;;  %v5473_v18 = vld [vmem:[#allocation10 + $0xc4] ss:$24 sps:$4 sm:$0xff]  }
  0xfc   :  { %939 = vmatpush1.bf16.msra.mxu1 %v5448_v3  ;;  %v5464_v15 = vld [vmem:[#allocation10 + $0xcc] ss:$24 sps:$4 sm:$0xff]   ;;  %v5466_v17 = vld [vmem:[#allocation10 + $0xc8] ss:$24 sps:$4 sm:$0xff]   ;;  %v5470_v19 = vld [vmem:[#allocation10 + $0xfc] ss:$24 sps:$4 sm:$0xff]  }
  0xfd   :  { %940 = vmatprep.subr.bf16.mxu1 %v5452_v6  ;;  %v5475_v20 = vld [vmem:[#allocation10 + $0xc0] ss:$24 sps:$4 sm:$0xff]   ;;  %v5479_v22 = vld [vmem:[#allocation10 + $0xf4] ss:$24 sps:$4 sm:$0xff]   ;;  %v5481_v24 = vld [vmem:[#allocation10 + $0xf0] ss:$24 sps:$4 sm:$0xff]  }
  0xfe   :  { %886 = vmatpush1.bf16.msra.mxu0 %v5457_v8  ;;  %v5472_v21 = vld [vmem:[#allocation10 + $0xf8] ss:$24 sps:$4 sm:$0xff]   ;;  %v5476_v23 = vld [vmem:[#allocation10 + $0x12c] ss:$24 sps:$4 sm:$0xff]   ;;  %v5478_v25 = vld [vmem:[#allocation10 + $0x128] ss:$24 sps:$4 sm:$0xff]  }
  0xff   :  { %887 = vmatprep.subr.bf16.mxu0 %v5461_v11  ;;  %v5485_v26 = vld [vmem:[#allocation10 + $0x124] ss:$24 sps:$4 sm:$0xff]   ;;  %v5487_v28 = vld [vmem:[#allocation10 + $0x120] ss:$24 sps:$4 sm:$0xff]   ;;  %v5491_v30 = vld [vmem:[#allocation10 + $0x154] ss:$24 sps:$4 sm:$0xff]  }
 0x100   :  { %941 = vmatpush1.bf16.msra.mxu1 %v5454_v9  ;;  %v5482_v27 = vld [vmem:[#allocation10 + $0x15c] ss:$24 sps:$4 sm:$0xff]   ;;  %v5484_v29 = vld [vmem:[#allocation10 + $0x158] ss:$24 sps:$4 sm:$0xff]   ;;  %v5488_v31 = vld [vmem:[#allocation10 + $0x18c] ss:$24 sps:$4 sm:$0xff]  }
 0x101   :  { %942 = vmatprep.subr.bf16.mxu1 %v5458_v10  ;;  %v5493_v32 = vld [vmem:[#allocation10 + $0x150] ss:$24 sps:$4 sm:$0xff]   ;;  %v5497_v34 = vld [vmem:[#allocation10 + $0x184] ss:$24 sps:$4 sm:$0xff]   ;;  %v5499_v36 = vld [vmem:[#allocation10 + $0x180] ss:$24 sps:$4 sm:$0xff]  }
 0x102   :  { %888 = vmatpush1.bf16.msra.mxu0 %v5463_v12  ;;  %v5490_v33 = vld [vmem:[#allocation10 + $0x188] ss:$24 sps:$4 sm:$0xff]   ;;  %v5494_v35 = vld [vmem:[#allocation10 + $0x1bc] ss:$24 sps:$4 sm:$0xff]   ;;  %v5496_v37 = vld [vmem:[#allocation10 + $0x1b8] ss:$24 sps:$4 sm:$0xff]  }
 0x103   :  { %889 = vmatprep.subr.bf16.mxu0 %v5467_v14  ;;  %v5503_v38 = vld [vmem:[#allocation10 + $0x1b4] ss:$24 sps:$4 sm:$0xff]   ;;  %v5505_v40 = vld [vmem:[#allocation10 + $0x1b0] ss:$24 sps:$4 sm:$0xff]   ;;  %v5509_v42 = vld [vmem:[#allocation10 + $0x1e4] ss:$24 sps:$4 sm:$0xff]  }
 0x104   :  { %943 = vmatpush1.bf16.msra.mxu1 %v5460_v13  ;;  %v5500_v39 = vld [vmem:[#allocation10 + $0x1ec] ss:$24 sps:$4 sm:$0xff]   ;;  %v5502_v41 = vld [vmem:[#allocation10 + $0x1e8] ss:$24 sps:$4 sm:$0xff]   ;;  %v5506_v43 = vld [vmem:[#allocation10 + $0x21c] ss:$24 sps:$4 sm:$0xff]  }
 0x105   :  { %944 = vmatprep.subr.bf16.mxu1 %v5464_v15  ;;  %v229_v44 = vld [vmem:[#allocation2 + $0x8] sm:$0xff]  ;;  %v231_v45 = vld [vmem:[#allocation2 + $0x18] sm:$0xff]  ;;  %v228_v1 = vld [vmem:[#allocation2] sm:$0xff]  ;;  %vm6412_vm0 = vmmov 0   ;;  %s7529_s2 = sld [smem:[#allocation33_spill]]  ;;  %vm1134_vm7 = vcmask 130048  }
 0x106   :  { %890 = vmatpush1.bf16.msra.mxu0 %v5469_v16  ;;  %v5511_v46 = vld [vmem:[#allocation10 + $0x1e0] ss:$24 sps:$4 sm:$0xff]   ;;  %v6716_v47 = vpack.c.bf16 %v231_v45, %v229_v44  ;;  %v5515_v49 = vld [vmem:[#allocation10 + $0x214] ss:$24 sps:$4 sm:$0xff]   ;;  %v5517_v51 = vld [vmem:[#allocation10 + $0x210] ss:$24 sps:$4 sm:$0xff]   ;;  %v236_v45 = vlaneseq }
 0x107   :  { %891 = vmatprep.subr.bf16.mxu0 %v5473_v18  ;;  %v5508_v48 = vld [vmem:[#allocation10 + $0x218] ss:$24 sps:$4 sm:$0xff]   ;;  %v5512_v50 = vld [vmem:[#allocation10 + $0x24c] ss:$24 sps:$4 sm:$0xff]   ;;  %v5514_v52 = vld [vmem:[#allocation10 + $0x248] ss:$24 sps:$4 sm:$0xff]  }
 0x108   :  { %945 = vmatpush1.bf16.msra.mxu1 %v5466_v17  ;;  %968 = vmatprep.mubr.bf16.mxu1 %v6716_v47  ;;  %v5521_v53 = vld [vmem:[#allocation10 + $0x244] ss:$24 sps:$4 sm:$0xff]   ;;  %v5523_v55 = vld [vmem:[#allocation10 + $0x240] ss:$24 sps:$4 sm:$0xff]   ;;  %v5527_v57 = vld [vmem:[#allocation10 + $0x274] ss:$24 sps:$4 sm:$0xff]  }
 0x109   :  { %946 = vmatprep.subr.bf16.mxu1 %v5470_v19  ;;  %915 = vmatprep.mubr.bf16.mxu0 %v6716_v47  ;;  %v5518_v54 = vld [vmem:[#allocation10 + $0x27c] ss:$24 sps:$4 sm:$0xff]   ;;  %v5520_v56 = vld [vmem:[#allocation10 + $0x278] ss:$24 sps:$4 sm:$0xff]   ;;  %v5524_v58 = vld [vmem:[#allocation10 + $0x2ac] ss:$24 sps:$4 sm:$0xff]  }
 0x10a   :  { %892 = vmatpush1.bf16.msra.mxu0 %v5475_v20  ;;  %v5529_v59 = vld [vmem:[#allocation10 + $0x270] ss:$24 sps:$4 sm:$0xff]   ;;  %v5533_v61 = vld [vmem:[#allocation10 + $0x2a4] ss:$24 sps:$4 sm:$0xff]   ;;  %v5535_v0 = vld [vmem:[#allocation10 + $0x2a0] ss:$24 sps:$4 sm:$0xff]  }
 0x10b   :  { %893 = vmatprep.subr.bf16.mxu0 %v5479_v22  ;;  %v5526_v60 = vld [vmem:[#allocation10 + $0x2a8] ss:$24 sps:$4 sm:$0xff]   ;;  %v5530_v62 = vld [vmem:[#allocation10 + $0x2dc] ss:$24 sps:$4 sm:$0xff]   ;;  %v5532_v63 = vld [vmem:[#allocation10 + $0x2d8] ss:$24 sps:$4 sm:$0xff]  }
 0x10c   :  { %947 = vmatpush1.bf16.msra.mxu1 %v5472_v21  ;;  %v230_v2 = vld [vmem:[#allocation2 + $0x10] sm:$0xff]  ;;  %v233_v4 = vld [vmem:[#allocation2 + $0x28] sm:$0xff]  ;;  %v235_v5 = vld [vmem:[#allocation2 + $0x38] sm:$0xff]  ;;  %v6411_v44 = vmov 0.0   ;;  %s7538_s3 = sld [smem:[#allocation35_spill]]  ;;  %s7539_s25 = sld [smem:[#allocation36_spill]] }
 0x10d   :  { %948 = vmatprep.subr.bf16.mxu1 %v5476_v23  ;;  %v5536_v3 = vld [vmem:[#allocation10 + $0x2d4] ss:$24 sps:$4 sm:$0xff]   ;;  %v6720_v6 = vpack.c.bf16 %v230_v2, %v228_v1  ;;  %v5538_v7 = vld [vmem:[#allocation10 + $0x2d0] ss:$24 sps:$4 sm:$0xff]   ;;  %v6722_v8 = vpack.c.bf16 %v235_v5, %v233_v4  ;;  %v232_v10 = vld [vmem:[#allocation2 + $0x20] sm:$0xff]  ;;  %vm2899_vm12 = vcmask 1043456  }
 0x10e   :  { %894 = vmatpush1.bf16.msra.mxu0 %v5481_v24  ;;  %v5541_v9 = vld [vmem:[#allocation10 + $0x14] ss:$24 sps:$4 sm:$0xff]   ;;  %v5539_v12 = vld [vmem:[#allocation10 + $0x10] ss:$24 sps:$4 sm:$0xff]   ;;  %v5544_v13 = vld [vmem:[#allocation10 + $0x44] ss:$24 sps:$4 sm:$0xff]  }
 0x10f   :  { %895 = vmatprep.subr.bf16.mxu0 %v5485_v26  ;;  %v234_v11 = vld [vmem:[#allocation2 + $0x30] sm:$0xff]  ;;  %v5542_v14 = vld [vmem:[#allocation10 + $0x40] ss:$24 sps:$4 sm:$0xff]   ;;  %v5550_v18 = vld [vmem:[#allocation10 + $0xa4] ss:$24 sps:$4 sm:$0xff]   ;;  %vm2849_vm15 = vcmask 195584  }
 0x110   :  { %949 = vmatpush1.bf16.msra.mxu1 %v5478_v25  ;;  %v5547_v15 = vld [vmem:[#allocation10 + $0x74] ss:$24 sps:$4 sm:$0xff]   ;;  %v6727_v16 = vpack.c.bf16 %v234_v11, %v232_v10  ;;  %v5545_v17 = vld [vmem:[#allocation10 + $0x70] ss:$24 sps:$4 sm:$0xff]   ;;  %v5548_v19 = vld [vmem:[#allocation10 + $0xa0] ss:$24 sps:$4 sm:$0xff]  }
 0x111   :  { %950 = vmatprep.subr.bf16.mxu1 %v5482_v27  ;;  %v5553_v20 = vld [vmem:[#allocation10 + $0xd4] ss:$24 sps:$4 sm:$0xff]   ;;  %v5551_v21 = vld [vmem:[#allocation10 + $0xd0] ss:$24 sps:$4 sm:$0xff]   ;;  %v5556_v22 = vld [vmem:[#allocation10 + $0x104] ss:$24 sps:$4 sm:$0xff]  }
 0x112   :  { %896 = vmatpush1.bf16.msra.mxu0 %v5487_v28  ;;  %v5554_v23 = vld [vmem:[#allocation10 + $0x100] ss:$24 sps:$4 sm:$0xff]   ;;  %v5559_v24 = vld [vmem:[#allocation10 + $0x134] ss:$24 sps:$4 sm:$0xff]   ;;  %v5557_v25 = vld [vmem:[#allocation10 + $0x130] ss:$24 sps:$4 sm:$0xff]  }
 0x113   :  { %897 = vmatprep.subr.bf16.mxu0 %v5491_v30  ;;  %v5562_v26 = vld [vmem:[#allocation10 + $0x164] ss:$24 sps:$4 sm:$0xff]   ;;  %v5560_v27 = vld [vmem:[#allocation10 + $0x160] ss:$24 sps:$4 sm:$0xff]   ;;  %v5565_v28 = vld [vmem:[#allocation10 + $0x194] ss:$24 sps:$4 sm:$0xff]  }
 0x114   :  { %951 = vmatpush1.bf16.msra.mxu1 %v5484_v29  ;;  %v5563_v29 = vld [vmem:[#allocation10 + $0x190] ss:$24 sps:$4 sm:$0xff]   ;;  %v5568_v30 = vld [vmem:[#allocation10 + $0x1c4] ss:$24 sps:$4 sm:$0xff]   ;;  %s7544_s6 = sld [smem:[#allocation37_spill]] }
 0x115   :  { %952 = vmatprep.subr.bf16.mxu1 %v5488_v31  ;;  %v5566_v31 = vld [vmem:[#allocation10 + $0x1c0] ss:$24 sps:$4 sm:$0xff]  }
 0x116   :  { %898 = vmatpush1.bf16.msra.mxu0 %v5493_v32  ;;  %v5571_v32 = vld [vmem:[#allocation10 + $0x1f4] ss:$24 sps:$4 sm:$0xff]  }
 0x117   :  { %899 = vmatprep.subr.bf16.mxu0 %v5497_v34  ;;  %v5574_v34 = vld [vmem:[#allocation10 + $0x224] ss:$24 sps:$4 sm:$0xff]  }
 0x118   :  { %953 = vmatpush1.bf16.msra.mxu1 %v5490_v33  ;;  %v5569_v33 = vld [vmem:[#allocation10 + $0x1f0] ss:$24 sps:$4 sm:$0xff]  }
 0x119   :  { %954 = vmatprep.subr.bf16.mxu1 %v5494_v35  ;;  %v5572_v35 = vld [vmem:[#allocation10 + $0x220] ss:$24 sps:$4 sm:$0xff]  }
 0x11a   :  { %900 = vmatpush1.bf16.msra.mxu0 %v5499_v36  ;;  %v5577_v36 = vld [vmem:[#allocation10 + $0x254] ss:$24 sps:$4 sm:$0xff]  }
 0x11b   :  { %901 = vmatprep.subr.bf16.mxu0 %v5503_v38  ;;  %v5580_v38 = vld [vmem:[#allocation10 + $0x284] ss:$24 sps:$4 sm:$0xff]  }
 0x11c   :  { %955 = vmatpush1.bf16.msra.mxu1 %v5496_v37  ;;  %v5575_v37 = vld [vmem:[#allocation10 + $0x250] ss:$24 sps:$4 sm:$0xff]  }
 0x11d   :  { %956 = vmatprep.subr.bf16.mxu1 %v5500_v39  ;;  %v5578_v39 = vld [vmem:[#allocation10 + $0x280] ss:$24 sps:$4 sm:$0xff]  }
 0x11e   :  { %902 = vmatpush1.bf16.msra.mxu0 %v5505_v40  ;;  %v5583_v40 = vld [vmem:[#allocation10 + $0x2b4] ss:$24 sps:$4 sm:$0xff]  }
 0x11f   :  { %903 = vmatprep.subr.bf16.mxu0 %v5509_v42  ;;  %v5586_v42 = vld [vmem:[#allocation10 + $0x2e4] ss:$24 sps:$4 sm:$0xff]  }
 0x120   :  { %957 = vmatpush1.bf16.msra.mxu1 %v5502_v41  ;;  %v5581_v41 = vld [vmem:[#allocation10 + $0x2b0] ss:$24 sps:$4 sm:$0xff]  }
 0x121   :  { %958 = vmatprep.subr.bf16.mxu1 %v5506_v43  ;;  %v5584_v43 = vld [vmem:[#allocation10 + $0x2e0] ss:$24 sps:$4 sm:$0xff]  }
 0x122   :  { %904 = vmatpush1.bf16.msra.mxu0 %v5511_v46  ;;  %v6743_v46 = vshrl.u32 %v236_v45, 7 }
 0x123   :  { %905 = vmatprep.subr.bf16.mxu0 %v5515_v49  ;;  %v371_v49 = vld [vmem:[%s7529_s2] sm:$0x3f] }
 0x124   :  { %959 = vmatpush1.bf16.msra.mxu1 %v5508_v48  ;;  %v6749_v48 = vsub.s32 0, %v6743_v46 }
 0x125   :  { %960 = vmatprep.subr.bf16.mxu1 %v5512_v50  ;;  %v6755_v50 = vsub.s32 3, %v6743_v46 }
 0x126   :  { %906 = vmatpush1.bf16.msra.mxu0 %v5517_v51  ;;  %v6758_v51 = vsub.s32 1, %v6743_v46 }
 0x127   :  { %907 = vmatprep.subr.bf16.mxu0 %v5521_v53 }
 0x128   :  { %961 = vmatpush1.bf16.msra.mxu1 %v5514_v52 }
 0x129   :  { %962 = vmatprep.subr.bf16.mxu1 %v5518_v54  ;;  %v388_v54 = vrot.slane %v371_v49, %v6755_v50 }
 0x12a   :  { %908 = vmatpush1.bf16.msra.mxu0 %v5523_v55  ;;  %v376_v55 = vrot.slane %v371_v49, %v6749_v48 }
 0x12b   :  { %909 = vmatprep.subr.bf16.mxu0 %v5527_v57  ;;  %v380_v57 = vrot.slane %v371_v49, %v6758_v51 }
 0x12c   :  { %963 = vmatpush1.bf16.msra.mxu1 %v5520_v56 }
 0x12d   :  { %964 = vmatprep.subr.bf16.mxu1 %v5524_v58 }
 0x12e   :  { %910 = vmatpush1.bf16.msra.mxu0 %v5529_v59 }
 0x12f   :  { %911 = vmatprep.subr.bf16.mxu0 %v5533_v61 }
 0x130   :  { %965 = vmatpush1.bf16.msra.mxu1 %v5526_v60 }
 0x131   :  { %966 = vmatprep.subr.bf16.mxu1 %v5530_v62 }
 0x132   :  { %912 = vmatpush1.bf16.msra.mxu0 %v5535_v0 }
 0x133   :  { %913 = vmatprep.subr.bf16.mxu0 %v5536_v3 }
 0x134   :  { %967 = vmatpush1.bf16.msra.mxu1 %v5532_v63 }
 0x135   :  { %5283 = vmatprep.subr.bf16.mxu1 %v6411_v44 }
 0x136   :  { %914 = vmatpush1.bf16.msra.mxu0 %v5538_v7 }
 0x137   :  { %969 = vmatmul.mubr.bf16.vlgmr.msra.gmra.mrb[0].mxu1 %v6720_v6  ;;  %989 = vmatprep.subr.bf16.mxu0 %v5541_v9 }
 0x138   :  { %978 = vmatprep.mubr.bf16.mxu1 %v6722_v8 }
 0x139   :  { %916 = vmatmul.mubr.bf16.vlgmr.msra.gmra.mrb[0].mxu0 %v6720_v6 }
 0x13a   :  { %925 = vmatprep.mubr.bf16.mxu0 %v6722_v8  ;;  %990 = vmatpush1.bf16.msra.mxu0 %v5539_v12 }
 0x13b   :  { %991 = vmatprep.subr.bf16.mxu0 %v5544_v13 }
 0x13e   :  { %992 = vmatpush1.bf16.msra.mxu0 %v5542_v14 }
 0x13f   :  { %979 = vmatmul.mubr.bf16.gmra.mrb[4].mxu1 %v6727_v16  ;;  %993 = vmatprep.subr.bf16.mxu0 %v5547_v15 }
 0x140   :  { %5285 = vmatprep.mubr.msk.bf16.mxu1 %vm6412_vm0, %v6411_v44 }
 0x141   :  { %926 = vmatmul.mubr.bf16.gmra.mrb[4].mxu0 %v6727_v16 }
 0x142   :  { %994 = vmatpush1.bf16.msra.mxu0 %v5545_v17  ;;  %1021 = vmatprep.mubr.bf16.mxu0 %v6716_v47  ;;  %v6746_v47 = vsub.s32 2, %v6743_v46 }
 0x143   :  { %995 = vmatprep.subr.bf16.mxu0 %v5550_v18 }
 0x144   :  { %v384_v52 = vrot.slane %v371_v49, %v6746_v47 }
 0x146   :  { %996 = vmatpush1.bf16.msra.mxu0 %v5548_v19 }
 0x147   :  { %997 = vmatprep.subr.bf16.mxu0 %v5553_v20 }
 0x14a   :  { %998 = vmatpush1.bf16.msra.mxu0 %v5551_v21 }
 0x14b   :  { %999 = vmatprep.subr.bf16.mxu0 %v5556_v22 }
 0x14e   :  { %1000 = vmatpush1.bf16.msra.mxu0 %v5554_v23 }
 0x14f   :  { %1001 = vmatprep.subr.bf16.mxu0 %v5559_v24 }
 0x152   :  { %1002 = vmatpush1.bf16.msra.mxu0 %v5557_v25 }
 0x153   :  { %1003 = vmatprep.subr.bf16.mxu0 %v5562_v26 }
 0x156   :  { %1004 = vmatpush1.bf16.msra.mxu0 %v5560_v27 }
 0x157   :  { %1005 = vmatprep.subr.bf16.mxu0 %v5565_v28 }
 0x15a   :  { %1006 = vmatpush1.bf16.msra.mxu0 %v5563_v29 }
 0x15b   :  { %1007 = vmatprep.subr.bf16.mxu0 %v5568_v30  ;;  %v6413_v30 = vmov 0  }
 0x15e   :  { %1008 = vmatpush1.bf16.msra.mxu0 %v5566_v31 }
 0x15f   :  { %1009 = vmatprep.subr.bf16.mxu0 %v5571_v32 }
 0x162   :  { %1010 = vmatpush1.bf16.msra.mxu0 %v5569_v33  ;;  %v391_v33 = vsub.s32 4, %v6743_v46 }
 0x163   :  { %1011 = vmatprep.subr.bf16.mxu0 %v5574_v34  ;;  %v395_v34 = vsub.s32 5, %v6743_v46 }
 0x166   :  { %1012 = vmatpush1.bf16.msra.mxu0 %v5572_v35  ;;  %v392_v35 = vrot.slane %v371_v49, %v391_v33 }
 0x167   :  { %1013 = vmatprep.subr.bf16.mxu0 %v5577_v36  ;;  %v396_v36 = vrot.slane %v371_v49, %v395_v34 }
 0x16a   :  { %1014 = vmatpush1.bf16.msra.mxu0 %v5575_v37 }
 0x16b   :  { %1015 = vmatprep.subr.bf16.mxu0 %v5580_v38 }
 0x16e   :  { %1016 = vmatpush1.bf16.msra.mxu0 %v5578_v39 }
 0x16f   :  { %1017 = vmatprep.subr.bf16.mxu0 %v5583_v40 }
 0x172   :  { %1018 = vmatpush1.bf16.msra.mxu0 %v5581_v41 }
 0x173   :  { %1019 = vmatprep.subr.bf16.mxu0 %v5586_v42 }
 0x176   :  { %1020 = vmatpush1.bf16.msra.mxu0 %v5584_v43 }
 0x177   :  { %5277 = vmatprep.subr.bf16.mxu0 %v6411_v44 }
 0x179   :  { %1022 = vmatmul.mubr.bf16.vlgmr.msra.gmra.mrb[8].mxu0 %v6720_v6 }
 0x17a   :  { %1031 = vmatprep.mubr.bf16.mxu0 %v6722_v8 }
 0x181   :  { %1032 = vmatmul.mubr.bf16.gmra.mrb[12].mxu0 %v6727_v16 }
 0x182   :  { %5279 = vmatprep.mubr.msk.bf16.mxu0 %vm6412_vm0, %v6411_v44 }
 0x20a   :  { %v970_v53 = vpop.f32.mrb[0].mxu1 }
 0x20b   :  { %v972_v56 = vpop.f32.mrb[1].mxu1  ;;  %v971_v59 = vadd.f32 %v970_v53, %v384_v52 }
 0x20c   :  { %v974_v58 = vpop.f32.mrb[2].mxu1  ;;  %v917_v62 = vpop.f32.mrb[0].mxu0  ;;  %v6764_v63 = vadd.f32 %v972_v56, %v388_v54 }
 0x20d   :  { %v975_v60 = vadd.f32 %v974_v58, %v384_v52  ;;  %v976_v61 = vpop.f32.mrb[3].mxu1  ;;  %v918_v1 = vadd.f32 %v917_v62, %v376_v55  ;;  %v919_v2 = vpop.f32.mrb[1].mxu0 }
 0x20e   :  { %v6766_v0 = vadd.f32 %v976_v61, %v388_v54  ;;  %v6768_v4 = vadd.f32 %v919_v2, %v380_v57  ;;  %v921_v5 = vpop.f32.mrb[2].mxu0  ;;  %v243_v2 = vld [vmem:[#allocation7] sm:$0x1] }
 0x20f   :  { %v1044_v3 = vpack.c.bf16 %v975_v60, %v971_v59  ;;  %v922_v7 = vadd.f32 %v921_v5, %v376_v55  ;;  %v923_v8 = vpop.f32.mrb[3].mxu0  ;;  %vm245_vm1 = vcmp.ne.f32.partialorder %v243_v2, 0.0  ;;  %v244_v5 = vld [vmem:[#allocation7 + $0x1] sm:$0x1] }
 0x210   :  { %v1289_v6 = vpack.c.bf16 %v6766_v0, %v6764_v63  ;;  %v6772_v9 = vadd.f32 %v923_v8, %v380_v57  ;;  %vm246_vm2 = vcmp.ne.f32.partialorder %v244_v5, 0.0 }
 0x211   :  { %5278 = vmatpush3.bf16.xpose.msra.mxu0 %v1044_v3  ;;  %v1042_v11 = vpack.c.bf16 %v922_v7, %v918_v1  ;;  %v251_v3 = vsel %vm245_vm1, 1, %v6413_v30  ;;  %v240_v7 = vand.u32 127, %v236_v45 }
 0x212   :  { %v980_v10 = vpop.f32.mrb[4].mxu1  ;;  %v1287_v13 = vpack.c.bf16 %v6772_v9, %v6768_v4  ;;  %v256_v8 = vrot.slane %v251_v3, %v6749_v48 }
 0x213   :  { %v982_v12 = vpop.f32.mrb[5].mxu1  ;;  %v981_v15 = vadd.f32 %v980_v10, %v384_v52  ;;  %v238_v10 = vadd.s32 8, %v6743_v46  ;;  %vm241_vm3 = vcmp.ge.s32.totalorder %v6743_v46, %v240_v7 }
 0x214   :  { %v984_v14 = vpop.f32.mrb[6].mxu1  ;;  %v927_v18 = vpop.f32.mrb[4].mxu0  ;;  %v6776_v19 = vadd.f32 %v982_v12, %v388_v54  ;;  %vm261_vm4 = vcmp.eq.s32.totalorder %v256_v8, 1 }
 0x215   :  { %v985_v16 = vadd.f32 %v984_v14, %v384_v52  ;;  %v986_v17 = vpop.f32.mrb[7].mxu1  ;;  %v928_v21 = vadd.f32 %v927_v18, %v376_v55  ;;  %v929_v22 = vpop.f32.mrb[5].mxu0  ;;  %vm242_vm5 = vcmp.ge.s32.totalorder %v238_v10, %v240_v7  ;;  %vm6821_vm6 = vmand %vm241_vm3, %vm261_vm4 }
 0x216   :  { %v6778_v20 = vadd.f32 %v986_v17, %v388_v54  ;;  %v6780_v24 = vadd.f32 %v929_v22, %v380_v57  ;;  %v931_v25 = vpop.f32.mrb[6].mxu0  ;;  %vm6827_vm8 = vmand %vm242_vm5, %vm261_vm4 }
 0x217   :  { %v1045_v23 = vpack.c.bf16 %v985_v16, %v981_v15  ;;  %v932_v27 = vadd.f32 %v931_v25, %v376_v55  ;;  %v933_v28 = vpop.f32.mrb[7].mxu0 }
 0x218   :  { %v1290_v26 = vpack.c.bf16 %v6778_v20, %v6776_v19  ;;  %5280 = vmatmul.mubr.bf16.vlgmr.msra.gmra.mrb[16].mxu0 %v1042_v11  ;;  %v6784_v29 = vadd.f32 %v933_v28, %v380_v57  ;;  %v252_v11 = vsel %vm246_vm2, 1, %v6413_v30 }
 0x219   :  { %5284 = vmatpush3.bf16.xpose.msra.mxu1 %v1045_v23  ;;  %1643 = vmatprep.mubr.bf16.mxu0 %v6413_v30  ;;  %v1043_v31 = vpack.c.bf16 %v932_v27, %v928_v21  ;;  %v260_v45 = vrot.slane %v252_v11, %v6749_v48 }
 0x21a   :  { %5289 = vmatprep.subr.bf16.mxu1 %v6411_v44  ;;  %v1288_v32 = vpack.c.bf16 %v6784_v29, %v6780_v24 }
 0x21b   :  { %vm262_vm9 = vcmp.eq.s32.totalorder %v260_v45, 1 }
 0x21c   :  { %vm6839_vm10 = vmand %vm241_vm3, %vm262_vm9 }
 0x21d   :  { %vm6844_vm11 = vmand %vm242_vm5, %vm262_vm9 }
 0x220   :  { %5286 = vmatmul.mubr.bf16.vlgmr.msra.gmra.mrb[8].mxu1 %v1043_v31 }
 0x221   :  { %5291 = vmatprep.mubr.msk.bf16.mxu1 %vm6412_vm0, %v6411_v44 }
 0x24c   :  { %v1023_v37 = vpop.f32.mrb[8].mxu0 }
 0x24d   :  { %v1024_v38 = vadd.f32 %v1023_v37, %v392_v35  ;;  %v1025_v39 = vpop.f32.mrb[9].mxu0 }
 0x24e   :  { %v6794_v40 = vadd.f32 %v1025_v39, %v396_v36  ;;  %v1027_v41 = vpop.f32.mrb[10].mxu0 }
 0x24f   :  { %v1028_v42 = vadd.f32 %v1027_v41, %v392_v35  ;;  %v1029_v43 = vpop.f32.mrb[11].mxu0 }
 0x250   :  { %v6796_v52 = vadd.f32 %v1029_v43, %v396_v36 }
 0x251   :  { %v1046_v53 = vpack.c.bf16 %v1028_v42, %v1024_v38 }
 0x252   :  { %v1291_v54 = vpack.c.bf16 %v6796_v52, %v6794_v40 }
 0x253   :  { %5290 = vmatpush3.bf16.msra.mxu1 %v1046_v53 }
 0x254   :  { %v1033_v55 = vpop.f32.mrb[12].mxu0  ;;  %5295 = vmatprep.subr.bf16.mxu1 %v6411_v44 }
 0x255   :  { %v6801_v56 = vadd.f32 %v1033_v55, %v392_v35  ;;  %v1035_v49 = vpop.f32.mrb[13].mxu0 }
 0x256   :  { %v6803_v57 = vadd.f32 %v1035_v49, %v396_v36  ;;  %v1037_v58 = vpop.f32.mrb[14].mxu0 }
 0x257   :  { %v6805_v59 = vadd.f32 %v1037_v58, %v392_v35  ;;  %v1039_v60 = vpop.f32.mrb[15].mxu0 }
 0x258   :  { %v6807_v61 = vadd.f32 %v1039_v60, %v396_v36 }
 0x259   :  { %v1047_v62 = vpack.c.bf16 %v6805_v59, %v6801_v56 }
 0x25a   :  { %v1292_v1 = vpack.c.bf16 %v6807_v61, %v6803_v57  ;;  %v5611_v57 = vld [vmem:[#allocation11] ss:$8 sps:$4 sm:$0xff]  }
 0x2eb   :  { %v1082_v14 = vpop.f32.mrb[16].mxu0 }
 0x2ec   :  { %v1130_v16 = vsel %vm6821_vm6, %v1082_v14, -10000.0  ;;  %v5281_v17 = vpop.f32.mrb[17].mxu0 }
 0x2ed   :  { %v1135_v18 = vsel %vm1134_vm7, %v1130_v16, -inf  ;;  %v1085_v21 = vpop.f32.mrb[18].mxu0 }
 0x2ee   :  { %1136 = vmax.xlane.f32.xlu0 %v1135_v18  ;;  %v1131_v22 = vsel %vm6827_vm8, %v1085_v21, -10000.0  ;;  %v5282_v23 = vpop.f32.mrb[19].mxu0 }
 0x2ef   :  { %v1138_v25 = vsel %vm1134_vm7, %v1131_v22, -inf }
 0x2f2   :  { %1139 = vmax.xlane.f32.xlu0 %v1138_v25 }
 0x2f3   :  { %v1123_v28 = vpop.f32.mrb[8].mxu1 }
 0x2f4   :  { %v1132_v33 = vsel %vm6839_vm10, %v1123_v28, -10000.0  ;;  %v5287_v34 = vpop.f32.mrb[9].mxu1 }
 0x2f5   :  { %v1141_v35 = vsel %vm1134_vm7, %v1132_v33, -inf  ;;  %v1126_v36 = vpop.f32.mrb[10].mxu1 }
 0x2f6   :  { %1142 = vmax.xlane.f32.xlu1 %v1141_v35  ;;  %v1133_v46 = vsel %vm6844_vm11, %v1126_v36, -10000.0  ;;  %v5288_v37 = vpop.f32.mrb[11].mxu1 }
 0x2f7   :  { %v1144_v38 = vsel %vm1134_vm7, %v1133_v46, -inf }
 0x2fa   :  { %1145 = vmax.xlane.f32.xlu1 %v1144_v38 }
 0x37b   :  { %v1137_v39 = vpop.xlane.xlu0 %1136 }
 0x37c   :  { %v1147_v41 = vsub.f32 %v1130_v16, %v1137_v39 }
 0x37e   :  { %v1151_v42 = vmul.f32 1.442695, %v1147_v41 }
 0x37f   :  { %v1140_v43 = vpop.xlane.xlu0 %1139 }
 0x380   :  { %6019 = vpow2.f32 %v1151_v42  ;;  %v1148_v53 = vsub.f32 %v1131_v22, %v1140_v43 }
 0x382   :  { %v1153_v55 = vmul.f32 1.442695, %v1148_v53 }
 0x383   :  { %v1143_v49 = vpop.xlane.xlu1 %1142 }
 0x384   :  { %6021 = vpow2.f32 %v1153_v55  ;;  %v1149_v58 = vsub.f32 %v1132_v33, %v1143_v49 }
 0x386   :  { %v1155_v60 = vmul.f32 1.442695, %v1149_v58 }
 0x387   :  { %v1146_v2 = vpop.xlane.xlu1 %1145 }
 0x388   :  { %6023 = vpow2.f32 %v1155_v60  ;;  %v1150_v3 = vsub.f32 %v1133_v46, %v1146_v2 }
 0x38a   :  { %v6020_v5 = vpop.eup %6019  ;;  %v1157_v7 = vmul.f32 1.442695, %v1150_v3 }
 0x38b   :  { %v1159_v8 = vsel %vm1134_vm7, %v6020_v5, 0.0 }
 0x38c   :  { %6025 = vpow2.f32 %v1157_v7  ;;  %1160 = vadd.xlane.f32.xlu0 %v1159_v8 }
 0x38e   :  { %v6022_v10 = vpop.eup %6021 }
 0x38f   :  { %v1162_v11 = vsel %vm1134_vm7, %v6022_v10, 0.0 }
 0x390   :  { %1163 = vadd.xlane.f32.xlu1 %v1162_v11 }
 0x392   :  { %v6024_v45 = vpop.eup %6023 }
 0x393   :  { %v1165_v14 = vsel %vm1134_vm7, %v6024_v45, 0.0 }
 0x394   :  { %1166 = vadd.xlane.f32.xlu0 %v1165_v14 }
 0x396   :  { %v6026_v16 = vpop.eup %6025 }
 0x397   :  { %v1168_v17 = vsel %vm1134_vm7, %v6026_v16, 0.0 }
 0x398   :  { %1169 = vadd.xlane.f32.xlu1 %v1168_v17 }
 0x419   :  { %v1161_v18 = vpop.xlane.xlu0 %1160 }
 0x41a   :  { %6027 = vrcp.f32 %v1161_v18 }
 0x41d   :  { %v1164_v21 = vpop.xlane.xlu1 %1163 }
 0x41e   :  { %6029 = vrcp.f32 %v1164_v21 }
 0x421   :  { %v1167_v22 = vpop.xlane.xlu0 %1166 }
 0x422   :  { %6031 = vrcp.f32 %v1167_v22 }
 0x424   :  { %v6028_v25 = vpop.eup %6027 }
 0x425   :  { %v1170_v23 = vpop.xlane.xlu1 %1169  ;;  %v1175_v33 = vmul.f32 %v6028_v25, %v6020_v5 }
 0x426   :  { %6033 = vrcp.f32 %v1170_v23 }
 0x428   :  { %v6030_v28 = vpop.eup %6029 }
 0x429   :  { %v1176_v34 = vmul.f32 %v6030_v28, %v6022_v10  ;;  %v5587_v28 = vld [vmem:[#allocation11 + $0x80] ss:$8 sps:$4 sm:$0xff]  }
 0x42b   :  { %v1179_v35 = vpack.c.bf16 %v1176_v34, %v1175_v33  ;;  %v5589_v33 = vld [vmem:[#allocation11 + $0x84] ss:$8 sps:$4 sm:$0xff]   ;;  %v5592_v34 = vld [vmem:[#allocation11 + $0x94] ss:$8 sps:$4 sm:$0xff]  }
 0x42c   :  { %v6032_v36 = vpop.eup %6031  ;;  %1611 = vmatprep.subr.bf16.mxu0 %v5589_v33  ;;  %v5629_v33 = vld [vmem:[#allocation11 + $0x60] ss:$8 sps:$4 sm:$0xff]  }
 0x42d   :  { %5292 = vmatmul.mubr.msk.bf16.vlgmr.msra.gmra.mrb[12].mxu1 %vm1134_vm7, %v1179_v35  ;;  %v1177_v37 = vmul.f32 %v6032_v36, %v6024_v45  ;;  %1612 = vmatpush1.bf16.msra.mxu0 %v5587_v28  ;;  %v5590_v35 = vld [vmem:[#allocation11 + $0x90] ss:$8 sps:$4 sm:$0xff]   ;;  %v5595_v36 = vld [vmem:[#allocation11 + $0xa4] ss:$8 sps:$4 sm:$0xff]  }
 0x42e   :  { %5296 = vmatpush3.bf16.msra.mxu1 %v1047_v62  ;;  %5297 = vmatprep.mubr.msk.bf16.mxu1 %vm6412_vm0, %v6411_v44  ;;  %v5631_v28 = vld [vmem:[#allocation11 + $0x64] ss:$8 sps:$4 sm:$0xff]  }
 0x42f   :  { %5301 = vmatprep.subr.bf16.mxu1 %v6411_v44  ;;  %1613 = vmatprep.subr.bf16.mxu0 %v5592_v34  ;;  %v5634_v34 = vld [vmem:[#allocation11 + $0x74] ss:$8 sps:$4 sm:$0xff]  }
 0x430   :  { %v6034_v46 = vpop.eup %6033 }
 0x431   :  { %v1178_v38 = vmul.f32 %v6034_v46, %v6026_v16  ;;  %1614 = vmatpush1.bf16.msra.mxu0 %v5590_v35  ;;  %v5593_v46 = vld [vmem:[#allocation11 + $0xa0] ss:$8 sps:$4 sm:$0xff]   ;;  %v5632_v35 = vld [vmem:[#allocation11 + $0x70] ss:$8 sps:$4 sm:$0xff]  }
 0x432   :  { %1615 = vmatprep.subr.bf16.mxu0 %v5595_v36  ;;  %v1797_v36 = vld [vmem:[%s7538_s3] sm:$0x3] }
 0x433   :  { %v1180_v39 = vpack.c.bf16 %v1178_v38, %v1177_v37  ;;  %v5598_v37 = vld [vmem:[#allocation11 + $0xb4] ss:$8 sps:$4 sm:$0xff]   ;;  %v5596_v38 = vld [vmem:[#allocation11 + $0xb0] ss:$8 sps:$4 sm:$0xff]  }
 0x435   :  { %5298 = vmatmul.mubr.msk.bf16.vlgmr.msra.gmra.mrb[16].mxu1 %vm1134_vm7, %v1180_v39  ;;  %1616 = vmatpush1.bf16.msra.mxu0 %v5593_v46  ;;  %v5601_v39 = vld [vmem:[#allocation11 + $0xc4] ss:$8 sps:$4 sm:$0xff]   ;;  %v1802_v46 = vrot.slane %v1797_v36, %v6749_v48 }
 0x436   :  { %5303 = vmatprep.mubr.msk.bf16.mxu1 %vm6412_vm0, %v6411_v44  ;;  %1617 = vmatprep.subr.bf16.mxu0 %v5598_v37  ;;  %v1806_v37 = vrot.slane %v1797_v36, %v6758_v51  ;;  %v5676_v36 = vld [vmem:[#allocation14 + $0x1a4] ss:$16 sps:$4 sm:$0xff]  }
 0x437   :  { %5302 = vmatpush3.bf16.xpose.msra.mxu1 %v1289_v6 }
 0x438   :  { %5307 = vmatprep.subr.bf16.mxu1 %v6411_v44 }
 0x439   :  { %1618 = vmatpush1.bf16.msra.mxu0 %v5596_v38 }
 0x43a   :  { %1619 = vmatprep.subr.bf16.mxu0 %v5601_v39 }
 0x43e   :  { %5304 = vmatmul.mubr.bf16.vlgmr.msra.gmra.mrb[20].mxu1 %v1287_v13 }
 0x43f   :  { %5308 = vmatpush3.bf16.xpose.msra.mxu1 %v1290_v26  ;;  %5309 = vmatprep.mubr.msk.bf16.mxu1 %vm6412_vm0, %v6411_v44 }
 0x440   :  { %5313 = vmatprep.subr.bf16.mxu1 %v6411_v44 }
 0x446   :  { %5310 = vmatmul.mubr.bf16.vlgmr.msra.gmra.mrb[24].mxu1 %v1288_v32 }
 0x447   :  { %5314 = vmatpush3.bf16.msra.mxu1 %v1291_v54  ;;  %5315 = vmatprep.mubr.msk.bf16.mxu1 %vm6412_vm0, %v6411_v44 }
 0x448   :  { %5319 = vmatprep.subr.bf16.mxu1 %v6411_v44 }
 0x500   :  { %v6890_v63 = vpop.f32.mrb[12].mxu1 }
 0x501   :  { %v5293_v0 = vpop.f32.mrb[13].mxu1 }
 0x502   :  { %v6892_v4 = vpop.f32.mrb[14].mxu1  ;;  %v5599_v0 = vld [vmem:[#allocation11 + $0xc0] ss:$8 sps:$4 sm:$0xff]  }
 0x503   :  { %v1269_v6 = vpack.c.bf16 %v6892_v4, %v6890_v63  ;;  %v5294_v9 = vpop.f32.mrb[15].mxu1  ;;  %1620 = vmatpush1.bf16.msra.mxu0 %v5599_v0  ;;  %v6107_v4 = vld [vmem:[#allocation2] sm:$0xff] }
 0x504   :  { %v5604_v9 = vld [vmem:[#allocation11 + $0xd4] ss:$8 sps:$4 sm:$0xff]  }
 0x505   :  { %1621 = vmatprep.subr.bf16.mxu0 %v5604_v9 }
 0x508   :  { %v6896_v13 = vpop.f32.mrb[16].mxu1 }
 0x509   :  { %v5299_v19 = vpop.f32.mrb[17].mxu1 }
 0x50a   :  { %v6898_v20 = vpop.f32.mrb[18].mxu1  ;;  %v5602_v19 = vld [vmem:[#allocation11 + $0xd0] ss:$8 sps:$4 sm:$0xff]  }
 0x50b   :  { %v1270_v24 = vpack.c.bf16 %v6898_v20, %v6896_v13  ;;  %v5300_v26 = vpop.f32.mrb[19].mxu1  ;;  %1622 = vmatpush1.bf16.msra.mxu0 %v5602_v19  ;;  %v6108_v13 = vld [vmem:[#allocation2 + $0x8] sm:$0xff] }
 0x50c   :  { %v5607_v26 = vld [vmem:[#allocation11 + $0xe4] ss:$8 sps:$4 sm:$0xff]  }
 0x50d   :  { %1623 = vmatprep.subr.bf16.mxu0 %v5607_v26 }
 0x511   :  { %v1327_v29 = vpop.f32.mrb[20].mxu1 }
 0x512   :  { %v1375_v32 = vsel %vm6821_vm6, %v1327_v29, -10000.0  ;;  %v5305_v40 = vpop.f32.mrb[21].mxu1  ;;  %v5605_v29 = vld [vmem:[#allocation11 + $0xe0] ss:$8 sps:$4 sm:$0xff]  }
 0x513   :  { %v1330_v52 = vpop.f32.mrb[22].mxu1  ;;  %v1379_v54 = vsel %vm1134_vm7, %v1375_v32, -inf  ;;  %1624 = vmatpush1.bf16.msra.mxu0 %v5605_v29  ;;  %v6109_v29 = vld [vmem:[#allocation2 + $0x10] sm:$0xff] }
 0x514   :  { %v1376_v56 = vsel %vm6827_vm8, %v1330_v52, -10000.0  ;;  %1380 = vmax.xlane.f32.xlu0 %v1379_v54  ;;  %v5306_v59 = vpop.f32.mrb[23].mxu1 }
 0x515   :  { %v1382_v62 = vsel %vm1134_vm7, %v1376_v56, -inf }
 0x516   :  { %1383 = vmax.xlane.f32.xlu1 %v1382_v62 }
 0x519   :  { %v1368_v41 = vpop.f32.mrb[24].mxu1 }
 0x51a   :  { %v1377_v42 = vsel %vm6839_vm10, %v1368_v41, -10000.0  ;;  %v5311_v43 = vpop.f32.mrb[25].mxu1 }
 0x51b   :  { %v1371_v53 = vpop.f32.mrb[26].mxu1  ;;  %v1385_v12 = vsel %vm1134_vm7, %v1377_v42, -inf }
 0x51c   :  { %v1378_v55 = vsel %vm6844_vm11, %v1371_v53, -10000.0  ;;  %1386 = vmax.xlane.f32.xlu0 %v1385_v12  ;;  %v5312_v49 = vpop.f32.mrb[27].mxu1 }
 0x51d   :  { %v1388_v15 = vsel %vm1134_vm7, %v1378_v55, -inf }
 0x51e   :  { %1389 = vmax.xlane.f32.xlu1 %v1388_v15  ;;  %v5610_v15 = vld [vmem:[#allocation11 + $0xf4] ss:$8 sps:$4 sm:$0xff]  }
 0x51f   :  { %1625 = vmatprep.subr.bf16.mxu0 %v5610_v15  ;;  %v5637_v15 = vld [vmem:[#allocation14 + $0x4] ss:$16 sps:$4 sm:$0xff]  }
 0x5a1   :  { %v1381_v58 = vpop.xlane.xlu0 %1380 }
 0x5a2   :  { %v1391_v60 = vsub.f32 %v1375_v32, %v1381_v58  ;;  %v5608_v58 = vld [vmem:[#allocation11 + $0xf0] ss:$8 sps:$4 sm:$0xff]  }
 0x5a3   :  { %v1384_v2 = vpop.xlane.xlu1 %1383  ;;  %1626 = vmatpush1.bf16.msra.mxu0 %v5608_v58  ;;  %v5640_v58 = vld [vmem:[#allocation14 + $0x24] ss:$16 sps:$4 sm:$0xff]  }
 0x5a4   :  { %v1395_v3 = vmul.f32 1.442695, %v1391_v60  ;;  %v1392_v5 = vsub.f32 %v1376_v56, %v1384_v2  ;;  %v5613_v60 = vld [vmem:[#allocation11 + $0x4] ss:$8 sps:$4 sm:$0xff]  }
 0x5a5   :  { %1744 = vmatprep.subr.bf16.mxu0 %v5613_v60  ;;  %v5638_v60 = vld [vmem:[#allocation14 + $0x20] ss:$16 sps:$4 sm:$0xff]  }
 0x5a6   :  { %6035 = vpow2.f32 %v1395_v3  ;;  %v1397_v27 = vmul.f32 1.442695, %v1392_v5 }
 0x5a8   :  { %6037 = vpow2.f32 %v1397_v27  ;;  %v5616_v27 = vld [vmem:[#allocation11 + $0x14] ss:$8 sps:$4 sm:$0xff]  }
 0x5a9   :  { %v1387_v7 = vpop.xlane.xlu0 %1386 }
 0x5aa   :  { %v1393_v8 = vsub.f32 %v1377_v42, %v1387_v7  ;;  %v5614_v7 = vld [vmem:[#allocation11 + $0x10] ss:$8 sps:$4 sm:$0xff]  }
 0x5ab   :  { %v1390_v10 = vpop.xlane.xlu1 %1389 }
 0x5ac   :  { %v1399_v11 = vmul.f32 1.442695, %v1393_v8  ;;  %v1394_v45 = vsub.f32 %v1378_v55, %v1390_v10  ;;  %v5619_v8 = vld [vmem:[#allocation11 + $0x24] ss:$8 sps:$4 sm:$0xff]  }
 0x5ae   :  { %6039 = vpow2.f32 %v1399_v11  ;;  %v1401_v31 = vmul.f32 1.442695, %v1394_v45 }
 0x5b0   :  { %v6036_v14 = vpop.eup %6035  ;;  %6041 = vpow2.f32 %v1401_v31  ;;  %v5617_v31 = vld [vmem:[#allocation11 + $0x20] ss:$8 sps:$4 sm:$0xff]  }
 0x5b1   :  { %v1403_v16 = vsel %vm1134_vm7, %v6036_v14, 0.0 }
 0x5b2   :  { %v6038_v17 = vpop.eup %6037  ;;  %1404 = vadd.xlane.f32.xlu0 %v1403_v16 }
 0x5b3   :  { %v1406_v18 = vsel %vm1134_vm7, %v6038_v17, 0.0 }
 0x5b4   :  { %1407 = vadd.xlane.f32.xlu1 %v1406_v18  ;;  %v5620_v18 = vld [vmem:[#allocation11 + $0x30] ss:$8 sps:$4 sm:$0xff]  }
 0x5b8   :  { %v6040_v21 = vpop.eup %6039 }
 0x5b9   :  { %v1409_v22 = vsel %vm1134_vm7, %v6040_v21, 0.0 }
 0x5ba   :  { %v6042_v23 = vpop.eup %6041  ;;  %1410 = vadd.xlane.f32.xlu0 %v1409_v22  ;;  %v5623_v22 = vld [vmem:[#allocation11 + $0x40] ss:$8 sps:$4 sm:$0xff]  }
 0x5bb   :  { %v1412_v25 = vsel %vm1134_vm7, %v6042_v23, 0.0 }
 0x5bc   :  { %1413 = vadd.xlane.f32.xlu1 %v1412_v25  ;;  %v5626_v25 = vld [vmem:[#allocation11 + $0x50] ss:$8 sps:$4 sm:$0xff]  }
 0x63f   :  { %v1405_v32 = vpop.xlane.xlu0 %1404 }
 0x640   :  { %6043 = vrcp.f32 %v1405_v32 }
 0x641   :  { %v1408_v40 = vpop.xlane.xlu1 %1407 }
 0x642   :  { %6045 = vrcp.f32 %v1408_v40  ;;  %v6110_v40 = vld [vmem:[#allocation2 + $0x18] sm:$0xff] }
 0x647   :  { %v1411_v52 = vpop.xlane.xlu0 %1410 }
 0x648   :  { %6047 = vrcp.f32 %v1411_v52 }
 0x649   :  { %v1414_v54 = vpop.xlane.xlu1 %1413 }
 0x64a   :  { %v6044_v56 = vpop.eup %6043  ;;  %6049 = vrcp.f32 %v1414_v54 }
 0x64b   :  { %v1419_v62 = vmul.f32 %v6044_v56, %v6036_v14 }
 0x64c   :  { %v6046_v59 = vpop.eup %6045 }
 0x64d   :  { %v1420_v41 = vmul.f32 %v6046_v59, %v6038_v17  ;;  %v5622_v17 = vld [vmem:[#allocation11 + $0x34] ss:$8 sps:$4 sm:$0xff]  }
 0x64f   :  { %v1423_v42 = vpack.c.bf16 %v1420_v41, %v1419_v62 }
 0x651   :  { %5316 = vmatmul.mubr.msk.bf16.vlgmr.msra.gmra.mrb[28].mxu1 %vm1134_vm7, %v1423_v42 }
 0x652   :  { %v6048_v43 = vpop.eup %6047  ;;  %5320 = vmatpush3.bf16.msra.mxu1 %v1292_v1  ;;  %5321 = vmatprep.mubr.msk.bf16.mxu1 %vm6412_vm0, %v6411_v44 }
 0x653   :  { %v1421_v12 = vmul.f32 %v6048_v43, %v6040_v21  ;;  %v5625_v21 = vld [vmem:[#allocation11 + $0x44] ss:$8 sps:$4 sm:$0xff]   ;;  %2354 = vmatprep.subr.bf16.mxu1 %v5637_v15  ;;  %v5701_v15 = vld [vmem:[#allocation13 + $0x60] ss:$8 sps:$4 sm:$0xff]  }
 0x654   :  { %v6050_v53 = vpop.eup %6049 }
 0x655   :  { %v1422_v55 = vmul.f32 %v6050_v53, %v6042_v23  ;;  %v5628_v23 = vld [vmem:[#allocation11 + $0x54] ss:$8 sps:$4 sm:$0xff]  }
 0x657   :  { %v1424_v49 = vpack.c.bf16 %v1422_v55, %v1421_v12 }
 0x659   :  { %5322 = vmatmul.mubr.msk.bf16.vlgmr.msra.gmra.mrb[32].mxu1 %vm1134_vm7, %v1424_v49  ;;  %v5635_v49 = vld [vmem:[#allocation14] ss:$16 sps:$4 sm:$0xff]  }
 0x65a   :  { %2355 = vmatpush1.bf16.msra.mxu1 %v5635_v49  ;;  %v5703_v49 = vld [vmem:[#allocation13 + $0x64] ss:$8 sps:$4 sm:$0xff]  }
 0x65b   :  { %2356 = vmatprep.subr.bf16.mxu1 %v5640_v58  ;;  %v5706_v58 = vld [vmem:[#allocation13 + $0x74] ss:$8 sps:$4 sm:$0xff]  }
 0x65e   :  { %2357 = vmatpush1.bf16.msra.mxu1 %v5638_v60  ;;  %v5704_v60 = vld [vmem:[#allocation13 + $0x70] ss:$8 sps:$4 sm:$0xff]  }
 0x724   :  { %v1462_v2 = vpop.f32.mrb[28].mxu1 }
 0x725   :  { %v5317_v3 = vpop.f32.mrb[29].mxu1 }
 0x726   :  { %v1465_v5 = vpop.f32.mrb[30].mxu1  ;;  %v5641_v3 = vld [vmem:[#allocation14 + $0x40] ss:$16 sps:$4 sm:$0xff]  }
 0x727   :  { %v1513_v61 = vpack.c.bf16 %v1465_v5, %v1462_v2  ;;  %v5318_v1 = vpop.f32.mrb[31].mxu1  ;;  %v5643_v2 = vld [vmem:[#allocation14 + $0x44] ss:$16 sps:$4 sm:$0xff]  }
 0x728   :  { %2358 = vmatprep.subr.bf16.mxu1 %v5643_v2  ;;  %v5646_v5 = vld [vmem:[#allocation14 + $0x64] ss:$16 sps:$4 sm:$0xff]  }
 0x729   :  { %1644 = vmatmul.mubr.bf16.vlgmr.msra.gmra.mrb[20].mxu0 %v1513_v61  ;;  %2359 = vmatpush1.bf16.msra.mxu1 %v5641_v3  ;;  %v5644_v61 = vld [vmem:[#allocation14 + $0x60] ss:$16 sps:$4 sm:$0xff]   ;;  %v1933_v1 = vld [vmem:[#allocation5 + $0x18] sm:$0xff]  ;;  %v5709_v2 = vld [vmem:[#allocation13 + $0x84] ss:$8 sps:$4 sm:$0xff]  }
 0x72a   :  { %1745 = vmatpush1.bf16.msra.mxu0 %v5611_v57  ;;  %1653 = vmatprep.mubr.bf16.mxu0 %v6413_v30  ;;  %v1931_v57 = vld [vmem:[#allocation5 + $0x8] sm:$0xff] }
 0x72b   :  { %1746 = vmatprep.subr.bf16.mxu0 %v5616_v27  ;;  %2360 = vmatprep.subr.bf16.mxu1 %v5646_v5  ;;  %v5649_v27 = vld [vmem:[#allocation14 + $0x84] ss:$16 sps:$4 sm:$0xff]   ;;  %v5707_v3 = vld [vmem:[#allocation13 + $0x80] ss:$8 sps:$4 sm:$0xff]  }
 0x72c   :  { %v1506_v10 = vpop.f32.mrb[32].mxu1  ;;  %v5712_v5 = vld [vmem:[#allocation13 + $0x94] ss:$8 sps:$4 sm:$0xff]  }
 0x72d   :  { %v5323_v11 = vpop.f32.mrb[33].mxu1  ;;  %2361 = vmatpush1.bf16.msra.mxu1 %v5644_v61 }
 0x72e   :  { %1747 = vmatpush1.bf16.msra.mxu0 %v5614_v7  ;;  %v1509_v45 = vpop.f32.mrb[34].mxu1  ;;  %v1943_v7 = vpack.c.bf16 %v1933_v1, %v1931_v57  ;;  %2362 = vmatprep.subr.bf16.mxu1 %v5649_v27  ;;  %v5650_v11 = vld [vmem:[#allocation14 + $0xa0] ss:$16 sps:$4 sm:$0xff]  }
 0x72f   :  { %v1514_v14 = vpack.c.bf16 %v1509_v45, %v1506_v10  ;;  %v5324_v16 = vpop.f32.mrb[35].mxu1  ;;  %1748 = vmatprep.subr.bf16.mxu0 %v5619_v8  ;;  %v5647_v8 = vld [vmem:[#allocation14 + $0x80] ss:$16 sps:$4 sm:$0xff]   ;;  %v5652_v10 = vld [vmem:[#allocation14 + $0xa4] ss:$16 sps:$4 sm:$0xff]  }
 0x730   :  { %2386 = vmatprep.mubr.bf16.mxu1 %v1943_v7  ;;  %v5655_v45 = vld [vmem:[#allocation14 + $0xc4] ss:$16 sps:$4 sm:$0xff]   ;;  %v5656_v16 = vld [vmem:[#allocation14 + $0xe0] ss:$16 sps:$4 sm:$0xff]  }
 0x731   :  { %1654 = vmatmul.mubr.bf16.gmra.mrb[24].mxu0 %v1514_v14  ;;  %2363 = vmatpush1.bf16.msra.mxu1 %v5647_v8  ;;  %v5658_v14 = vld [vmem:[#allocation14 + $0xe4] ss:$16 sps:$4 sm:$0xff]   ;;  %v5710_v57 = vld [vmem:[#allocation13 + $0x90] ss:$8 sps:$4 sm:$0xff]  }
 0x732   :  { %1749 = vmatpush1.bf16.msra.mxu0 %v5617_v31  ;;  %1776 = vmatprep.mubr.bf16.mxu0 %v6413_v30  ;;  %v5653_v31 = vld [vmem:[#allocation14 + $0xc0] ss:$16 sps:$4 sm:$0xff]  }
 0x733   :  { %1750 = vmatprep.subr.bf16.mxu0 %v5622_v17  ;;  %2364 = vmatprep.subr.bf16.mxu1 %v5652_v10  ;;  %v5661_v17 = vld [vmem:[#allocation14 + $0x104] ss:$16 sps:$4 sm:$0xff]  }
 0x735   :  { %2365 = vmatpush1.bf16.msra.mxu1 %v5650_v11 }
 0x736   :  { %1751 = vmatpush1.bf16.msra.mxu0 %v5620_v18  ;;  %2366 = vmatprep.subr.bf16.mxu1 %v5655_v45  ;;  %v5659_v18 = vld [vmem:[#allocation14 + $0x100] ss:$16 sps:$4 sm:$0xff]  }
 0x737   :  { %1752 = vmatprep.subr.bf16.mxu0 %v5625_v21  ;;  %v5664_v21 = vld [vmem:[#allocation14 + $0x124] ss:$16 sps:$4 sm:$0xff]  }
 0x739   :  { %2367 = vmatpush1.bf16.msra.mxu1 %v5653_v31 }
 0x73a   :  { %1753 = vmatpush1.bf16.msra.mxu0 %v5623_v22  ;;  %2368 = vmatprep.subr.bf16.mxu1 %v5658_v14  ;;  %v5662_v22 = vld [vmem:[#allocation14 + $0x120] ss:$16 sps:$4 sm:$0xff]  }
 0x73b   :  { %1754 = vmatprep.subr.bf16.mxu0 %v5628_v23  ;;  %v5667_v23 = vld [vmem:[#allocation14 + $0x144] ss:$16 sps:$4 sm:$0xff]  }
 0x73d   :  { %2369 = vmatpush1.bf16.msra.mxu1 %v5656_v16  ;;  %v6111_v16 = vld [vmem:[#allocation2 + $0x20] sm:$0xff] }
 0x73e   :  { %1755 = vmatpush1.bf16.msra.mxu0 %v5626_v25  ;;  %2370 = vmatprep.subr.bf16.mxu1 %v5661_v17  ;;  %v5665_v25 = vld [vmem:[#allocation14 + $0x140] ss:$16 sps:$4 sm:$0xff]   ;;  %v6112_v17 = vld [vmem:[#allocation2 + $0x28] sm:$0xff] }
 0x73f   :  { %1756 = vmatprep.subr.bf16.mxu0 %v5631_v28  ;;  %v5670_v28 = vld [vmem:[#allocation14 + $0x164] ss:$16 sps:$4 sm:$0xff]  }
 0x741   :  { %2371 = vmatpush1.bf16.msra.mxu1 %v5659_v18 }
 0x742   :  { %1757 = vmatpush1.bf16.msra.mxu0 %v5629_v33  ;;  %2372 = vmatprep.subr.bf16.mxu1 %v5664_v21  ;;  %v5668_v33 = vld [vmem:[#allocation14 + $0x160] ss:$16 sps:$4 sm:$0xff]  }
 0x743   :  { %1758 = vmatprep.subr.bf16.mxu0 %v5634_v34  ;;  %v5673_v34 = vld [vmem:[#allocation14 + $0x184] ss:$16 sps:$4 sm:$0xff]   ;;  %v6113_v21 = vld [vmem:[#allocation2 + $0x30] sm:$0xff] }
 0x745   :  { %2373 = vmatpush1.bf16.msra.mxu1 %v5662_v22 }
 0x746   :  { %1759 = vmatpush1.bf16.msra.mxu0 %v5632_v35  ;;  %2374 = vmatprep.subr.bf16.mxu1 %v5667_v23  ;;  %v5671_v35 = vld [vmem:[#allocation14 + $0x180] ss:$16 sps:$4 sm:$0xff]   ;;  %v6114_v23 = vld [vmem:[#allocation2 + $0x38] sm:$0xff] }
 0x749   :  { %1777 = vmatmul.mubr.bf16.vlgmr.msra.gmra.mrb[20].mxu0 %v1269_v6  ;;  %2375 = vmatpush1.bf16.msra.mxu1 %v5665_v25 }
 0x74a   :  { %1786 = vmatprep.mubr.bf16.mxu0 %v6413_v30  ;;  %2376 = vmatprep.subr.bf16.mxu1 %v5670_v28 }
 0x74d   :  { %2377 = vmatpush1.bf16.msra.mxu1 %v5668_v33  ;;  %v1935_v33 = vld [vmem:[#allocation5 + $0x28] sm:$0xff] }
 0x74e   :  { %2378 = vmatprep.subr.bf16.mxu1 %v5673_v34  ;;  %v1937_v34 = vld [vmem:[#allocation5 + $0x38] sm:$0xff] }
 0x751   :  { %1787 = vmatmul.mubr.bf16.gmra.mrb[24].mxu0 %v1270_v24  ;;  %2379 = vmatpush1.bf16.msra.mxu1 %v5671_v35  ;;  %v6998_v35 = vpack.c.bf16 %v1937_v34, %v1935_v33 }
 0x752   :  { %2449 = vmatprep.mubr.bf16.mxu0 %v1943_v7  ;;  %2380 = vmatprep.subr.bf16.mxu1 %v5676_v36  ;;  %v1936_v36 = vld [vmem:[#allocation5 + $0x30] sm:$0xff] }
 0x81c   :  { %v1778_v38 = vpop.f32.mrb[20].mxu0 }
 0x81d   :  { %v1809_v39 = vadd.f32 %v1802_v46, %v1778_v38  ;;  %v1780_v0 = vpop.f32.mrb[21].mxu0  ;;  %v5677_v38 = vld [vmem:[#allocation14 + $0x1c0] ss:$16 sps:$4 sm:$0xff]  }
 0x81e   :  { %v1810_v9 = vadd.f32 %v1806_v37, %v1780_v0  ;;  %v1782_v63 = vpop.f32.mrb[22].mxu0  ;;  %v5680_v0 = vld [vmem:[#allocation14 + $0x1e0] ss:$16 sps:$4 sm:$0xff]  }
 0x81f   :  { %v6939_v6 = vadd.f32 %v6107_v4, %v1809_v39  ;;  %v1811_v19 = vadd.f32 %v1802_v46, %v1782_v63  ;;  %v1784_v26 = vpop.f32.mrb[23].mxu0  ;;  %v5682_v39 = vld [vmem:[#allocation14 + $0x1e4] ss:$16 sps:$4 sm:$0xff]   ;;  %v1932_v63 = vld [vmem:[#allocation5 + $0x10] sm:$0xff] }
 0x820   :  { %v6941_v20 = vadd.f32 %v6108_v13, %v1810_v9  ;;  %v1812_v24 = vadd.f32 %v1806_v37, %v1784_v26  ;;  %v1930_v9 = vld [vmem:[#allocation5] sm:$0xff]  ;;  %v5685_v4 = vld [vmem:[#allocation13 + $0x4] ss:$8 sps:$4 sm:$0xff]  }
 0x821   :  { %v6943_v32 = vadd.f32 %v6109_v29, %v1811_v19  ;;  %v6959_v19 = vpack.c.bf16 %v1932_v63, %v1930_v9  ;;  %v5683_v26 = vld [vmem:[#allocation13] ss:$8 sps:$4 sm:$0xff]   ;;  %v5688_v13 = vld [vmem:[#allocation13 + $0x14] ss:$8 sps:$4 sm:$0xff]   ;;  %v5691_v29 = vld [vmem:[#allocation13 + $0x24] ss:$8 sps:$4 sm:$0xff]  }
 0x822   :  { %v6945_v52 = vadd.f32 %v6110_v40, %v1812_v24  ;;  %v1825_v54 = vadd.f32 %v6941_v20, %v6939_v6  ;;  %v5686_v24 = vld [vmem:[#allocation13 + $0x10] ss:$8 sps:$4 sm:$0xff]   ;;  %v5689_v40 = vld [vmem:[#allocation13 + $0x20] ss:$8 sps:$4 sm:$0xff]  }
 0x823   :  { %v1941_v9 = vld [vmem:[#allocation5 + $0x58] sm:$0xff] }
 0x824   :  { %1826 = vadd.xlane.f32.xlu0 %v1825_v54  ;;  %v1788_v56 = vpop.f32.mrb[24].mxu0  ;;  %v1828_v59 = vadd.f32 %v6945_v52, %v6943_v32  ;;  %v5694_v54 = vld [vmem:[#allocation13 + $0x34] ss:$8 sps:$4 sm:$0xff]  }
 0x825   :  { %v6951_v62 = vadd.f32 %v1802_v46, %v1788_v56  ;;  %v1790_v41 = vpop.f32.mrb[25].mxu0  ;;  %v5692_v56 = vld [vmem:[#allocation13 + $0x30] ss:$8 sps:$4 sm:$0xff]  }
 0x826   :  { %v6953_v42 = vadd.f32 %v1806_v37, %v1790_v41  ;;  %1829 = vadd.xlane.f32.xlu1 %v1828_v59  ;;  %v1792_v43 = vpop.f32.mrb[26].mxu0  ;;  %v5697_v59 = vld [vmem:[#allocation13 + $0x44] ss:$8 sps:$4 sm:$0xff]   ;;  %v5695_v41 = vld [vmem:[#allocation13 + $0x40] ss:$8 sps:$4 sm:$0xff]  }
 0x827   :  { %v6955_v53 = vadd.f32 %v1802_v46, %v1792_v43  ;;  %v1794_v12 = vpop.f32.mrb[27].mxu0  ;;  %v5674_v46 = vld [vmem:[#allocation14 + $0x1a0] ss:$16 sps:$4 sm:$0xff]   ;;  %v5700_v43 = vld [vmem:[#allocation13 + $0x54] ss:$8 sps:$4 sm:$0xff]  }
 0x828   :  { %v6957_v55 = vadd.f32 %v1806_v37, %v1794_v12  ;;  %v5679_v37 = vld [vmem:[#allocation14 + $0x1c4] ss:$16 sps:$4 sm:$0xff]   ;;  %2381 = vmatpush1.bf16.msra.mxu1 %v5674_v46  ;;  %v5698_v12 = vld [vmem:[#allocation13 + $0x50] ss:$8 sps:$4 sm:$0xff]  }
 0x829   :  { %2382 = vmatprep.subr.bf16.mxu1 %v5679_v37  ;;  %v6989_v22 = vadd.f32 %v6113_v21, %v6955_v53  ;;  %v1934_v53 = vld [vmem:[#allocation5 + $0x20] sm:$0xff] }
 0x82a   :  { %v6992_v25 = vadd.f32 %v6114_v23, %v6957_v55  ;;  %v7000_v46 = vpack.c.bf16 %v1936_v36, %v1934_v53  ;;  %v5715_v55 = vld [vmem:[#allocation13 + $0xa4] ss:$8 sps:$4 sm:$0xff]   ;;  %v5713_v37 = vld [vmem:[#allocation13 + $0xa0] ss:$8 sps:$4 sm:$0xff]  }
 0x82c   :  { %2383 = vmatpush1.bf16.msra.mxu1 %v5677_v38  ;;  %v1834_v28 = vadd.f32 %v6992_v25, %v6989_v22  ;;  %v5718_v38 = vld [vmem:[#allocation13 + $0xb4] ss:$8 sps:$4 sm:$0xff]  }
 0x82d   :  { %2384 = vmatprep.subr.bf16.mxu1 %v5682_v39  ;;  %v5716_v39 = vld [vmem:[#allocation13 + $0xb0] ss:$8 sps:$4 sm:$0xff]  }
 0x830   :  { %2385 = vmatpush1.bf16.msra.mxu1 %v5680_v0  ;;  %v1939_v0 = vld [vmem:[#allocation5 + $0x48] sm:$0xff] }
 0x831   :  { %2688 = vmatprep.subr.bf16.mxu1 %v5685_v4  ;;  %v7004_v63 = vpack.c.bf16 %v1941_v9, %v1939_v0  ;;  %v1938_v4 = vld [vmem:[#allocation5 + $0x40] sm:$0xff] }
 0x833   :  { %2387 = vmatmul.mubr.bf16.vlgmr.msra.gmra.mrb[36].mxu1 %v6959_v19 }
 0x834   :  { %2689 = vmatpush1.bf16.msra.mxu1 %v5683_v26  ;;  %2396 = vmatprep.mubr.bf16.mxu1 %v6998_v35  ;;  %v1940_v26 = vld [vmem:[#allocation5 + $0x50] sm:$0xff] }
 0x835   :  { %2690 = vmatprep.subr.bf16.mxu1 %v5688_v13  ;;  %v7006_v13 = vpack.c.bf16 %v1940_v26, %v1938_v4 }
 0x838   :  { %2691 = vmatpush1.bf16.msra.mxu1 %v5686_v24  ;;  %v5721_v24 = vld [vmem:[#allocation13 + $0xc4] ss:$8 sps:$4 sm:$0xff]  }
 0x839   :  { %2692 = vmatprep.subr.bf16.mxu1 %v5691_v29  ;;  %v5719_v29 = vld [vmem:[#allocation13 + $0xc0] ss:$8 sps:$4 sm:$0xff]  }
 0x83b   :  { %2397 = vmatmul.mubr.bf16.gmra.mrb[40].mxu1 %v7000_v46 }
 0x83c   :  { %2693 = vmatpush1.bf16.msra.mxu1 %v5689_v40  ;;  %2406 = vmatprep.mubr.bf16.mxu1 %v7004_v63  ;;  %v5724_v40 = vld [vmem:[#allocation13 + $0xd4] ss:$8 sps:$4 sm:$0xff]  }
 0x83d   :  { %2694 = vmatprep.subr.bf16.mxu1 %v5694_v54  ;;  %v5722_v54 = vld [vmem:[#allocation13 + $0xd0] ss:$8 sps:$4 sm:$0xff]  }
 0x840   :  { %2695 = vmatpush1.bf16.msra.mxu1 %v5692_v56  ;;  %v5727_v56 = vld [vmem:[#allocation13 + $0xe4] ss:$8 sps:$4 sm:$0xff]  }
 0x841   :  { %2696 = vmatprep.subr.bf16.mxu1 %v5697_v59  ;;  %v5725_v59 = vld [vmem:[#allocation13 + $0xe0] ss:$8 sps:$4 sm:$0xff]  }
 0x843   :  { %2407 = vmatmul.mubr.bf16.gmra.mrb[44].mxu1 %v7006_v13 }
 0x844   :  { %2697 = vmatpush1.bf16.msra.mxu1 %v5695_v41  ;;  %v5728_v41 = vld [vmem:[#allocation13 + $0xf0] ss:$8 sps:$4 sm:$0xff]  }
 0x845   :  { %2698 = vmatprep.subr.bf16.mxu1 %v5700_v43  ;;  %v5730_v43 = vld [vmem:[#allocation13 + $0xf4] ss:$8 sps:$4 sm:$0xff]  }
 0x848   :  { %2699 = vmatpush1.bf16.msra.mxu1 %v5698_v12  ;;  %v5731_v12 = vld [vmem:[#allocation14 + $0x8] ss:$16 sps:$4 sm:$0xff]  }
 0x849   :  { %2700 = vmatprep.subr.bf16.mxu1 %v5703_v49  ;;  %v5733_v49 = vld [vmem:[#allocation14 + $0xc] ss:$16 sps:$4 sm:$0xff]  }
 0x84a   :  { %2417 = vmatprep.subr.bf16.mxu0 %v5733_v49 }
 0x84b   :  { %2418 = vmatpush1.bf16.msra.mxu0 %v5731_v12  ;;  %v5758_v12 = vld [vmem:[#allocation14 + $0x128] ss:$16 sps:$4 sm:$0xff]  }
 0x84c   :  { %2701 = vmatpush1.bf16.msra.mxu1 %v5701_v15  ;;  %v5736_v15 = vld [vmem:[#allocation14 + $0x2c] ss:$16 sps:$4 sm:$0xff]  }
 0x84d   :  { %2702 = vmatprep.subr.bf16.mxu1 %v5706_v58  ;;  %v5734_v58 = vld [vmem:[#allocation14 + $0x28] ss:$16 sps:$4 sm:$0xff]   ;;  %2419 = vmatprep.subr.bf16.mxu0 %v5736_v15 }
 0x84f   :  { %2420 = vmatpush1.bf16.msra.mxu0 %v5734_v58 }
 0x850   :  { %2703 = vmatpush1.bf16.msra.mxu1 %v5704_v60  ;;  %v5739_v60 = vld [vmem:[#allocation14 + $0x4c] ss:$16 sps:$4 sm:$0xff]  }
 0x851   :  { %2704 = vmatprep.subr.bf16.mxu1 %v5709_v2  ;;  %v5737_v2 = vld [vmem:[#allocation14 + $0x48] ss:$16 sps:$4 sm:$0xff]   ;;  %2421 = vmatprep.subr.bf16.mxu0 %v5739_v60 }
 0x853   :  { %2422 = vmatpush1.bf16.msra.mxu0 %v5737_v2  ;;  %v5763_v2 = vld [vmem:[#allocation14 + $0x14c] ss:$16 sps:$4 sm:$0xff]  }
 0x854   :  { %2705 = vmatpush1.bf16.msra.mxu1 %v5707_v3  ;;  %v5742_v3 = vld [vmem:[#allocation14 + $0x6c] ss:$16 sps:$4 sm:$0xff]  }
 0x855   :  { %2706 = vmatprep.subr.bf16.mxu1 %v5712_v5  ;;  %v5740_v5 = vld [vmem:[#allocation14 + $0x68] ss:$16 sps:$4 sm:$0xff]   ;;  %2423 = vmatprep.subr.bf16.mxu0 %v5742_v3 }
 0x856   :  { %v5761_v3 = vld [vmem:[#allocation14 + $0x148] ss:$16 sps:$4 sm:$0xff]  }
 0x857   :  { %2424 = vmatpush1.bf16.msra.mxu0 %v5740_v5 }
 0x858   :  { %2707 = vmatpush1.bf16.msra.mxu1 %v5710_v57  ;;  %v5745_v57 = vld [vmem:[#allocation14 + $0x8c] ss:$16 sps:$4 sm:$0xff]  }
 0x859   :  { %2708 = vmatprep.subr.bf16.mxu1 %v5715_v55  ;;  %2425 = vmatprep.subr.bf16.mxu0 %v5745_v57 }
 0x85c   :  { %2709 = vmatpush1.bf16.msra.mxu1 %v5713_v37 }
 0x85d   :  { %2710 = vmatprep.subr.bf16.mxu1 %v5718_v38 }
 0x860   :  { %2711 = vmatpush1.bf16.msra.mxu1 %v5716_v39 }
 0x861   :  { %2712 = vmatprep.subr.bf16.mxu1 %v5721_v24  ;;  %v1910_v24 = vld [vmem:[%s7475_s9] sm:$0x3] }
 0x864   :  { %2713 = vmatpush1.bf16.msra.mxu1 %v5719_v29 }
 0x865   :  { %2714 = vmatprep.subr.bf16.mxu1 %v5724_v40 }
 0x868   :  { %2715 = vmatpush1.bf16.msra.mxu1 %v5722_v54 }
 0x869   :  { %2716 = vmatprep.subr.bf16.mxu1 %v5727_v56  ;;  %v5760_v56 = vld [vmem:[#allocation14 + $0x12c] ss:$16 sps:$4 sm:$0xff]  }
 0x86c   :  { %2717 = vmatpush1.bf16.msra.mxu1 %v5725_v59 }
 0x86d   :  { %2718 = vmatprep.subr.bf16.mxu1 %v5730_v43  ;;  %v7049_v43 = vrot.slane %v1910_v24, %v6758_v51 }
 0x870   :  { %2719 = vmatpush1.bf16.msra.mxu1 %v5728_v41  ;;  %v7046_v41 = vrot.slane %v1910_v24, %v6749_v48 }
 0x871   :  { %5333 = vmatprep.subr.bf16.mxu1 %v6411_v44 }
 0x8b1   :  { %v1827_v61 = vpop.xlane.xlu0 %1826 }
 0x8b2   :  { %v1838_v1 = vmul.f32 0.00390625, %v1827_v61  ;;  %v5743_v61 = vld [vmem:[#allocation14 + $0x88] ss:$16 sps:$4 sm:$0xff]  }
 0x8b3   :  { %v1830_v27 = vpop.xlane.xlu1 %1829  ;;  %2426 = vmatpush1.bf16.msra.mxu0 %v5743_v61 }
 0x8b4   :  { %v6963_v7 = vsub.f32 %v6939_v6, %v1838_v1  ;;  %v6966_v8 = vsub.f32 %v6941_v20, %v1838_v1  ;;  %v1839_v10 = vmul.f32 0.00390625, %v1830_v27  ;;  %v6979_v6 = vadd.f32 %v6111_v16, %v6951_v62  ;;  %v5748_v1 = vld [vmem:[#allocation14 + $0xac] ss:$16 sps:$4 sm:$0xff]   ;;  %v5746_v27 = vld [vmem:[#allocation14 + $0xa8] ss:$16 sps:$4 sm:$0xff]  }
 0x8b5   :  { %v6982_v20 = vadd.f32 %v6112_v17, %v6953_v42  ;;  %2427 = vmatprep.subr.bf16.mxu0 %v5748_v1  ;;  %v5752_v16 = vld [vmem:[#allocation14 + $0xe8] ss:$16 sps:$4 sm:$0xff]   ;;  %v5757_v17 = vld [vmem:[#allocation14 + $0x10c] ss:$16 sps:$4 sm:$0xff]  }
 0x8b6   :  { %v6969_v11 = vsub.f32 %v6943_v32, %v1839_v10  ;;  %v6972_v45 = vsub.f32 %v6945_v52, %v1839_v10  ;;  %v1850_v31 = vmul.f32 %v6963_v7, %v6963_v7  ;;  %v1851_v14 = vmul.f32 %v6966_v8, %v6966_v8  ;;  %v5751_v10 = vld [vmem:[#allocation14 + $0xcc] ss:$16 sps:$4 sm:$0xff]  }
 0x8b7   :  { %v1831_v42 = vadd.f32 %v6982_v20, %v6979_v6  ;;  %2428 = vmatpush1.bf16.msra.mxu0 %v5746_v27  ;;  %v5766_v27 = vld [vmem:[#allocation14 + $0x16c] ss:$16 sps:$4 sm:$0xff]  }
 0x8b8   :  { %v1858_v18 = vadd.f32 %v1851_v14, %v1850_v31  ;;  %v1852_v32 = vmul.f32 %v6969_v11, %v6969_v11  ;;  %v1853_v52 = vmul.f32 %v6972_v45, %v6972_v45  ;;  %v5749_v31 = vld [vmem:[#allocation14 + $0xc8] ss:$16 sps:$4 sm:$0xff]   ;;  %2429 = vmatprep.subr.bf16.mxu0 %v5751_v10  ;;  %v5754_v14 = vld [vmem:[#allocation14 + $0xec] ss:$16 sps:$4 sm:$0xff]  }
 0x8b9   :  { %v5764_v10 = vld [vmem:[#allocation14 + $0x168] ss:$16 sps:$4 sm:$0xff]  }
 0x8ba   :  { %1859 = vadd.xlane.f32.xlu0 %v1858_v18  ;;  %v1861_v62 = vadd.f32 %v1853_v52, %v1852_v32  ;;  %v5755_v18 = vld [vmem:[#allocation14 + $0x108] ss:$16 sps:$4 sm:$0xff]  }
 0x8bb   :  { %2430 = vmatpush1.bf16.msra.mxu0 %v5749_v31  ;;  %v5769_v31 = vld [vmem:[#allocation14 + $0x18c] ss:$16 sps:$4 sm:$0xff]  }
 0x8bc   :  { %1862 = vadd.xlane.f32.xlu1 %v1861_v62  ;;  %2431 = vmatprep.subr.bf16.mxu0 %v5754_v14  ;;  %v5767_v14 = vld [vmem:[#allocation14 + $0x188] ss:$16 sps:$4 sm:$0xff]  }
 0x8be   :  { %1832 = vadd.xlane.f32.xlu0 %v1831_v42 }
 0x8bf   :  { %2432 = vmatpush1.bf16.msra.mxu0 %v5752_v16  ;;  %v5772_v16 = vld [vmem:[#allocation14 + $0x1ac] ss:$16 sps:$4 sm:$0xff]  }
 0x8c0   :  { %1835 = vadd.xlane.f32.xlu1 %v1834_v28  ;;  %2433 = vmatprep.subr.bf16.mxu0 %v5757_v17  ;;  %v5770_v17 = vld [vmem:[#allocation14 + $0x1a8] ss:$16 sps:$4 sm:$0xff]  }
 0x8c3   :  { %2434 = vmatpush1.bf16.msra.mxu0 %v5755_v18  ;;  %v5775_v18 = vld [vmem:[#allocation14 + $0x1cc] ss:$16 sps:$4 sm:$0xff]  }
 0x8c4   :  { %2435 = vmatprep.subr.bf16.mxu0 %v5760_v56 }
 0x8c7   :  { %2436 = vmatpush1.bf16.msra.mxu0 %v5758_v12 }
 0x8c8   :  { %2437 = vmatprep.subr.bf16.mxu0 %v5763_v2 }
 0x8cb   :  { %2438 = vmatpush1.bf16.msra.mxu0 %v5761_v3 }
 0x8cc   :  { %2439 = vmatprep.subr.bf16.mxu0 %v5766_v27 }
 0x8cf   :  { %2440 = vmatpush1.bf16.msra.mxu0 %v5764_v10 }
 0x8d0   :  { %2441 = vmatprep.subr.bf16.mxu0 %v5769_v31 }
 0x8d3   :  { %2442 = vmatpush1.bf16.msra.mxu0 %v5767_v14 }
 0x8d4   :  { %2443 = vmatprep.subr.bf16.mxu0 %v5772_v16 }
 0x8d7   :  { %2444 = vmatpush1.bf16.msra.mxu0 %v5770_v17 }
 0x8d8   :  { %2445 = vmatprep.subr.bf16.mxu0 %v5775_v18 }
 0x947   :  { %v1860_v32 = vpop.xlane.xlu0 %1859 }
 0x948   :  { %v1870_v52 = vmul.f32 0.00390625, %v1860_v32  ;;  %v5773_v32 = vld [vmem:[#allocation14 + $0x1c8] ss:$16 sps:$4 sm:$0xff]  }
 0x949   :  { %v1863_v21 = vpop.xlane.xlu1 %1862  ;;  %2446 = vmatpush1.bf16.msra.mxu0 %v5773_v32 }
 0x94a   :  { %v1874_v23 = vadd.f32 1e-05, %v1870_v52  ;;  %v1871_v62 = vmul.f32 0.00390625, %v1863_v21  ;;  %v5778_v52 = vld [vmem:[#allocation14 + $0x1ec] ss:$16 sps:$4 sm:$0xff]  }
 0x94b   :  { %v1833_v42 = vpop.xlane.xlu0 %1832  ;;  %v5776_v21 = vld [vmem:[#allocation14 + $0x1e8] ss:$16 sps:$4 sm:$0xff]   ;;  %2447 = vmatprep.subr.bf16.mxu0 %v5778_v52 }
 0x94c   :  { %6051 = vrsqrt.f32 %v1874_v23  ;;  %v1875_v28 = vadd.f32 1e-05, %v1871_v62  ;;  %v1840_v33 = vmul.f32 0.00390625, %v1833_v42  ;;  %v7076_v23 = vld [vmem:[%s7479_s13] sm:$0xf]  ;;  %v2388_v62 = vpop.f32.mrb[36].mxu1 }
 0x94d   :  { %v1836_v34 = vpop.xlane.xlu1 %1835  ;;  %2448 = vmatpush1.bf16.msra.mxu0 %v5776_v21  ;;  %v2390_v42 = vpop.f32.mrb[37].mxu1 }
 0x94e   :  { %6053 = vrsqrt.f32 %v1875_v28  ;;  %v7012_v53 = vsub.f32 %v6979_v6, %v1840_v33  ;;  %v7015_v36 = vsub.f32 %v6982_v20, %v1840_v33  ;;  %v1841_v55 = vmul.f32 0.00390625, %v1836_v34  ;;  %v1890_v6 = vld [vmem:[%s7539_s25] sm:$0x3]  ;;  %5325 = vmatprep.subr.bf16.mxu0 %v6411_v44  ;;  %v2392_v34 = vpop.f32.mrb[38].mxu1 }
 0x94f   :  { %v7035_v4 = vrot.slane %v1890_v6, %v6749_v48  ;;  %v7038_v26 = vrot.slane %v1890_v6, %v6758_v51  ;;  %v2017_v28 = vrot.slane %v7076_v23, %v6749_v48  ;;  %v7083_v33 = vrot.slane %v7076_v23, %v6758_v51 }
 0x950   :  { %v7018_v37 = vsub.f32 %v6989_v22, %v1841_v55  ;;  %v7021_v38 = vsub.f32 %v6992_v25, %v1841_v55  ;;  %v1854_v39 = vmul.f32 %v7012_v53, %v7012_v53  ;;  %v1855_v0 = vmul.f32 %v7015_v36, %v7015_v36  ;;  %2450 = vmatmul.mubr.bf16.vlgmr.msra.gmra.mrb[28].mxu0 %v6959_v19  ;;  %v2394_v55 = vpop.f32.mrb[39].mxu1 }
 0x951   :  { %2459 = vmatprep.mubr.bf16.mxu0 %v6998_v35  ;;  %v2393_v6 = vadd.f32 %v2392_v34, %v2017_v28  ;;  %v2398_v19 = vpop.f32.mrb[40].mxu1 }
 0x952   :  { %v1864_v9 = vadd.f32 %v1855_v0, %v1854_v39  ;;  %v1856_v20 = vmul.f32 %v7018_v37, %v7018_v37  ;;  %v1857_v22 = vmul.f32 %v7021_v38, %v7021_v38  ;;  %v2389_v39 = vadd.f32 %v2388_v62, %v2017_v28 }
 0x953   :  { %v7088_v0 = vadd.f32 %v2390_v42, %v7083_v33  ;;  %v2399_v35 = vadd.f32 %v2398_v19, %v2017_v28 }
 0x954   :  { %1865 = vadd.xlane.f32.xlu0 %v1864_v9  ;;  %v1867_v25 = vadd.f32 %v1857_v22, %v1856_v20  ;;  %v7091_v9 = vadd.f32 %v2394_v55, %v7083_v33  ;;  %v2743_v20 = vpack.c.bf16 %v2393_v6, %v2389_v39 }
 0x956   :  { %v6052_v29 = vpop.eup %6051  ;;  %1868 = vadd.xlane.f32.xlu1 %v1867_v25  ;;  %v3011_v22 = vpack.c.bf16 %v7091_v9, %v7088_v0  ;;  %5326 = vmatpush3.bf16.xpose.msra.mxu0 %v2743_v20  ;;  %v7101_v25 = vpop.f32.mrb[41].mxu1 }
 0x957   :  { %v1882_v40 = vmul.f32 %v6052_v29, %v6963_v7  ;;  %v1883_v54 = vmul.f32 %v6052_v29, %v6966_v8  ;;  %5327 = vmatprep.subr.bf16.mxu0 %v6411_v44  ;;  %v2402_v24 = vpop.f32.mrb[42].mxu1  ;;  %v2744_v29 = vpack.c.bf16 %v2399_v35, %v2399_v35 }
 0x958   :  { %v6054_v59 = vpop.eup %6053  ;;  %2460 = vmatmul.mubr.bf16.gmra.mrb[32].mxu0 %v7000_v46 }
 0x959   :  { %v1902_v49 = vmul.f32 %v7035_v4, %v1882_v40  ;;  %v1884_v15 = vmul.f32 %v6054_v59, %v6969_v11  ;;  %v1885_v58 = vmul.f32 %v6054_v59, %v6972_v45  ;;  %v1903_v60 = vmul.f32 %v7038_v26, %v1883_v54  ;;  %2469 = vmatprep.mubr.bf16.mxu0 %v7004_v63  ;;  %v2404_v40 = vpop.f32.mrb[43].mxu1 }
 0x95a   :  { %v2403_v54 = vadd.f32 %v2402_v24, %v2017_v28  ;;  %v7105_v46 = vadd.f32 %v2404_v40, %v7083_v33  ;;  %v2408_v63 = vpop.f32.mrb[44].mxu1  ;;  %v2025_v40 = vrot.slane %v7076_v23, %v6746_v47 }
 0x95b   :  { %v1904_v7 = vmul.f32 %v7035_v4, %v1884_v15  ;;  %v1905_v8 = vmul.f32 %v7038_v26, %v1885_v58  ;;  %v7058_v5 = vadd.f32 %v7049_v43, %v1903_v60  ;;  %v7064_v11 = vadd.f32 %v7046_v41, %v1902_v49 }
 0x95c   :  { %v2409_v56 = vadd.f32 %v2408_v63, %v2017_v28 }
 0x95d   :  { %v7061_v57 = vadd.f32 %v7049_v43, %v1905_v8  ;;  %v7067_v45 = vadd.f32 %v7046_v41, %v1904_v7 }
 0x95e   :  { %5328 = vmatpush3.bf16.xpose.msra.mxu0 %v2744_v29  ;;  %v2745_v49 = vpack.c.bf16 %v2409_v56, %v2403_v54  ;;  %v2029_v54 = vrot.slane %v7076_v23, %v6755_v50 }
 0x95f   :  { %v2481_v61 = vpack.c.bf16 %v7061_v57, %v7058_v5  ;;  %v2480_v1 = vpack.c.bf16 %v7067_v45, %v7064_v11  ;;  %5341 = vmatprep.subr.bf16.mxu0 %v6411_v44 }
 0x960   :  { %2470 = vmatmul.mubr.bf16.gmra.mrb[36].mxu0 %v7006_v13  ;;  %v2410_v13 = vpop.f32.mrb[45].mxu1 }
 0x961   :  { %2720 = vmatprep.mubr.bf16.mxu1 %v2481_v61  ;;  %5329 = vmatprep.mubr.msk.bf16.mxu0 %vm6412_vm0, %v6411_v44  ;;  %v7108_v59 = vadd.f32 %v2410_v13, %v7083_v33  ;;  %v2412_v12 = vpop.f32.mrb[46].mxu1 }
 0x962   :  { %2721 = vmatmul.mubr.bf16.vlgmr.msra.gmra.mrb[48].mxu1 %v2480_v1  ;;  %v7110_v15 = vpop.f32.mrb[47].mxu1  ;;  %v2413_v60 = vadd.f32 %v2412_v12, %v2017_v28 }
 0x963   :  { %v3013_v58 = vpack.c.bf16 %v7108_v59, %v7105_v46  ;;  %5334 = vmatpush3.bf16.xpose.msra.mxu1 %v2745_v49  ;;  %v2415_v0 = vadd.f32 %v7110_v15, %v7083_v33  ;;  %v268_v46 = vld [vmem:[#allocation8 + $0x1] sm:$0x1] }
 0x964   :  { %5335 = vmatprep.subr.bf16.mxu1 %v6411_v44  ;;  %v2746_v7 = vpack.c.bf16 %v2413_v60, %v2413_v60  ;;  %vm270_vm1 = vcmp.ne.f32.partialorder %v268_v46, 0.0 }
 0x965   :  { %v3014_v9 = vpack.c.bf16 %v2415_v0, %v2415_v0 }
 0x96b   :  { %5336 = vmatpush3.bf16.xpose.msra.mxu1 %v2746_v7 }
 0x96c   :  { %5349 = vmatprep.subr.bf16.mxu1 %v6411_v44 }
 0x9e1   :  { %v1866_v8 = vpop.xlane.xlu0 %1865 }
 0x9e2   :  { %v1872_v2 = vmul.f32 0.00390625, %v1866_v8 }
 0x9e3   :  { %v1869_v3 = vpop.xlane.xlu1 %1868 }
 0x9e4   :  { %v1876_v61 = vadd.f32 1e-05, %v1872_v2  ;;  %v1873_v1 = vmul.f32 0.00390625, %v1869_v3 }
 0x9e6   :  { %6055 = vrsqrt.f32 %v1876_v61  ;;  %v1877_v27 = vadd.f32 1e-05, %v1873_v1 }
 0x9e8   :  { %6057 = vrsqrt.f32 %v1877_v27 }
 0x9f0   :  { %v6056_v10 = vpop.eup %6055 }
 0x9f1   :  { %v1887_v31 = vmul.f32 %v6056_v10, %v7015_v36  ;;  %v1886_v14 = vmul.f32 %v6056_v10, %v7012_v53 }
 0x9f2   :  { %v6058_v16 = vpop.eup %6057 }
 0x9f3   :  { %v1889_v17 = vmul.f32 %v6058_v16, %v7021_v38  ;;  %v1907_v18 = vmul.f32 %v7038_v26, %v1887_v31  ;;  %v1888_v32 = vmul.f32 %v6058_v16, %v7018_v37  ;;  %v1906_v52 = vmul.f32 %v7035_v4, %v1886_v14 }
 0x9f5   :  { %v1909_v21 = vmul.f32 %v7038_v26, %v1889_v17  ;;  %v1908_v62 = vmul.f32 %v7035_v4, %v1888_v32  ;;  %v7125_v42 = vadd.f32 %v7049_v43, %v1907_v18  ;;  %v7131_v53 = vadd.f32 %v7046_v41, %v1906_v52  ;;  %v2516_v4 = vld [vmem:[%s7477_s11] sm:$0x3] }
 0x9f7   :  { %v7128_v36 = vadd.f32 %v7049_v43, %v1909_v21  ;;  %v7134_v38 = vadd.f32 %v7046_v41, %v1908_v62  ;;  %v7146_v43 = vrot.slane %v2516_v4, %v6758_v51  ;;  %v2521_v41 = vrot.slane %v2516_v4, %v6749_v48 }
 0x9f9   :  { %v2483_v37 = vpack.c.bf16 %v7128_v36, %v7125_v42  ;;  %v2482_v26 = vpack.c.bf16 %v7134_v38, %v7131_v53 }
 0x9fb   :  { %2730 = vmatprep.mubr.bf16.mxu1 %v2483_v37 }
 0x9fc   :  { %2731 = vmatmul.mubr.bf16.gmra.mrb[52].mxu1 %v2482_v26 }
 0x9fd   :  { %5337 = vmatprep.mubr.msk.bf16.mxu1 %vm6412_vm0, %v6411_v44 }
 0xa23   :  { %v2451_v63 = vpop.f32.mrb[28].mxu0 }
 0xa24   :  { %v2452_v56 = vadd.f32 %v2451_v63, %v2025_v40  ;;  %v2453_v13 = vpop.f32.mrb[29].mxu0 }
 0xa25   :  { %v7163_v12 = vadd.f32 %v2453_v13, %v2029_v54  ;;  %v2455_v49 = vpop.f32.mrb[30].mxu0 }
 0xa26   :  { %v2456_v60 = vadd.f32 %v2455_v49, %v2025_v40  ;;  %v2457_v7 = vpop.f32.mrb[31].mxu0 }
 0xa27   :  { %v7165_v8 = vadd.f32 %v2457_v7, %v2029_v54 }
 0xa28   :  { %v2747_v3 = vpack.c.bf16 %v2456_v60, %v2452_v56 }
 0xa29   :  { %v3015_v27 = vpack.c.bf16 %v7165_v8, %v7163_v12 }
 0xa2b   :  { %v2461_v2 = vpop.f32.mrb[32].mxu0 }
 0xa2c   :  { %v2462_v61 = vadd.f32 %v2461_v2, %v2025_v40  ;;  %v2463_v1 = vpop.f32.mrb[33].mxu0 }
 0xa2d   :  { %v2464_v10 = vadd.f32 %v2463_v1, %v2029_v54  ;;  %v2465_v23 = vpop.f32.mrb[34].mxu0 }
 0xa2e   :  { %v2748_v31 = vpack.c.bf16 %v2462_v61, %v2462_v61  ;;  %v2466_v14 = vadd.f32 %v2465_v23, %v2025_v40  ;;  %v2467_v16 = vpop.f32.mrb[35].mxu0 }
 0xa2f   :  { %v3016_v17 = vpack.c.bf16 %v2464_v10, %v2464_v10  ;;  %v7169_v18 = vadd.f32 %v2467_v16, %v2029_v54  ;;  %v267_v10 = vld [vmem:[#allocation8] sm:$0x1] }
 0xa30   :  { %v2901_v52 = vsel %vm2899_vm12, %v2748_v31, 0  ;;  %vm269_vm13 = vcmp.ne.f32.partialorder %v267_v10, 0.0 }
 0xa31   :  { %v7174_v37 = vsel %vm2899_vm12, %v3016_v17, 0 }
 0xa33   :  { %v2471_v32 = vpop.f32.mrb[36].mxu0 }
 0xa34   :  { %v2472_v21 = vadd.f32 %v2471_v32, %v2025_v40  ;;  %v2473_v62 = vpop.f32.mrb[37].mxu0 }
 0xa35   :  { %v2722_v28 = vpop.f32.mrb[48].mxu1  ;;  %v7176_v26 = vadd.f32 %v2473_v62, %v2029_v54  ;;  %v2475_v4 = vpop.f32.mrb[38].mxu0 }
 0xa36   :  { %v2724_v34 = vpop.f32.mrb[49].mxu1  ;;  %v2723_v6 = vadd.f32 %v2722_v28, %v2521_v41  ;;  %v2749_v28 = vpack.c.bf16 %v2472_v21, %v2466_v14 }
 0xa37   :  { %v7150_v55 = vadd.f32 %v2724_v34, %v7146_v43  ;;  %v2726_v39 = vpop.f32.mrb[50].mxu1  ;;  %v2476_v34 = vadd.f32 %v2475_v4, %v2025_v40 }
 0xa38   :  { %v2727_v20 = vadd.f32 %v2726_v39, %v2521_v41  ;;  %v2728_v19 = vpop.f32.mrb[51].mxu1  ;;  %v2477_v39 = vpop.f32.mrb[39].mxu0 }
 0xa39   :  { %v7153_v35 = vadd.f32 %v2728_v19, %v7146_v43  ;;  %v2750_v19 = vpack.c.bf16 %v2476_v34, %v2476_v34 }
 0xa3a   :  { %v2741_v24 = vpack.c.bf16 %v2727_v20, %v2723_v6  ;;  %v3017_v6 = vpack.c.bf16 %v7176_v26, %v7169_v18  ;;  %v2478_v20 = vadd.f32 %v2477_v39, %v2029_v54 }
 0xa3b   :  { %v3009_v29 = vpack.c.bf16 %v7153_v35, %v7150_v55  ;;  %v2948_v63 = vsel %vm2899_vm12, %v2750_v19, 0 }
 0xa3c   :  { %5330 = vmatmul.mubr.bf16.vlgmr.msra.gmra.mrb[40].mxu0 %v2741_v24  ;;  %v3018_v24 = vpack.c.bf16 %v2478_v20, %v2478_v20 }
 0xa3d   :  { %5345 = vmatprep.mubr.msk.bf16.mxu0 %vm6412_vm0, %v6411_v44  ;;  %5342 = vmatpush3.bf16.msra.mxu0 %v2747_v3 }
 0xa3e   :  { %5343 = vmatprep.subr.bf16.mxu0 %v6411_v44  ;;  %v7183_v56 = vsel %vm2899_vm12, %v3018_v24, 0 }
 0xa41   :  { %5344 = vmatpush3.bf16.msra.mxu0 %v2901_v52 }
 0xa42   :  { %5357 = vmatprep.subr.bf16.mxu0 %v6411_v44 }
 0xacf   :  { %v2732_v13 = vpop.f32.mrb[52].mxu1 }
 0xad0   :  { %v2734_v49 = vpop.f32.mrb[53].mxu1  ;;  %v2733_v7 = vadd.f32 %v2732_v13, %v2521_v41 }
 0xad1   :  { %v7186_v60 = vadd.f32 %v2734_v49, %v7146_v43  ;;  %v2736_v40 = vpop.f32.mrb[54].mxu1 }
 0xad2   :  { %v2737_v2 = vadd.f32 %v2736_v40, %v2521_v41  ;;  %v2738_v3 = vpop.f32.mrb[55].mxu1  ;;  %v2833_v41 = vsel %vm269_vm13, 1, %v6413_v30 }
 0xad3   :  { %v7189_v54 = vadd.f32 %v2738_v3, %v7146_v43  ;;  %v2838_v43 = vrot.slane %v2833_v41, %v6749_v48 }
 0xad4   :  { %v2742_v61 = vpack.c.bf16 %v2737_v2, %v2733_v7 }
 0xad5   :  { %v3010_v1 = vpack.c.bf16 %v7189_v54, %v7186_v60  ;;  %vm7199_vm14 = vcmp.eq.s32.totalorder %v2838_v43, 1 }
 0xad6   :  { %5338 = vmatmul.mubr.bf16.vlgmr.msra.gmra.mrb[56].mxu1 %v2742_v61 }
 0xad7   :  { %5350 = vmatpush3.bf16.msra.mxu1 %v2749_v28  ;;  %5353 = vmatprep.mubr.msk.bf16.mxu1 %vm6412_vm0, %v6411_v44 }
 0xad8   :  { %5351 = vmatprep.subr.bf16.mxu1 %v6411_v44 }
 0xadb   :  { %5352 = vmatpush3.bf16.msra.mxu1 %v2948_v63 }
 0xadc   :  { %5381 = vmatprep.subr.bf16.mxu1 %v6411_v44 }
 0xb0f   :  { %v2785_v31 = vpop.f32.mrb[40].mxu0 }
 0xb10   :  { %v2845_v14 = vsel %vm7199_vm14, %v2785_v31, -10000.0  ;;  %v5331_v16 = vpop.f32.mrb[41].mxu0 }
 0xb11   :  { %v2788_v17 = vpop.f32.mrb[42].mxu0  ;;  %v2850_v32 = vsel %vm2849_vm15, %v2845_v14, -inf }
 0xb12   :  { %v2846_v52 = vsel %vm7199_vm14, %v2788_v17, -10000.0  ;;  %2851 = vmax.xlane.f32.xlu0 %v2850_v32  ;;  %v5332_v21 = vpop.f32.mrb[43].mxu0  ;;  %v2401_v17 = vadd.f32 %v7101_v25, %v7083_v33 }
 0xb13   :  { %v2853_v62 = vsel %vm2849_vm15, %v2846_v52, -inf }
 0xb14   :  { %2854 = vmax.xlane.f32.xlu1 %v2853_v62  ;;  %v3012_v32 = vpack.c.bf16 %v2401_v17, %v2401_v17 }
 0xb9f   :  { %v2852_v4 = vpop.xlane.xlu0 %2851 }
 0xba0   :  { %v2862_v28 = vsub.f32 %v2845_v14, %v2852_v4 }
 0xba1   :  { %v2855_v34 = vpop.xlane.xlu1 %2854 }
 0xba2   :  { %v2866_v39 = vmul.f32 1.442695, %v2862_v28  ;;  %v2863_v20 = vsub.f32 %v2846_v52, %v2855_v34 }
 0xba4   :  { %6059 = vpow2.f32 %v2866_v39  ;;  %v2868_v19 = vmul.f32 1.442695, %v2863_v20 }
 0xba6   :  { %6061 = vpow2.f32 %v2868_v19 }
 0xba9   :  { %v2826_v24 = vpop.f32.mrb[56].mxu1 }
 0xbaa   :  { %v5339_v63 = vpop.f32.mrb[57].mxu1 }
 0xbab   :  { %v2829_v13 = vpop.f32.mrb[58].mxu1 }
 0xbac   :  { %v5340_v49 = vpop.f32.mrb[59].mxu1 }
 0xbae   :  { %v6060_v40 = vpop.eup %6059 }
 0xbaf   :  { %v2874_v7 = vsel %vm2849_vm15, %v6060_v40, 0.0 }
 0xbb0   :  { %v6062_v2 = vpop.eup %6061  ;;  %2875 = vadd.xlane.f32.xlu0 %v2874_v7 }
 0xbb1   :  { %v2877_v3 = vsel %vm2849_vm15, %v6062_v2, 0.0 }
 0xbb2   :  { %2878 = vadd.xlane.f32.xlu1 %v2877_v3 }
 0xc3d   :  { %v2876_v61 = vpop.xlane.xlu0 %2875 }
 0xc3e   :  { %6063 = vrcp.f32 %v2876_v61 }
 0xc3f   :  { %v2879_v10 = vpop.xlane.xlu1 %2878 }
 0xc40   :  { %6065 = vrcp.f32 %v2879_v10 }
 0xc48   :  { %v6064_v41 = vpop.eup %6063 }
 0xc49   :  { %v2890_v31 = vmul.f32 %v6064_v41, %v6060_v40 }
 0xc4a   :  { %v6066_v43 = vpop.eup %6065 }
 0xc4b   :  { %v2891_v14 = vmul.f32 %v6066_v43, %v6062_v2 }
 0xc4d   :  { %v2894_v16 = vpack.c.bf16 %v2891_v14, %v2890_v31 }
 0xc4f   :  { %5346 = vmatmul.mubr.msk.bf16.vlgmr.msra.gmra.mrb[44].mxu0 %vm2849_vm15, %v2894_v16 }
 0xc50   :  { %5358 = vmatpush3.bf16.xpose.msra.mxu0 %v3011_v22  ;;  %5361 = vmatprep.mubr.msk.bf16.mxu0 %vm6412_vm0, %v6411_v44 }
 0xc51   :  { %5359 = vmatprep.subr.bf16.mxu0 %v6411_v44 }
 0xc58   :  { %5360 = vmatpush3.bf16.xpose.msra.mxu0 %v3012_v32 }
 0xc59   :  { %5365 = vmatprep.subr.bf16.mxu0 %v6411_v44 }
 0xc5f   :  { %5362 = vmatmul.mubr.bf16.vlgmr.msra.gmra.mrb[48].mxu0 %v3009_v29 }
 0xc60   :  { %5366 = vmatpush3.bf16.xpose.msra.mxu0 %v3013_v58  ;;  %5369 = vmatprep.mubr.msk.bf16.mxu0 %vm6412_vm0, %v6411_v44  ;;  %v2834_v58 = vsel %vm270_vm1, 1, %v6413_v30 }
 0xc61   :  { %5367 = vmatprep.subr.bf16.mxu0 %v6411_v44  ;;  %v2842_v55 = vrot.slane %v2834_v58, %v6749_v48 }
 0xc63   :  { %vm7251_vm2 = vcmp.eq.s32.totalorder %v2842_v55, 1 }
 0xc64   :  { %v2847_v60 = vsel %vm7251_vm2, %v2826_v24, -10000.0  ;;  %v2848_v21 = vsel %vm7251_vm2, %v2829_v13, -10000.0 }
 0xc65   :  { %v2856_v62 = vsel %vm2849_vm15, %v2847_v60, -inf  ;;  %v2859_v4 = vsel %vm2849_vm15, %v2848_v21, -inf }
 0xc68   :  { %5368 = vmatpush3.bf16.xpose.msra.mxu0 %v3014_v9 }
 0xc69   :  { %5373 = vmatprep.subr.bf16.mxu0 %v6411_v44 }
 0xc6f   :  { %5370 = vmatmul.mubr.bf16.vlgmr.msra.gmra.mrb[52].mxu0 %v3010_v1 }
 0xc70   :  { %5374 = vmatpush3.bf16.msra.mxu0 %v3015_v27  ;;  %5377 = vmatprep.mubr.msk.bf16.mxu0 %vm6412_vm0, %v6411_v44 }
 0xc71   :  { %5375 = vmatprep.subr.bf16.mxu0 %v6411_v44 }
 0xc74   :  { %5376 = vmatpush3.bf16.msra.mxu0 %v7174_v37 }
 0xd22   :  { %v7243_v33 = vpop.f32.mrb[44].mxu0 }
 0xd23   :  { %v5347_v22 = vpop.f32.mrb[45].mxu0 }
 0xd24   :  { %v7245_v25 = vpop.f32.mrb[46].mxu0 }
 0xd25   :  { %v2991_v59 = vpack.c.bf16 %v7245_v25, %v7243_v33  ;;  %v5348_v15 = vpop.f32.mrb[47].mxu0 }
 0xd32   :  { %v3053_v29 = vpop.f32.mrb[48].mxu0 }
 0xd33   :  { %v3101_v12 = vsel %vm7199_vm14, %v3053_v29, -10000.0  ;;  %v5363_v8 = vpop.f32.mrb[49].mxu0 }
 0xd34   :  { %v3056_v27 = vpop.f32.mrb[50].mxu0  ;;  %v3105_v37 = vsel %vm2849_vm15, %v3101_v12, -inf }
 0xd35   :  { %v3102_v54 = vsel %vm7199_vm14, %v3056_v27, -10000.0  ;;  %3106 = vmax.xlane.f32.xlu0 %v3105_v37  ;;  %v5364_v1 = vpop.f32.mrb[51].mxu0 }
 0xd36   :  { %v3108_v52 = vsel %vm2849_vm15, %v3102_v54, -inf  ;;  %v5781_v1 = vld [vmem:[#allocation16 + $0x84] ss:$8 sps:$4 sm:$0xff]  }
 0xd37   :  { %3109 = vmax.xlane.f32.xlu1 %v3108_v52  ;;  %3343 = vmatprep.subr.bf16.mxu0 %v5781_v1  ;;  %v5806_v1 = vld [vmem:[#allocation16 + $0x10] ss:$8 sps:$4 sm:$0xff]  }
 0xd39   :  { %2857 = vmax.xlane.f32.xlu0 %v2856_v62 }
 0xd3b   :  { %2860 = vmax.xlane.f32.xlu1 %v2859_v4 }
 0xd42   :  { %v3094_v28 = vpop.f32.mrb[52].mxu0 }
 0xd43   :  { %v3103_v34 = vsel %vm7251_vm2, %v3094_v28, -10000.0  ;;  %v5371_v23 = vpop.f32.mrb[53].mxu0 }
 0xd44   :  { %v3097_v39 = vpop.f32.mrb[54].mxu0  ;;  %v3111_v20 = vsel %vm2849_vm15, %v3103_v34, -inf }
 0xd45   :  { %v3104_v19 = vsel %vm7251_vm2, %v3097_v39, -10000.0  ;;  %3112 = vmax.xlane.f32.xlu0 %v3111_v20  ;;  %v5372_v24 = vpop.f32.mrb[55].mxu0 }
 0xd46   :  { %v3114_v63 = vsel %vm2849_vm15, %v3104_v19, -inf }
 0xd47   :  { %3115 = vmax.xlane.f32.xlu1 %v3114_v63 }
 0xdc2   :  { %v3107_v13 = vpop.xlane.xlu0 %3106 }
 0xdc3   :  { %v3117_v49 = vsub.f32 %v3101_v12, %v3107_v13  ;;  %v5784_v13 = vld [vmem:[#allocation16 + $0x94] ss:$8 sps:$4 sm:$0xff]  }
 0xdc4   :  { %v3110_v40 = vpop.xlane.xlu1 %3109 }
 0xdc5   :  { %v3121_v7 = vmul.f32 1.442695, %v3117_v49  ;;  %v3118_v2 = vsub.f32 %v3102_v54, %v3110_v40 }
 0xdc6   :  { %v2858_v3 = vpop.xlane.xlu0 %2857 }
 0xdc7   :  { %6067 = vpow2.f32 %v3121_v7  ;;  %v3123_v61 = vmul.f32 1.442695, %v3118_v2  ;;  %v2864_v10 = vsub.f32 %v2847_v60, %v2858_v3 }
 0xdc8   :  { %v2861_v41 = vpop.xlane.xlu1 %2860 }
 0xdc9   :  { %6069 = vpow2.f32 %v3123_v61  ;;  %v2870_v43 = vmul.f32 1.442695, %v2864_v10  ;;  %v2865_v31 = vsub.f32 %v2848_v21, %v2861_v41  ;;  %v5782_v61 = vld [vmem:[#allocation16 + $0x90] ss:$8 sps:$4 sm:$0xff]   ;;  %v5787_v10 = vld [vmem:[#allocation16 + $0xa4] ss:$8 sps:$4 sm:$0xff]  }
 0xdca   :  { %v5785_v41 = vld [vmem:[#allocation16 + $0xa0] ss:$8 sps:$4 sm:$0xff]  }
 0xdcb   :  { %6071 = vpow2.f32 %v2870_v43  ;;  %v2872_v14 = vmul.f32 1.442695, %v2865_v31  ;;  %v5790_v43 = vld [vmem:[#allocation16 + $0xb4] ss:$8 sps:$4 sm:$0xff]  }
 0xdcd   :  { %6073 = vpow2.f32 %v2872_v14  ;;  %v5788_v14 = vld [vmem:[#allocation16 + $0xb0] ss:$8 sps:$4 sm:$0xff]  }
 0xdd1   :  { %v6068_v16 = vpop.eup %6067 }
 0xdd2   :  { %v3113_v17 = vpop.xlane.xlu0 %3112  ;;  %v3129_v32 = vsel %vm2849_vm15, %v6068_v16, 0.0 }
 0xdd3   :  { %v6070_v0 = vpop.eup %6069  ;;  %v3119_v9 = vsub.f32 %v3103_v34, %v3113_v17  ;;  %3130 = vadd.xlane.f32.xlu0 %v3129_v32  ;;  %v5793_v17 = vld [vmem:[#allocation16 + $0xc4] ss:$8 sps:$4 sm:$0xff]  }
 0xdd4   :  { %v3116_v22 = vpop.xlane.xlu1 %3115  ;;  %v3132_v46 = vsel %vm2849_vm15, %v6070_v0, 0.0 }
 0xdd5   :  { %v6072_v15 = vpop.eup %6071  ;;  %v3125_v58 = vmul.f32 1.442695, %v3119_v9  ;;  %v3120_v55 = vsub.f32 %v3104_v19, %v3116_v22  ;;  %3133 = vadd.xlane.f32.xlu1 %v3132_v46  ;;  %v5779_v19 = vld [vmem:[#allocation16 + $0x80] ss:$8 sps:$4 sm:$0xff]   ;;  %v5799_v9 = vld [vmem:[#allocation16 + $0xe4] ss:$8 sps:$4 sm:$0xff]  }
 0xdd6   :  { %v2880_v35 = vsel %vm2849_vm15, %v6072_v15, 0.0  ;;  %v5802_v22 = vld [vmem:[#allocation16 + $0xf4] ss:$8 sps:$4 sm:$0xff]   ;;  %v5800_v46 = vld [vmem:[#allocation16 + $0xf0] ss:$8 sps:$4 sm:$0xff]  }
 0xdd7   :  { %v6074_v29 = vpop.eup %6073  ;;  %6075 = vpow2.f32 %v3125_v58  ;;  %v3127_v12 = vmul.f32 1.442695, %v3120_v55  ;;  %2881 = vadd.xlane.f32.xlu0 %v2880_v35 }
 0xdd8   :  { %v2883_v8 = vsel %vm2849_vm15, %v6074_v29, 0.0 }
 0xdd9   :  { %6077 = vpow2.f32 %v3127_v12  ;;  %2884 = vadd.xlane.f32.xlu1 %v2883_v8 }
 0xde1   :  { %v6076_v27 = vpop.eup %6075 }
 0xde2   :  { %v3135_v37 = vsel %vm2849_vm15, %v6076_v27, 0.0 }
 0xde3   :  { %v6078_v60 = vpop.eup %6077  ;;  %3136 = vadd.xlane.f32.xlu0 %v3135_v37 }
 0xde4   :  { %v3138_v54 = vsel %vm2849_vm15, %v6078_v60, 0.0 }
 0xde5   :  { %3139 = vadd.xlane.f32.xlu1 %v3138_v54 }
 0xe60   :  { %v3131_v52 = vpop.xlane.xlu0 %3130 }
 0xe61   :  { %6079 = vrcp.f32 %v3131_v52 }
 0xe62   :  { %v3134_v21 = vpop.xlane.xlu1 %3133 }
 0xe63   :  { %6081 = vrcp.f32 %v3134_v21 }
 0xe64   :  { %v2882_v62 = vpop.xlane.xlu0 %2881 }
 0xe65   :  { %6083 = vrcp.f32 %v2882_v62  ;;  %v5811_v62 = vld [vmem:[#allocation16 + $0x24] ss:$8 sps:$4 sm:$0xff]  }
 0xe66   :  { %v2885_v4 = vpop.xlane.xlu1 %2884 }
 0xe67   :  { %6085 = vrcp.f32 %v2885_v4  ;;  %v5809_v4 = vld [vmem:[#allocation16 + $0x20] ss:$8 sps:$4 sm:$0xff]  }
 0xe6b   :  { %v6080_v28 = vpop.eup %6079 }
 0xe6c   :  { %v3145_v23 = vmul.f32 %v6080_v28, %v6068_v16  ;;  %v5814_v28 = vld [vmem:[#allocation16 + $0x34] ss:$8 sps:$4 sm:$0xff]  }
 0xe6d   :  { %v6082_v34 = vpop.eup %6081 }
 0xe6e   :  { %v3146_v39 = vmul.f32 %v6082_v34, %v6070_v0  ;;  %v5796_v0 = vld [vmem:[#allocation16 + $0xd4] ss:$8 sps:$4 sm:$0xff]   ;;  %v5812_v34 = vld [vmem:[#allocation16 + $0x30] ss:$8 sps:$4 sm:$0xff]  }
 0xe6f   :  { %v6084_v20 = vpop.eup %6083 }
 0xe70   :  { %v3137_v24 = vpop.xlane.xlu0 %3136  ;;  %v3149_v63 = vpack.c.bf16 %v3146_v39, %v3145_v23  ;;  %v2892_v40 = vmul.f32 %v6084_v20, %v6072_v15  ;;  %v5805_v15 = vld [vmem:[#allocation16 + $0x4] ss:$8 sps:$4 sm:$0xff]  }
 0xe71   :  { %v6086_v49 = vpop.eup %6085  ;;  %6087 = vrcp.f32 %v3137_v24  ;;  %v5817_v23 = vld [vmem:[#allocation16 + $0x44] ss:$8 sps:$4 sm:$0xff]   ;;  %v5815_v24 = vld [vmem:[#allocation16 + $0x40] ss:$8 sps:$4 sm:$0xff]  }
 0xe72   :  { %v2893_v7 = vmul.f32 %v6086_v49, %v6074_v29  ;;  %5378 = vmatmul.mubr.msk.bf16.vlgmr.msra.gmra.mrb[56].mxu0 %vm2849_vm15, %v3149_v63  ;;  %v3140_v2 = vpop.xlane.xlu1 %3139  ;;  %v5803_v29 = vld [vmem:[#allocation16] ss:$8 sps:$4 sm:$0xff]   ;;  %v5820_v49 = vld [vmem:[#allocation16 + $0x54] ss:$8 sps:$4 sm:$0xff]  }
 0xe73   :  { %6089 = vrcp.f32 %v3140_v2  ;;  %3344 = vmatpush1.bf16.msra.mxu0 %v5779_v19  ;;  %3375 = vmatprep.mubr.bf16.mxu0 %v6413_v30  ;;  %v5821_v2 = vld [vmem:[#allocation16 + $0x60] ss:$8 sps:$4 sm:$0xff]  }
 0xe74   :  { %v2895_v3 = vpack.c.bf16 %v2893_v7, %v2892_v40  ;;  %3345 = vmatprep.subr.bf16.mxu0 %v5784_v13  ;;  %v5818_v40 = vld [vmem:[#allocation16 + $0x50] ss:$8 sps:$4 sm:$0xff]   ;;  %v5823_v7 = vld [vmem:[#allocation16 + $0x64] ss:$8 sps:$4 sm:$0xff]  }
 0xe76   :  { %5354 = vmatmul.mubr.msk.bf16.vlgmr.msra.gmra.mrb[60].mxu1 %vm2849_vm15, %v2895_v3  ;;  %v5826_v3 = vld [vmem:[#allocation16 + $0x74] ss:$8 sps:$4 sm:$0xff]  }
 0xe77   :  { %5382 = vmatpush3.bf16.msra.mxu1 %v3017_v6  ;;  %5385 = vmatprep.mubr.msk.bf16.mxu1 %vm6412_vm0, %v6411_v44  ;;  %v5791_v6 = vld [vmem:[#allocation16 + $0xc0] ss:$8 sps:$4 sm:$0xff]  }
 0xe78   :  { %5383 = vmatprep.subr.bf16.mxu1 %v6411_v44  ;;  %3346 = vmatpush1.bf16.msra.mxu0 %v5782_v61  ;;  %v5794_v44 = vld [vmem:[#allocation16 + $0xd0] ss:$8 sps:$4 sm:$0xff]  }
 0xe79   :  { %3347 = vmatprep.subr.bf16.mxu0 %v5787_v10  ;;  %v5824_v61 = vld [vmem:[#allocation16 + $0x70] ss:$8 sps:$4 sm:$0xff]   ;;  %v3529_v10 = vld [vmem:[%s7481_s15] sm:$0x3] }
 0xe7b   :  { %v6088_v31 = vpop.eup %6087  ;;  %5384 = vmatpush3.bf16.msra.mxu1 %v7183_v56  ;;  %v5797_v56 = vld [vmem:[#allocation16 + $0xe0] ss:$8 sps:$4 sm:$0xff]  }
 0xe7c   :  { %3348 = vmatpush1.bf16.msra.mxu0 %v5785_v41  ;;  %v3147_v32 = vmul.f32 %v6088_v31, %v6076_v27  ;;  %v5808_v27 = vld [vmem:[#allocation16 + $0x14] ss:$8 sps:$4 sm:$0xff]   ;;  %v3534_v41 = vrot.slane %v3529_v10, %v6749_v48 }
 0xe7d   :  { %v6090_v16 = vpop.eup %6089  ;;  %3349 = vmatprep.subr.bf16.mxu0 %v5790_v43  ;;  %v3538_v43 = vrot.slane %v3529_v10, %v6758_v51  ;;  %v5874_v10 = vld [vmem:[#allocation17 + $0xec] ss:$16 sps:$4 sm:$0xff]  }
 0xe7e   :  { %v3148_v18 = vmul.f32 %v6090_v16, %v6078_v60 }
 0xe80   :  { %v3150_v26 = vpack.c.bf16 %v3148_v18, %v3147_v32  ;;  %3350 = vmatpush1.bf16.msra.mxu0 %v5788_v14 }
 0xe81   :  { %3351 = vmatprep.subr.bf16.mxu0 %v5793_v17 }
 0xe82   :  { %5386 = vmatmul.mubr.msk.bf16.vlgmr.msra.gmra.mrb[64].mxu1 %vm2849_vm15, %v3150_v26 }
 0xe84   :  { %3352 = vmatpush1.bf16.msra.mxu0 %v5791_v6 }
 0xe85   :  { %3353 = vmatprep.subr.bf16.mxu0 %v5796_v0 }
 0xe88   :  { %3354 = vmatpush1.bf16.msra.mxu0 %v5794_v44 }
 0xe89   :  { %3355 = vmatprep.subr.bf16.mxu0 %v5799_v9 }
 0xe8c   :  { %3356 = vmatpush1.bf16.msra.mxu0 %v5797_v56 }
 0xe8d   :  { %3357 = vmatprep.subr.bf16.mxu0 %v5802_v22 }
 0xe90   :  { %3358 = vmatpush1.bf16.msra.mxu0 %v5800_v46 }
 0xe91   :  { %3476 = vmatprep.subr.bf16.mxu0 %v5805_v15 }
 0xf45   :  { %v3191_v58 = vpop.f32.mrb[56].mxu0 }
 0xf46   :  { %v5379_v55 = vpop.f32.mrb[57].mxu0 }
 0xf47   :  { %v3194_v35 = vpop.f32.mrb[58].mxu0 }
 0xf48   :  { %v3245_v12 = vpack.c.bf16 %v3194_v35, %v3191_v58  ;;  %v5380_v8 = vpop.f32.mrb[59].mxu0 }
 0xf49   :  { %v2984_v37 = vpop.f32.mrb[60].mxu1  ;;  %v5829_v8 = vld [vmem:[#allocation17 + $0x4] ss:$16 sps:$4 sm:$0xff]  }
 0xf4a   :  { %v5355_v60 = vpop.f32.mrb[61].mxu1  ;;  %3376 = vmatmul.mubr.bf16.vlgmr.msra.gmra.mrb[60].mxu0 %v3245_v12  ;;  %v5827_v12 = vld [vmem:[#allocation17] ss:$16 sps:$4 sm:$0xff]   ;;  %4071 = vmatprep.subr.bf16.mxu1 %v5829_v8 }
 0xf4b   :  { %3477 = vmatpush1.bf16.msra.mxu0 %v5803_v29  ;;  %v2987_v54 = vpop.f32.mrb[62].mxu1  ;;  %3385 = vmatprep.mubr.bf16.mxu0 %v6413_v30  ;;  %v5838_v60 = vld [vmem:[#allocation17 + $0x2c] ss:$16 sps:$4 sm:$0xff]  }
 0xf4c   :  { %v2992_v52 = vpack.c.bf16 %v2987_v54, %v2984_v37  ;;  %v5356_v21 = vpop.f32.mrb[63].mxu1  ;;  %3478 = vmatprep.subr.bf16.mxu0 %v5808_v27  ;;  %v5830_v27 = vld [vmem:[#allocation17 + $0x8] ss:$16 sps:$4 sm:$0xff]   ;;  %v5835_v37 = vld [vmem:[#allocation17 + $0x24] ss:$16 sps:$4 sm:$0xff]   ;;  %4072 = vmatpush1.bf16.msra.mxu1 %v5827_v12 }
 0xf4d   :  { %4073 = vmatprep.subr.bf16.mxu1 %v5835_v37  ;;  %v5841_v54 = vld [vmem:[#allocation17 + $0x44] ss:$16 sps:$4 sm:$0xff]   ;;  %v5842_v21 = vld [vmem:[#allocation17 + $0x48] ss:$16 sps:$4 sm:$0xff]  }
 0xf4f   :  { %3479 = vmatpush1.bf16.msra.mxu0 %v5806_v1  ;;  %v5844_v1 = vld [vmem:[#allocation17 + $0x4c] ss:$16 sps:$4 sm:$0xff]  }
 0xf50   :  { %3480 = vmatprep.subr.bf16.mxu0 %v5811_v62  ;;  %v5847_v62 = vld [vmem:[#allocation17 + $0x64] ss:$16 sps:$4 sm:$0xff]  }
 0xf53   :  { %3481 = vmatpush1.bf16.msra.mxu0 %v5809_v4  ;;  %v5850_v4 = vld [vmem:[#allocation17 + $0x6c] ss:$16 sps:$4 sm:$0xff]  }
 0xf54   :  { %3482 = vmatprep.subr.bf16.mxu0 %v5814_v28  ;;  %v5845_v28 = vld [vmem:[#allocation17 + $0x60] ss:$16 sps:$4 sm:$0xff]  }
 0xf55   :  { %v3238_v39 = vpop.f32.mrb[64].mxu1 }
 0xf56   :  { %v5387_v20 = vpop.f32.mrb[65].mxu1 }
 0xf57   :  { %3483 = vmatpush1.bf16.msra.mxu0 %v5812_v34  ;;  %v3241_v19 = vpop.f32.mrb[66].mxu1  ;;  %v5848_v34 = vld [vmem:[#allocation17 + $0x68] ss:$16 sps:$4 sm:$0xff]   ;;  %v5851_v20 = vld [vmem:[#allocation17 + $0x80] ss:$16 sps:$4 sm:$0xff]  }
 0xf58   :  { %v3246_v63 = vpack.c.bf16 %v3241_v19, %v3238_v39  ;;  %v5388_v13 = vpop.f32.mrb[67].mxu1  ;;  %3484 = vmatprep.subr.bf16.mxu0 %v5817_v23  ;;  %v5853_v23 = vld [vmem:[#allocation17 + $0x84] ss:$16 sps:$4 sm:$0xff]   ;;  %v5856_v39 = vld [vmem:[#allocation17 + $0x8c] ss:$16 sps:$4 sm:$0xff]  }
 0xf59   :  { %v5854_v19 = vld [vmem:[#allocation17 + $0x88] ss:$16 sps:$4 sm:$0xff]   ;;  %v5857_v13 = vld [vmem:[#allocation17 + $0xa0] ss:$16 sps:$4 sm:$0xff]  }
 0xf5a   :  { %3386 = vmatmul.mubr.bf16.gmra.mrb[64].mxu0 %v3246_v63  ;;  %v5862_v63 = vld [vmem:[#allocation17 + $0xac] ss:$16 sps:$4 sm:$0xff]  }
 0xf5b   :  { %3485 = vmatpush1.bf16.msra.mxu0 %v5815_v24  ;;  %3508 = vmatprep.mubr.bf16.mxu0 %v6413_v30  ;;  %v5859_v24 = vld [vmem:[#allocation17 + $0xa4] ss:$16 sps:$4 sm:$0xff]  }
 0xf5c   :  { %3486 = vmatprep.subr.bf16.mxu0 %v5820_v49  ;;  %v5860_v49 = vld [vmem:[#allocation17 + $0xa8] ss:$16 sps:$4 sm:$0xff]  }
 0xf5f   :  { %3487 = vmatpush1.bf16.msra.mxu0 %v5818_v40  ;;  %v5865_v40 = vld [vmem:[#allocation17 + $0xc4] ss:$16 sps:$4 sm:$0xff]  }
 0xf60   :  { %3488 = vmatprep.subr.bf16.mxu0 %v5823_v7  ;;  %v5868_v7 = vld [vmem:[#allocation17 + $0xcc] ss:$16 sps:$4 sm:$0xff]  }
 0xf63   :  { %3489 = vmatpush1.bf16.msra.mxu0 %v5821_v2  ;;  %v5863_v2 = vld [vmem:[#allocation17 + $0xc0] ss:$16 sps:$4 sm:$0xff]  }
 0xf64   :  { %3490 = vmatprep.subr.bf16.mxu0 %v5826_v3  ;;  %v5866_v3 = vld [vmem:[#allocation17 + $0xc8] ss:$16 sps:$4 sm:$0xff]  }
 0xf67   :  { %3491 = vmatpush1.bf16.msra.mxu0 %v5824_v61  ;;  %v5871_v61 = vld [vmem:[#allocation17 + $0xe4] ss:$16 sps:$4 sm:$0xff]  }
 0xf6a   :  { %3509 = vmatmul.mubr.bf16.vlgmr.msra.gmra.mrb[60].mxu0 %v2991_v59 }
 0xf6b   :  { %3518 = vmatprep.mubr.bf16.mxu0 %v6413_v30 }
 0xf72   :  { %3519 = vmatmul.mubr.bf16.gmra.mrb[64].mxu0 %v2992_v52  ;;  %v5839_v52 = vld [vmem:[#allocation17 + $0x40] ss:$16 sps:$4 sm:$0xff]  }
0x103d   :  { %v3510_v31 = vpop.f32.mrb[60].mxu0 }
0x103e   :  { %v3541_v14 = vadd.f32 %v3534_v41, %v3510_v31  ;;  %v3512_v16 = vpop.f32.mrb[61].mxu0  ;;  %v5877_v31 = vld [vmem:[#allocation17 + $0x104] ss:$16 sps:$4 sm:$0xff]  }
0x103f   :  { %v3542_v17 = vadd.f32 %v3538_v43, %v3512_v16  ;;  %v3514_v32 = vpop.f32.mrb[62].mxu0  ;;  %v5875_v16 = vld [vmem:[#allocation17 + $0x100] ss:$16 sps:$4 sm:$0xff]  }
0x1040   :  { %v7302_v18 = vadd.f32 %v3541_v14, %v7064_v11  ;;  %v3543_v33 = vadd.f32 %v3534_v41, %v3514_v32  ;;  %v3516_v25 = vpop.f32.mrb[63].mxu0  ;;  %v5880_v14 = vld [vmem:[#allocation17 + $0x10c] ss:$16 sps:$4 sm:$0xff]   ;;  %v5883_v32 = vld [vmem:[#allocation17 + $0x124] ss:$16 sps:$4 sm:$0xff]  }
0x1041   :  { %v7305_v30 = vadd.f32 %v3542_v17, %v7058_v5  ;;  %v3544_v59 = vadd.f32 %v3538_v43, %v3516_v25  ;;  %v5878_v17 = vld [vmem:[#allocation17 + $0x108] ss:$16 sps:$4 sm:$0xff]   ;;  %v5881_v25 = vld [vmem:[#allocation17 + $0x120] ss:$16 sps:$4 sm:$0xff]  }
0x1042   :  { %v7308_v26 = vadd.f32 %v3543_v33, %v7067_v45  ;;  %v5886_v33 = vld [vmem:[#allocation17 + $0x12c] ss:$16 sps:$4 sm:$0xff]  }
0x1043   :  { %v7311_v6 = vadd.f32 %v3544_v59, %v7061_v57  ;;  %v3557_v0 = vadd.f32 %v7305_v30, %v7302_v18  ;;  %v5884_v59 = vld [vmem:[#allocation17 + $0x128] ss:$16 sps:$4 sm:$0xff]  }
0x1045   :  { %3558 = vadd.xlane.f32.xlu0 %v3557_v0  ;;  %v3520_v44 = vpop.f32.mrb[64].mxu0  ;;  %v3560_v11 = vadd.f32 %v7311_v6, %v7308_v26 }
0x1046   :  { %v3545_v9 = vadd.f32 %v3534_v41, %v3520_v44  ;;  %v3522_v56 = vpop.f32.mrb[65].mxu0 }
0x1047   :  { %v3546_v22 = vadd.f32 %v3538_v43, %v3522_v56  ;;  %3561 = vadd.xlane.f32.xlu1 %v3560_v11  ;;  %v3524_v5 = vpop.f32.mrb[66].mxu0 }
0x1048   :  { %v7318_v46 = vadd.f32 %v3545_v9, %v7131_v53  ;;  %v3547_v45 = vadd.f32 %v3534_v41, %v3524_v5  ;;  %v3526_v15 = vpop.f32.mrb[67].mxu0  ;;  %v5869_v41 = vld [vmem:[#allocation17 + $0xe0] ss:$16 sps:$4 sm:$0xff]  }
0x1049   :  { %v7321_v57 = vadd.f32 %v3546_v22, %v7125_v42  ;;  %v3548_v58 = vadd.f32 %v3538_v43, %v3526_v15  ;;  %v5832_v42 = vld [vmem:[#allocation17 + $0xc] ss:$16 sps:$4 sm:$0xff]   ;;  %v5872_v43 = vld [vmem:[#allocation17 + $0xe8] ss:$16 sps:$4 sm:$0xff]  }
0x104a   :  { %v7324_v55 = vadd.f32 %v3547_v45, %v7134_v38  ;;  %4124 = vmatprep.subr.bf16.mxu0 %v5832_v42  ;;  %v5833_v38 = vld [vmem:[#allocation17 + $0x20] ss:$16 sps:$4 sm:$0xff]  }
0x104b   :  { %v7327_v35 = vadd.f32 %v3548_v58, %v7128_v36  ;;  %v3563_v29 = vadd.f32 %v7321_v57, %v7318_v46  ;;  %4125 = vmatpush1.bf16.msra.mxu0 %v5830_v27  ;;  %v5836_v36 = vld [vmem:[#allocation17 + $0x28] ss:$16 sps:$4 sm:$0xff]   ;;  %4074 = vmatpush1.bf16.msra.mxu1 %v5833_v38 }
0x104c   :  { %4126 = vmatprep.subr.bf16.mxu0 %v5838_v60  ;;  %4075 = vmatprep.subr.bf16.mxu1 %v5841_v54 }
0x104d   :  { %3564 = vadd.xlane.f32.xlu0 %v3563_v29  ;;  %v3566_v53 = vadd.f32 %v7327_v35, %v7324_v55 }
0x104f   :  { %3567 = vadd.xlane.f32.xlu1 %v3566_v53  ;;  %4127 = vmatpush1.bf16.msra.mxu0 %v5836_v36 }
0x1050   :  { %4128 = vmatprep.subr.bf16.mxu0 %v5844_v1  ;;  %4076 = vmatpush1.bf16.msra.mxu1 %v5839_v52  ;;  %v5892_v52 = vld [vmem:[#allocation17 + $0x14c] ss:$16 sps:$4 sm:$0xff]  }
0x1051   :  { %4077 = vmatprep.subr.bf16.mxu1 %v5847_v62  ;;  %v5895_v62 = vld [vmem:[#allocation17 + $0x164] ss:$16 sps:$4 sm:$0xff]  }
0x1053   :  { %4129 = vmatpush1.bf16.msra.mxu0 %v5842_v21  ;;  %v5890_v21 = vld [vmem:[#allocation17 + $0x148] ss:$16 sps:$4 sm:$0xff]  }
0x1054   :  { %4130 = vmatprep.subr.bf16.mxu0 %v5850_v4  ;;  %4078 = vmatpush1.bf16.msra.mxu1 %v5845_v28  ;;  %v5898_v4 = vld [vmem:[#allocation17 + $0x16c] ss:$16 sps:$4 sm:$0xff]   ;;  %v5893_v28 = vld [vmem:[#allocation17 + $0x160] ss:$16 sps:$4 sm:$0xff]  }
0x1055   :  { %4079 = vmatprep.subr.bf16.mxu1 %v5853_v23  ;;  %v5901_v23 = vld [vmem:[#allocation17 + $0x184] ss:$16 sps:$4 sm:$0xff]  }
0x1057   :  { %4131 = vmatpush1.bf16.msra.mxu0 %v5848_v34  ;;  %v5896_v34 = vld [vmem:[#allocation17 + $0x168] ss:$16 sps:$4 sm:$0xff]  }
0x1058   :  { %4132 = vmatprep.subr.bf16.mxu0 %v5856_v39  ;;  %4080 = vmatpush1.bf16.msra.mxu1 %v5851_v20  ;;  %v5904_v39 = vld [vmem:[#allocation17 + $0x18c] ss:$16 sps:$4 sm:$0xff]   ;;  %v5899_v20 = vld [vmem:[#allocation17 + $0x180] ss:$16 sps:$4 sm:$0xff]  }
0x1059   :  { %4081 = vmatprep.subr.bf16.mxu1 %v5859_v24  ;;  %v5907_v24 = vld [vmem:[#allocation17 + $0x1a4] ss:$16 sps:$4 sm:$0xff]  }
0x105b   :  { %4133 = vmatpush1.bf16.msra.mxu0 %v5854_v19  ;;  %v5902_v19 = vld [vmem:[#allocation17 + $0x188] ss:$16 sps:$4 sm:$0xff]  }
0x105c   :  { %4134 = vmatprep.subr.bf16.mxu0 %v5862_v63  ;;  %4082 = vmatpush1.bf16.msra.mxu1 %v5857_v13  ;;  %v5910_v63 = vld [vmem:[#allocation17 + $0x1ac] ss:$16 sps:$4 sm:$0xff]   ;;  %v5905_v13 = vld [vmem:[#allocation17 + $0x1a0] ss:$16 sps:$4 sm:$0xff]  }
0x105d   :  { %4083 = vmatprep.subr.bf16.mxu1 %v5865_v40  ;;  %v5913_v40 = vld [vmem:[#allocation17 + $0x1c4] ss:$16 sps:$4 sm:$0xff]  }
0x105f   :  { %4135 = vmatpush1.bf16.msra.mxu0 %v5860_v49  ;;  %v5908_v49 = vld [vmem:[#allocation17 + $0x1a8] ss:$16 sps:$4 sm:$0xff]  }
0x1060   :  { %4136 = vmatprep.subr.bf16.mxu0 %v5868_v7  ;;  %4084 = vmatpush1.bf16.msra.mxu1 %v5863_v2  ;;  %v5916_v7 = vld [vmem:[#allocation17 + $0x1cc] ss:$16 sps:$4 sm:$0xff]   ;;  %v5911_v2 = vld [vmem:[#allocation17 + $0x1c0] ss:$16 sps:$4 sm:$0xff]  }
0x1061   :  { %4085 = vmatprep.subr.bf16.mxu1 %v5871_v61  ;;  %v5919_v61 = vld [vmem:[#allocation17 + $0x1e4] ss:$16 sps:$4 sm:$0xff]  }
0x1063   :  { %4137 = vmatpush1.bf16.msra.mxu0 %v5866_v3  ;;  %v5914_v3 = vld [vmem:[#allocation17 + $0x1c8] ss:$16 sps:$4 sm:$0xff]  }
0x1064   :  { %4138 = vmatprep.subr.bf16.mxu0 %v5874_v10  ;;  %4086 = vmatpush1.bf16.msra.mxu1 %v5869_v41  ;;  %v5922_v10 = vld [vmem:[#allocation17 + $0x1ec] ss:$16 sps:$4 sm:$0xff]   ;;  %v5917_v41 = vld [vmem:[#allocation17 + $0x1e0] ss:$16 sps:$4 sm:$0xff]  }
0x1065   :  { %4087 = vmatprep.subr.bf16.mxu1 %v5877_v31  ;;  %v5925_v31 = vld [vmem:[#allocation19 + $0x4] ss:$8 sps:$4 sm:$0xff]  }
0x1067   :  { %4139 = vmatpush1.bf16.msra.mxu0 %v5872_v43  ;;  %v5920_v43 = vld [vmem:[#allocation17 + $0x1e8] ss:$16 sps:$4 sm:$0xff]  }
0x1068   :  { %4140 = vmatprep.subr.bf16.mxu0 %v5880_v14  ;;  %4088 = vmatpush1.bf16.msra.mxu1 %v5875_v16 }
0x1069   :  { %4089 = vmatprep.subr.bf16.mxu1 %v5883_v32 }
0x106b   :  { %4141 = vmatpush1.bf16.msra.mxu0 %v5878_v17 }
0x106c   :  { %4142 = vmatprep.subr.bf16.mxu0 %v5886_v33  ;;  %4090 = vmatpush1.bf16.msra.mxu1 %v5881_v25 }
0x106f   :  { %4143 = vmatpush1.bf16.msra.mxu0 %v5884_v59 }
0x1070   :  { %4144 = vmatprep.subr.bf16.mxu0 %v5892_v52 }
0x1073   :  { %4145 = vmatpush1.bf16.msra.mxu0 %v5890_v21 }
0x1074   :  { %4146 = vmatprep.subr.bf16.mxu0 %v5898_v4 }
0x1077   :  { %4147 = vmatpush1.bf16.msra.mxu0 %v5896_v34 }
0x1078   :  { %4148 = vmatprep.subr.bf16.mxu0 %v5904_v39 }
0x107b   :  { %4149 = vmatpush1.bf16.msra.mxu0 %v5902_v19 }
0x107c   :  { %4150 = vmatprep.subr.bf16.mxu0 %v5910_v63 }
0x107f   :  { %4151 = vmatpush1.bf16.msra.mxu0 %v5908_v49  ;;  %v5926_v49 = vld [vmem:[#allocation19 + $0x10] ss:$8 sps:$4 sm:$0xff]  }
0x1080   :  { %4152 = vmatprep.subr.bf16.mxu0 %v5916_v7 }
0x1083   :  { %4153 = vmatpush1.bf16.msra.mxu0 %v5914_v3  ;;  %v5929_v3 = vld [vmem:[#allocation19 + $0x20] ss:$8 sps:$4 sm:$0xff]  }
0x1084   :  { %4154 = vmatprep.subr.bf16.mxu0 %v5922_v10  ;;  %v5932_v10 = vld [vmem:[#allocation19 + $0x30] ss:$8 sps:$4 sm:$0xff]  }
0x1087   :  { %4155 = vmatpush1.bf16.msra.mxu0 %v5920_v43  ;;  %v5935_v43 = vld [vmem:[#allocation19 + $0x40] ss:$8 sps:$4 sm:$0xff]  }
0x10d2   :  { %v3559_v0 = vpop.xlane.xlu0 %3558 }
0x10d3   :  { %v3569_v44 = vmul.f32 0.00390625, %v3559_v0 }
0x10d4   :  { %v3562_v11 = vpop.xlane.xlu1 %3561 }
0x10d5   :  { %v7334_v9 = vsub.f32 %v7302_v18, %v3569_v44  ;;  %v7337_v56 = vsub.f32 %v7305_v30, %v3569_v44  ;;  %v3570_v22 = vmul.f32 0.00390625, %v3562_v11 }
0x10d7   :  { %v7340_v5 = vsub.f32 %v7308_v26, %v3570_v22  ;;  %v7343_v45 = vsub.f32 %v7311_v6, %v3570_v22  ;;  %v3581_v15 = vmul.f32 %v7334_v9, %v7334_v9  ;;  %v3582_v58 = vmul.f32 %v7337_v56, %v7337_v56 }
0x10d9   :  { %v3589_v29 = vadd.f32 %v3582_v58, %v3581_v15  ;;  %v3583_v18 = vmul.f32 %v7340_v5, %v7340_v5  ;;  %v3584_v30 = vmul.f32 %v7343_v45, %v7343_v45  ;;  %v3621_v15 = vld [vmem:[%s7482_s16] sm:$0x3] }
0x10da   :  { %v3565_v53 = vpop.xlane.xlu0 %3564 }
0x10db   :  { %v3571_v12 = vmul.f32 0.00390625, %v3565_v53  ;;  %3590 = vadd.xlane.f32.xlu0 %v3589_v29  ;;  %v3592_v26 = vadd.f32 %v3584_v30, %v3583_v18  ;;  %v3626_v29 = vrot.slane %v3621_v15, %v6749_v48  ;;  %v3630_v18 = vrot.slane %v3621_v15, %v6758_v51  ;;  %v3641_v30 = vld [vmem:[%s7483_s17] sm:$0x3] }
0x10dc   :  { %v3568_v8 = vpop.xlane.xlu1 %3567  ;;  %v5958_v15 = vld [vmem:[#allocation19 + $0xb4] ss:$8 sps:$4 sm:$0xff]  }
0x10dd   :  { %v7354_v6 = vsub.f32 %v7318_v46, %v3571_v12  ;;  %v7357_v27 = vsub.f32 %v7321_v57, %v3571_v12  ;;  %v3572_v42 = vmul.f32 0.00390625, %v3568_v8  ;;  %3593 = vadd.xlane.f32.xlu1 %v3592_v26 }
0x10df   :  { %v7360_v37 = vsub.f32 %v7324_v55, %v3572_v42  ;;  %v7363_v60 = vsub.f32 %v7327_v35, %v3572_v42  ;;  %v3585_v38 = vmul.f32 %v7354_v6, %v7354_v6  ;;  %v3586_v36 = vmul.f32 %v7357_v27, %v7357_v27  ;;  %v5889_v55 = vld [vmem:[#allocation17 + $0x144] ss:$16 sps:$4 sm:$0xff]   ;;  %v5887_v35 = vld [vmem:[#allocation17 + $0x140] ss:$16 sps:$4 sm:$0xff]  }
0x10e0   :  { %4091 = vmatprep.subr.bf16.mxu1 %v5889_v55  ;;  %v3646_v42 = vrot.slane %v3641_v30, %v6749_v48 }
0x10e1   :  { %v3595_v54 = vadd.f32 %v3586_v36, %v3585_v38  ;;  %v3587_v46 = vmul.f32 %v7360_v37, %v7360_v37  ;;  %v3588_v57 = vmul.f32 %v7363_v60, %v7363_v60  ;;  %4092 = vmatpush1.bf16.msra.mxu1 %v5887_v35  ;;  %v3650_v38 = vrot.slane %v3641_v30, %v6758_v51  ;;  %v5964_v30 = vld [vmem:[#allocation19 + $0xd4] ss:$8 sps:$4 sm:$0xff]  }
0x10e2   :  { %4093 = vmatprep.subr.bf16.mxu1 %v5895_v62 }
0x10e3   :  { %3596 = vadd.xlane.f32.xlu0 %v3595_v54  ;;  %v3598_v1 = vadd.f32 %v3588_v57, %v3587_v46 }
0x10e5   :  { %3599 = vadd.xlane.f32.xlu1 %v3598_v1  ;;  %4094 = vmatpush1.bf16.msra.mxu1 %v5893_v28  ;;  %v5923_v28 = vld [vmem:[#allocation19] ss:$8 sps:$4 sm:$0xff]  }
0x10e6   :  { %4095 = vmatprep.subr.bf16.mxu1 %v5901_v23  ;;  %v5928_v23 = vld [vmem:[#allocation19 + $0x14] ss:$8 sps:$4 sm:$0xff]  }
0x10e9   :  { %4096 = vmatpush1.bf16.msra.mxu1 %v5899_v20 }
0x10ea   :  { %4097 = vmatprep.subr.bf16.mxu1 %v5907_v24 }
0x10ed   :  { %4098 = vmatpush1.bf16.msra.mxu1 %v5905_v13 }
0x10ee   :  { %4099 = vmatprep.subr.bf16.mxu1 %v5913_v40 }
0x10f1   :  { %4100 = vmatpush1.bf16.msra.mxu1 %v5911_v2 }
0x10f2   :  { %4101 = vmatprep.subr.bf16.mxu1 %v5919_v61  ;;  %v5934_v61 = vld [vmem:[#allocation19 + $0x34] ss:$8 sps:$4 sm:$0xff]  }
0x10f5   :  { %4102 = vmatpush1.bf16.msra.mxu1 %v5917_v41  ;;  %v5937_v41 = vld [vmem:[#allocation19 + $0x44] ss:$8 sps:$4 sm:$0xff]  }
0x10f6   :  { %4597 = vmatprep.subr.bf16.mxu1 %v5925_v31  ;;  %v5940_v31 = vld [vmem:[#allocation19 + $0x54] ss:$8 sps:$4 sm:$0xff]  }
0x1168   :  { %v3591_v14 = vpop.xlane.xlu0 %3590 }
0x1169   :  { %v3601_v16 = vmul.f32 0.00390625, %v3591_v14  ;;  %v5938_v14 = vld [vmem:[#allocation19 + $0x50] ss:$8 sps:$4 sm:$0xff]  }
0x116a   :  { %v3594_v17 = vpop.xlane.xlu1 %3593 }
0x116b   :  { %v3605_v32 = vadd.f32 1e-05, %v3601_v16  ;;  %v3602_v33 = vmul.f32 0.00390625, %v3594_v17  ;;  %v5943_v16 = vld [vmem:[#allocation19 + $0x64] ss:$8 sps:$4 sm:$0xff]  }
0x116c   :  { %v5941_v17 = vld [vmem:[#allocation19 + $0x60] ss:$8 sps:$4 sm:$0xff]  }
0x116d   :  { %6091 = vrsqrt.f32 %v3605_v32  ;;  %v3606_v25 = vadd.f32 1e-05, %v3602_v33  ;;  %v5946_v32 = vld [vmem:[#allocation19 + $0x74] ss:$8 sps:$4 sm:$0xff]   ;;  %v5944_v33 = vld [vmem:[#allocation19 + $0x70] ss:$8 sps:$4 sm:$0xff]  }
0x116f   :  { %6093 = vrsqrt.f32 %v3606_v25  ;;  %v5949_v25 = vld [vmem:[#allocation19 + $0x84] ss:$8 sps:$4 sm:$0xff]  }
0x1170   :  { %v3597_v59 = vpop.xlane.xlu0 %3596 }
0x1171   :  { %v3603_v0 = vmul.f32 0.00390625, %v3597_v59  ;;  %v5947_v59 = vld [vmem:[#allocation19 + $0x80] ss:$8 sps:$4 sm:$0xff]  }
0x1172   :  { %v3600_v44 = vpop.xlane.xlu1 %3599 }
0x1173   :  { %v3607_v11 = vadd.f32 1e-05, %v3603_v0  ;;  %v3604_v22 = vmul.f32 0.00390625, %v3600_v44  ;;  %v5952_v0 = vld [vmem:[#allocation19 + $0x94] ss:$8 sps:$4 sm:$0xff]  }
0x1174   :  { %v5950_v44 = vld [vmem:[#allocation19 + $0x90] ss:$8 sps:$4 sm:$0xff]  }
0x1175   :  { %6095 = vrsqrt.f32 %v3607_v11  ;;  %v3608_v58 = vadd.f32 1e-05, %v3604_v22  ;;  %v5955_v11 = vld [vmem:[#allocation19 + $0xa4] ss:$8 sps:$4 sm:$0xff]   ;;  %v5953_v22 = vld [vmem:[#allocation19 + $0xa0] ss:$8 sps:$4 sm:$0xff]  }
0x1177   :  { %v6092_v53 = vpop.eup %6091  ;;  %6097 = vrsqrt.f32 %v3608_v58  ;;  %v5956_v58 = vld [vmem:[#allocation19 + $0xb0] ss:$8 sps:$4 sm:$0xff]  }
0x1178   :  { %v3613_v12 = vmul.f32 %v6092_v53, %v7334_v9  ;;  %v3614_v26 = vmul.f32 %v6092_v53, %v7337_v56  ;;  %v5962_v53 = vld [vmem:[#allocation19 + $0xd0] ss:$8 sps:$4 sm:$0xff]  }
0x1179   :  { %v6094_v8 = vpop.eup %6093 }
0x117a   :  { %v3615_v36 = vmul.f32 %v6094_v8, %v7340_v5  ;;  %v3616_v54 = vmul.f32 %v6094_v8, %v7343_v45  ;;  %v3634_v46 = vmul.f32 %v3630_v18, %v3614_v26  ;;  %v3633_v57 = vmul.f32 %v3626_v29, %v3613_v12  ;;  %v5967_v12 = vld [vmem:[#allocation19 + $0xe4] ss:$8 sps:$4 sm:$0xff]   ;;  %v5965_v26 = vld [vmem:[#allocation19 + $0xe0] ss:$8 sps:$4 sm:$0xff]   ;;  %v5970_v8 = vld [vmem:[#allocation19 + $0xf4] ss:$8 sps:$4 sm:$0xff]  }
0x117c   :  { %v3636_v1 = vmul.f32 %v3630_v18, %v3616_v54  ;;  %v3635_v55 = vmul.f32 %v3626_v29, %v3615_v36  ;;  %v7387_v52 = vadd.f32 %v3650_v38, %v3634_v46  ;;  %v7391_v9 = vadd.f32 %v3646_v42, %v3633_v57  ;;  %v3729_v36 = vld [vmem:[%s7485_s19] sm:$0xf] }
0x117d   :  { %v3734_v54 = vrot.slane %v3729_v36, %v6749_v48  ;;  %v3742_v46 = vrot.slane %v3729_v36, %v6746_v47  ;;  %v3738_v57 = vrot.slane %v3729_v36, %v6758_v51 }
0x117e   :  { %v7389_v35 = vadd.f32 %v3650_v38, %v3636_v1  ;;  %v7393_v56 = vadd.f32 %v3646_v42, %v3635_v55  ;;  %v3746_v1 = vrot.slane %v3729_v36, %v6755_v50 }
0x117f   :  { %v6096_v21 = vpop.eup %6095 }
0x1180   :  { %v3662_v62 = vpack.c.bf16 %v7389_v35, %v7387_v52  ;;  %v3661_v5 = vpack.c.bf16 %v7393_v56, %v7391_v9  ;;  %v3618_v45 = vmul.f32 %v6096_v21, %v7357_v27  ;;  %v3617_v4 = vmul.f32 %v6096_v21, %v7354_v6  ;;  %v5931_v27 = vld [vmem:[#allocation19 + $0x24] ss:$8 sps:$4 sm:$0xff]  }
0x1181   :  { %v6098_v34 = vpop.eup %6097 }
0x1182   :  { %4103 = vmatprep.mubr.bf16.mxu1 %v3662_v62  ;;  %4156 = vmatprep.mubr.bf16.mxu0 %v3662_v62  ;;  %v3620_v39 = vmul.f32 %v6098_v34, %v7363_v60  ;;  %v3638_v20 = vmul.f32 %v3630_v18, %v3618_v45  ;;  %v3619_v19 = vmul.f32 %v6098_v34, %v7360_v37 }
0x1183   :  { %4104 = vmatmul.mubr.bf16.vlgmr.msra.gmra.mrb[68].mxu1 %v3661_v5  ;;  %4157 = vmatmul.mubr.bf16.vlgmr.msra.gmra.mrb[68].mxu0 %v3661_v5  ;;  %v3637_v24 = vmul.f32 %v3626_v29, %v3617_v4 }
0x1184   :  { %v3640_v63 = vmul.f32 %v3630_v18, %v3620_v39  ;;  %v3639_v13 = vmul.f32 %v3626_v29, %v3619_v19  ;;  %4598 = vmatpush1.bf16.msra.mxu1 %v5923_v28  ;;  %v7403_v6 = vadd.f32 %v3650_v38, %v3638_v20  ;;  %v5961_v29 = vld [vmem:[#allocation19 + $0xc4] ss:$8 sps:$4 sm:$0xff]   ;;  %v5959_v18 = vld [vmem:[#allocation19 + $0xc0] ss:$8 sps:$4 sm:$0xff]  }
0x1185   :  { %4599 = vmatprep.subr.bf16.mxu1 %v5928_v23  ;;  %v7407_v7 = vadd.f32 %v3646_v42, %v3637_v24 }
0x1186   :  { %v7405_v40 = vadd.f32 %v3650_v38, %v3640_v63  ;;  %v7409_v2 = vadd.f32 %v3646_v42, %v3639_v13  ;;  %v5968_v42 = vld [vmem:[#allocation19 + $0xf0] ss:$8 sps:$4 sm:$0xff]   ;;  %v5973_v38 = vld [vmem:[#allocation19 + $0x104] ss:$8 sps:$4 sm:$0xff]  }
0x1188   :  { %v3664_v37 = vpack.c.bf16 %v7405_v40, %v7403_v6  ;;  %v3663_v60 = vpack.c.bf16 %v7409_v2, %v7407_v7  ;;  %4600 = vmatpush1.bf16.msra.mxu1 %v5926_v49 }
0x1189   :  { %4601 = vmatprep.subr.bf16.mxu1 %v5931_v27 }
0x118a   :  { %4113 = vmatprep.mubr.bf16.mxu1 %v3664_v37  ;;  %4166 = vmatprep.mubr.bf16.mxu0 %v3664_v37 }
0x118b   :  { %4114 = vmatmul.mubr.bf16.gmra.mrb[72].mxu1 %v3663_v60  ;;  %4167 = vmatmul.mubr.bf16.gmra.mrb[72].mxu0 %v3663_v60 }
0x118c   :  { %4602 = vmatpush1.bf16.msra.mxu1 %v5929_v3 }
0x118d   :  { %4603 = vmatprep.subr.bf16.mxu1 %v5934_v61 }
0x1190   :  { %4604 = vmatpush1.bf16.msra.mxu1 %v5932_v10 }
0x1191   :  { %4605 = vmatprep.subr.bf16.mxu1 %v5937_v41 }
0x1194   :  { %4606 = vmatpush1.bf16.msra.mxu1 %v5935_v43 }
0x1195   :  { %4607 = vmatprep.subr.bf16.mxu1 %v5940_v31 }
0x1198   :  { %4608 = vmatpush1.bf16.msra.mxu1 %v5938_v14 }
0x1199   :  { %4609 = vmatprep.subr.bf16.mxu1 %v5943_v16 }
0x119c   :  { %4610 = vmatpush1.bf16.msra.mxu1 %v5941_v17 }
0x119d   :  { %4611 = vmatprep.subr.bf16.mxu1 %v5946_v32  ;;  %v5971_v32 = vld [vmem:[#allocation19 + $0x100] ss:$8 sps:$4 sm:$0xff]  }
0x11a0   :  { %4612 = vmatpush1.bf16.msra.mxu1 %v5944_v33 }
0x11a1   :  { %4613 = vmatprep.subr.bf16.mxu1 %v5949_v25 }
0x11a4   :  { %4614 = vmatpush1.bf16.msra.mxu1 %v5947_v59 }
0x11a5   :  { %4615 = vmatprep.subr.bf16.mxu1 %v5952_v0 }
0x11a8   :  { %4616 = vmatpush1.bf16.msra.mxu1 %v5950_v44  ;;  %v5976_v44 = vld [vmem:[#allocation19 + $0x114] ss:$8 sps:$4 sm:$0xff]  }
0x11a9   :  { %4617 = vmatprep.subr.bf16.mxu1 %v5955_v11 }
0x11ac   :  { %4618 = vmatpush1.bf16.msra.mxu1 %v5953_v22 }
0x11ad   :  { %4619 = vmatprep.subr.bf16.mxu1 %v5958_v15 }
0x11b0   :  { %4620 = vmatpush1.bf16.msra.mxu1 %v5956_v58 }
0x11b1   :  { %4621 = vmatprep.subr.bf16.mxu1 %v5961_v29 }
0x11b4   :  { %4622 = vmatpush1.bf16.msra.mxu1 %v5959_v18 }
0x11b5   :  { %4623 = vmatprep.subr.bf16.mxu1 %v5964_v30 }
0x11b8   :  { %4624 = vmatpush1.bf16.msra.mxu1 %v5962_v53 }
0x11b9   :  { %4625 = vmatprep.subr.bf16.mxu1 %v5967_v12 }
0x11bc   :  { %4626 = vmatpush1.bf16.msra.mxu1 %v5965_v26 }
0x11bd   :  { %4627 = vmatprep.subr.bf16.mxu1 %v5970_v8  ;;  %v5974_v8 = vld [vmem:[#allocation19 + $0x110] ss:$8 sps:$4 sm:$0xff]  }
0x11c0   :  { %4628 = vmatpush1.bf16.msra.mxu1 %v5968_v42 }
0x11c1   :  { %4650 = vmatprep.subr.bf16.mxu1 %v5973_v38 }
0x1256   :  { %v4105_v55 = vpop.f32.mrb[68].mxu1  ;;  %v4158_v21 = vpop.f32.mrb[68].mxu0 }
0x1257   :  { %v4106_v62 = vadd.f32 %v4105_v55, %v3734_v54  ;;  %v4159_v5 = vadd.f32 %v4158_v21, %v3742_v46  ;;  %v4107_v45 = vpop.f32.mrb[69].mxu1  ;;  %v4160_v4 = vpop.f32.mrb[69].mxu0  ;;  %v5979_v21 = vld [vmem:[#allocation19 + $0x124] ss:$8 sps:$4 sm:$0xff]  }
0x1258   :  { %v4108_v28 = vadd.f32 %v4107_v45, %v3738_v57  ;;  %v4161_v34 = vadd.f32 %v4160_v4, %v3746_v1  ;;  %v4109_v23 = vpop.f32.mrb[70].mxu1  ;;  %v4162_v39 = vpop.f32.mrb[70].mxu0 }
0x1259   :  { %v4110_v20 = vadd.f32 %v4109_v23, %v3734_v54  ;;  %v4163_v19 = vadd.f32 %v4162_v39, %v3742_v46  ;;  %v4111_v24 = vpop.f32.mrb[71].mxu1  ;;  %v4164_v63 = vpop.f32.mrb[71].mxu0  ;;  %v4177_v49 = vmax.f32 %v4106_v62, 0.0  ;;  %v4179_v27 = vmax.f32 %v4159_v5, 0.0  ;;  %v5980_v23 = vld [vmem:[#allocation19 + $0x130] ss:$8 sps:$4 sm:$0xff]  }
0x125a   :  { %v4112_v13 = vadd.f32 %v4111_v24, %v3738_v57  ;;  %v4165_v47 = vadd.f32 %v4164_v63, %v3746_v1  ;;  %v4178_v60 = vmax.f32 %v4108_v28, 0.0  ;;  %v4180_v3 = vmax.f32 %v4161_v34, 0.0  ;;  %v5985_v39 = vld [vmem:[#allocation19 + $0x144] ss:$8 sps:$4 sm:$0xff]   ;;  %v5986_v24 = vld [vmem:[#allocation19 + $0x150] ss:$8 sps:$4 sm:$0xff]  }
0x125b   :  { %v4181_v37 = vmax.f32 %v4110_v20, 0.0  ;;  %v4183_v50 = vmax.f32 %v4163_v19, 0.0  ;;  %v5983_v20 = vld [vmem:[#allocation19 + $0x140] ss:$8 sps:$4 sm:$0xff]   ;;  %v5988_v19 = vld [vmem:[#allocation19 + $0x154] ss:$8 sps:$4 sm:$0xff]  }
0x125c   :  { %v4182_v61 = vmax.f32 %v4112_v13, 0.0  ;;  %v4184_v10 = vmax.f32 %v4165_v47, 0.0  ;;  %v5991_v63 = vld [vmem:[#allocation19 + $0x164] ss:$8 sps:$4 sm:$0xff]   ;;  %v5989_v13 = vld [vmem:[#allocation19 + $0x160] ss:$8 sps:$4 sm:$0xff]  }
0x125d   :  { %v4193_v41 = vpack.c.bf16 %v4181_v37, %v4177_v49  ;;  %v7422_v43 = vpack.c.bf16 %v4183_v50, %v4179_v27  ;;  %v5994_v47 = vld [vmem:[#allocation19 + $0x174] ss:$8 sps:$4 sm:$0xff]   ;;  %v5992_v49 = vld [vmem:[#allocation19 + $0x170] ss:$8 sps:$4 sm:$0xff]   ;;  %v5997_v27 = vld [vmem:[#allocation19 + $0x184] ss:$8 sps:$4 sm:$0xff]  }
0x125e   :  { %v4194_v31 = vpack.c.bf16 %v4182_v61, %v4178_v60  ;;  %v4196_v14 = vpack.c.bf16 %v4184_v10, %v4180_v3  ;;  %v4115_v16 = vpop.f32.mrb[72].mxu1  ;;  %v4168_v17 = vpop.f32.mrb[72].mxu0  ;;  %v5995_v37 = vld [vmem:[#allocation19 + $0x180] ss:$8 sps:$4 sm:$0xff]   ;;  %v6000_v50 = vld [vmem:[#allocation19 + $0x194] ss:$8 sps:$4 sm:$0xff]  }
0x125f   :  { %v4116_v33 = vadd.f32 %v4115_v16, %v3734_v54  ;;  %v4169_v25 = vadd.f32 %v4168_v17, %v3742_v46  ;;  %v4117_v59 = vpop.f32.mrb[73].mxu1  ;;  %v4170_v0 = vpop.f32.mrb[73].mxu0  ;;  %v5998_v60 = vld [vmem:[#allocation19 + $0x190] ss:$8 sps:$4 sm:$0xff]   ;;  %v6003_v3 = vld [vmem:[#allocation19 + $0x1a4] ss:$8 sps:$4 sm:$0xff]  }
0x1260   :  { %v4118_v11 = vadd.f32 %v4117_v59, %v3738_v57  ;;  %v4171_v22 = vadd.f32 %v4170_v0, %v3746_v1  ;;  %v4119_v15 = vpop.f32.mrb[74].mxu1  ;;  %v4172_v58 = vpop.f32.mrb[74].mxu0  ;;  %4629 = vmatprep.mubr.bf16.mxu1 %v4194_v31  ;;  %v6001_v61 = vld [vmem:[#allocation19 + $0x1a0] ss:$8 sps:$4 sm:$0xff]   ;;  %v6006_v10 = vld [vmem:[#allocation19 + $0x1b4] ss:$8 sps:$4 sm:$0xff]  }
0x1261   :  { %v4120_v29 = vadd.f32 %v4119_v15, %v3734_v54  ;;  %v4173_v18 = vadd.f32 %v4172_v58, %v3742_v46  ;;  %v4121_v30 = vpop.f32.mrb[75].mxu1  ;;  %v4174_v53 = vpop.f32.mrb[75].mxu0  ;;  %4630 = vmatmul.mubr.bf16.vlgmr.msra.gmra.mrb[76].mxu1 %v4193_v41  ;;  %v4185_v42 = vmax.f32 %v4116_v33, 0.0  ;;  %v4187_v38 = vmax.f32 %v4169_v25, 0.0  ;;  %v6004_v41 = vld [vmem:[#allocation19 + $0x1b0] ss:$8 sps:$4 sm:$0xff]  }
0x1262   :  { %v4122_v12 = vadd.f32 %v4121_v30, %v3738_v57  ;;  %v4175_v26 = vadd.f32 %v4174_v53, %v3746_v1  ;;  %4651 = vmatpush1.bf16.msra.mxu1 %v5971_v32  ;;  %v4186_v62 = vmax.f32 %v4118_v11, 0.0  ;;  %v4188_v5 = vmax.f32 %v4171_v22, 0.0  ;;  %v5977_v57 = vld [vmem:[#allocation19 + $0x120] ss:$8 sps:$4 sm:$0xff]   ;;  %v5982_v1 = vld [vmem:[#allocation19 + $0x134] ss:$8 sps:$4 sm:$0xff]  }
0x1263   :  { %v4189_v36 = vmax.f32 %v4120_v29, 0.0  ;;  %v4191_v55 = vmax.f32 %v4173_v18, 0.0  ;;  %4652 = vmatprep.subr.bf16.mxu1 %v5976_v44  ;;  %v6009_v31 = vld [vmem:[#allocation19 + $0x1c4] ss:$8 sps:$4 sm:$0xff]   ;;  %v6012_v16 = vld [vmem:[#allocation19 + $0x1d4] ss:$8 sps:$4 sm:$0xff]  }
0x1264   :  { %v4190_v45 = vmax.f32 %v4122_v12, 0.0  ;;  %v4192_v4 = vmax.f32 %v4175_v26, 0.0  ;;  %v6010_v17 = vld [vmem:[#allocation19 + $0x1d0] ss:$8 sps:$4 sm:$0xff]   ;;  %v6015_v32 = vld [vmem:[#allocation19 + $0x1e4] ss:$8 sps:$4 sm:$0xff]  }
0x1265   :  { %v4197_v28 = vpack.c.bf16 %v4189_v36, %v4185_v42  ;;  %v7424_v54 = vpack.c.bf16 %v4191_v55, %v4187_v38  ;;  %v6013_v33 = vld [vmem:[#allocation19 + $0x1e0] ss:$8 sps:$4 sm:$0xff]   ;;  %v6018_v25 = vld [vmem:[#allocation19 + $0x1f4] ss:$8 sps:$4 sm:$0xff]   ;;  %v6016_v59 = vld [vmem:[#allocation19 + $0x1f0] ss:$8 sps:$4 sm:$0xff]  }
0x1266   :  { %v4198_v46 = vpack.c.bf16 %v4190_v45, %v4186_v62  ;;  %v4200_v34 = vpack.c.bf16 %v4192_v4, %v4188_v5  ;;  %4653 = vmatpush1.bf16.msra.mxu1 %v5974_v8  ;;  %v4265_v0 = vld [vmem:[%s7487_s21] sm:$0x3] }
0x1267   :  { %4654 = vmatprep.subr.bf16.mxu1 %v5979_v21  ;;  %v4270_v44 = vrot.slane %v4265_v0, %v6749_v48  ;;  %v4274_v11 = vrot.slane %v4265_v0, %v6758_v51 }
0x1268   :  { %4639 = vmatprep.mubr.bf16.mxu1 %v4198_v46 }
0x1269   :  { %4640 = vmatmul.mubr.bf16.gmra.mrb[80].mxu1 %v4197_v28 }
0x126a   :  { %4655 = vmatpush1.bf16.msra.mxu1 %v5977_v57  ;;  %4682 = vmatprep.mubr.bf16.mxu1 %v4196_v14  ;;  %v6007_v14 = vld [vmem:[#allocation19 + $0x1c0] ss:$8 sps:$4 sm:$0xff]  }
0x126b   :  { %4656 = vmatprep.subr.bf16.mxu1 %v5982_v1 }
0x126e   :  { %4657 = vmatpush1.bf16.msra.mxu1 %v5980_v23 }
0x126f   :  { %4658 = vmatprep.subr.bf16.mxu1 %v5985_v39 }
0x1272   :  { %4659 = vmatpush1.bf16.msra.mxu1 %v5983_v20 }
0x1273   :  { %4660 = vmatprep.subr.bf16.mxu1 %v5988_v19 }
0x1276   :  { %4661 = vmatpush1.bf16.msra.mxu1 %v5986_v24 }
0x1277   :  { %4662 = vmatprep.subr.bf16.mxu1 %v5991_v63 }
0x127a   :  { %4663 = vmatpush1.bf16.msra.mxu1 %v5989_v13 }
0x127b   :  { %4664 = vmatprep.subr.bf16.mxu1 %v5994_v47 }
0x127e   :  { %4665 = vmatpush1.bf16.msra.mxu1 %v5992_v49 }
0x127f   :  { %4666 = vmatprep.subr.bf16.mxu1 %v5997_v27 }
0x1282   :  { %4667 = vmatpush1.bf16.msra.mxu1 %v5995_v37 }
0x1283   :  { %4668 = vmatprep.subr.bf16.mxu1 %v6000_v50 }
0x1286   :  { %4669 = vmatpush1.bf16.msra.mxu1 %v5998_v60 }
0x1287   :  { %4670 = vmatprep.subr.bf16.mxu1 %v6003_v3 }
0x128a   :  { %4671 = vmatpush1.bf16.msra.mxu1 %v6001_v61 }
0x128b   :  { %4672 = vmatprep.subr.bf16.mxu1 %v6006_v10 }
0x128e   :  { %4673 = vmatpush1.bf16.msra.mxu1 %v6004_v41 }
0x128f   :  { %4674 = vmatprep.subr.bf16.mxu1 %v6009_v31 }
0x1292   :  { %4675 = vmatpush1.bf16.msra.mxu1 %v6007_v14 }
0x1293   :  { %4676 = vmatprep.subr.bf16.mxu1 %v6012_v16 }
0x1296   :  { %4677 = vmatpush1.bf16.msra.mxu1 %v6010_v17 }
0x1297   :  { %4678 = vmatprep.subr.bf16.mxu1 %v6015_v32 }
0x129a   :  { %4679 = vmatpush1.bf16.msra.mxu1 %v6013_v33 }
0x129b   :  { %4680 = vmatprep.subr.bf16.mxu1 %v6018_v25 }
0x129e   :  { %4681 = vmatpush1.bf16.msra.mxu1 %v6016_v59 }
0x12a1   :  { %4683 = vmatmul.mubr.bf16.vlgmr.msra.gmra.mrb[76].mxu1 %v7422_v43 }
0x12a2   :  { %4692 = vmatprep.mubr.bf16.mxu1 %v4200_v34 }
0x12a9   :  { %4693 = vmatmul.mubr.bf16.gmra.mrb[80].mxu1 %v7424_v54 }
0x1374   :  { %v4684_v22 = vpop.f32.mrb[76].mxu1 }
0x1375   :  { %v5389_v15 = vadd.f32 %v4684_v22, %v4270_v44  ;;  %v4686_v58 = vpop.f32.mrb[77].mxu1 }
0x1376   :  { %v5390_v29 = vadd.f32 %v4686_v58, %v4274_v11  ;;  %v4688_v18 = vpop.f32.mrb[78].mxu1 }
0x1377   :  { %v4703_v30 = vadd.f32 %v5389_v15, %v7391_v9  ;;  %v5391_v53 = vadd.f32 %v4688_v18, %v4270_v44  ;;  %v4690_v43 = vpop.f32.mrb[79].mxu1 }
0x1378   :  { %v4704_v12 = vadd.f32 %v5390_v29, %v7387_v52  ;;  %v5392_v26 = vadd.f32 %v4690_v43, %v4274_v11  ;;  %v4775_v29 = vld [vmem:[%s7488_s22] sm:$0x3]  ;;  %s6414_s22 = smov [#allocation20]  }
0x1379   :  { %v4705_v8 = vadd.f32 %v5391_v53, %v7393_v56  ;;  %v4795_v53 = vld [vmem:[%s7544_s6] sm:$0x3]  ;;  %s4828_s2 = sshll.u32 %s6414_s22, 4  ;;  %s4829_s2 = int_to_ptr.vmem [resolvable:$true] %s4828_s2 }
0x137a   :  { %v4706_v42 = vadd.f32 %v5392_v26, %v7389_v35  ;;  %v4711_v38 = vadd.f32 %v4704_v12, %v4703_v30  ;;  %v4784_v26 = vrot.slane %v4775_v29, %v6758_v51  ;;  %s6357_s23 = scalar_lea.vmem %s4829_s2, 1024  ;;  %p6362_p5 = scmp.lt.s32.totalorder %s4829_s2, %s4829_s2 }
0x137b   :  { %p6358_p4 = scmp.ne.s32.totalorder %s4829_s2, %s6357_s23  ;;  %p6363_p6 = scmp.lt.s32.totalorder %s6357_s23, %s6357_s23 }
0x137c   :  { %v4694_v36 = vpop.f32.mrb[80].mxu1  ;;  %4712 = vadd.xlane.f32.xlu0 %v4711_v38  ;;  %v4714_v55 = vadd.f32 %v4706_v42, %v4705_v8  ;;  %v4804_v38 = vrot.slane %v4795_v53, %v6758_v51 }
0x137d   :  { %v5393_v21 = vadd.f32 %v4694_v36, %v4270_v44  ;;  %v4696_v62 = vpop.f32.mrb[81].mxu1  ;;  %p6364_p7 = por %p6363_p6, %p6362_p5 }
0x137e   :  { %v5394_v5 = vadd.f32 %v4696_v62, %v4274_v11  ;;  %v4698_v45 = vpop.f32.mrb[82].mxu1  ;;  %4715 = vadd.xlane.f32.xlu1 %v4714_v55 }
0x137f   :  { %v4707_v9 = vadd.f32 %v5393_v21, %v7407_v7  ;;  %v5395_v4 = vadd.f32 %v4698_v45, %v4270_v44  ;;  %v4700_v28 = vpop.f32.mrb[83].mxu1  ;;  %p6365_p8 = pnand %p6364_p7, %p6358_p4 }
0x1380   :  { %v4708_v52 = vadd.f32 %v5394_v5, %v7403_v6  ;;  %v5396_v54 = vadd.f32 %v4700_v28, %v4274_v11 }
0x1381   :  { %v4709_v56 = vadd.f32 %v5395_v4, %v7409_v2 }
0x1382   :  { %v4710_v35 = vadd.f32 %v5396_v54, %v7405_v40  ;;  %v4717_v46 = vadd.f32 %v4708_v52, %v4707_v9 }
0x1384   :  { %4718 = vadd.xlane.f32.xlu0 %v4717_v46  ;;  %v4720_v34 = vadd.f32 %v4710_v35, %v4709_v56 }
0x1386   :  { %4721 = vadd.xlane.f32.xlu1 %v4720_v34 }
0x1409   :  { %v4713_v57 = vpop.xlane.xlu0 %4712 }
0x140a   :  { %v4723_v1 = vmul.f32 0.00390625, %v4713_v57 }
0x140b   :  { %v4716_v23 = vpop.xlane.xlu1 %4715 }
0x140c   :  { %v4727_v39 = vsub.f32 %v4703_v30, %v4723_v1  ;;  %v4728_v20 = vsub.f32 %v4704_v12, %v4723_v1  ;;  %v4724_v19 = vmul.f32 0.00390625, %v4716_v23  ;;  %v4780_v12 = vrot.slane %v4775_v29, %v6749_v48 }
0x140e   :  { %v4729_v7 = vsub.f32 %v4705_v8, %v4724_v19  ;;  %v4730_v24 = vsub.f32 %v4706_v42, %v4724_v19  ;;  %v4735_v63 = vmul.f32 %v4727_v39, %v4727_v39  ;;  %v4736_v13 = vmul.f32 %v4728_v20, %v4728_v20 }
0x140f   :  { %v4800_v42 = vrot.slane %v4795_v53, %v6749_v48 }
0x1410   :  { %v4743_v6 = vadd.f32 %v4736_v13, %v4735_v63  ;;  %v4737_v47 = vmul.f32 %v4729_v7, %v4729_v7  ;;  %v4738_v49 = vmul.f32 %v4730_v24, %v4730_v24 }
0x1411   :  { %v4719_v2 = vpop.xlane.xlu0 %4718 }
0x1412   :  { %v4725_v27 = vmul.f32 0.00390625, %v4719_v2  ;;  %4744 = vadd.xlane.f32.xlu0 %v4743_v6  ;;  %v4746_v40 = vadd.f32 %v4738_v49, %v4737_v47 }
0x1413   :  { %v4722_v37 = vpop.xlane.xlu1 %4721 }
0x1414   :  { %v4731_v50 = vsub.f32 %v4707_v9, %v4725_v27  ;;  %v4732_v60 = vsub.f32 %v4708_v52, %v4725_v27  ;;  %v4726_v3 = vmul.f32 0.00390625, %v4722_v37  ;;  %4747 = vadd.xlane.f32.xlu1 %v4746_v40 }
0x1416   :  { %v4733_v61 = vsub.f32 %v4709_v56, %v4726_v3  ;;  %v4734_v10 = vsub.f32 %v4710_v35, %v4726_v3  ;;  %v4739_v41 = vmul.f32 %v4731_v50, %v4731_v50  ;;  %v4740_v31 = vmul.f32 %v4732_v60, %v4732_v60 }
0x1418   :  { %v4749_v14 = vadd.f32 %v4740_v31, %v4739_v41  ;;  %v4741_v16 = vmul.f32 %v4733_v61, %v4733_v61  ;;  %v4742_v17 = vmul.f32 %v4734_v10, %v4734_v10 }
0x141a   :  { %4750 = vadd.xlane.f32.xlu0 %v4749_v14  ;;  %v4752_v32 = vadd.f32 %v4742_v17, %v4741_v16 }
0x141c   :  { %4753 = vadd.xlane.f32.xlu1 %v4752_v32 }
0x149f   :  { %v4745_v33 = vpop.xlane.xlu0 %4744 }
0x14a0   :  { %v4755_v25 = vmul.f32 0.00390625, %v4745_v33 }
0x14a1   :  { %v4748_v59 = vpop.xlane.xlu1 %4747 }
0x14a2   :  { %v4759_v0 = vadd.f32 1e-05, %v4755_v25  ;;  %v4756_v44 = vmul.f32 0.00390625, %v4748_v59 }
0x14a4   :  { %6099 = vrsqrt.f32 %v4759_v0  ;;  %v4760_v11 = vadd.f32 1e-05, %v4756_v44 }
0x14a6   :  { %6101 = vrsqrt.f32 %v4760_v11 }
0x14a7   :  { %v4751_v22 = vpop.xlane.xlu0 %4750 }
0x14a8   :  { %v4757_v15 = vmul.f32 0.00390625, %v4751_v22 }
0x14a9   :  { %v4754_v58 = vpop.xlane.xlu1 %4753 }
0x14aa   :  { %v4761_v18 = vadd.f32 1e-05, %v4757_v15  ;;  %v4758_v30 = vmul.f32 0.00390625, %v4754_v58 }
0x14ac   :  { %6103 = vrsqrt.f32 %v4761_v18  ;;  %v4762_v43 = vadd.f32 1e-05, %v4758_v30 }
0x14ae   :  { %v6100_v8 = vpop.eup %6099  ;;  %6105 = vrsqrt.f32 %v4762_v43 }
0x14af   :  { %v4767_v36 = vmul.f32 %v6100_v8, %v4727_v39  ;;  %v4768_v55 = vmul.f32 %v6100_v8, %v4728_v20 }
0x14b0   :  { %v6102_v21 = vpop.eup %6101 }
0x14b1   :  { %v4787_v62 = vmul.f32 %v4780_v12, %v4767_v36  ;;  %v4788_v5 = vmul.f32 %v4784_v26, %v4768_v55  ;;  %v4769_v45 = vmul.f32 %v6102_v21, %v4729_v7  ;;  %v4770_v9 = vmul.f32 %v6102_v21, %v4730_v24 }
0x14b3   :  { %v4807_v4 = vadd.f32 %v4800_v42, %v4787_v62  ;;  %v4808_v28 = vadd.f32 %v4804_v38, %v4788_v5  ;;  %v4789_v52 = vmul.f32 %v4780_v12, %v4769_v45  ;;  %v4790_v54 = vmul.f32 %v4784_v26, %v4770_v9 }
0x14b5   :  { %4815 = vst [vmem:[#allocation20] sm:$0xff] %v4807_v4  ;;  %4816 = vst [vmem:[#allocation20 + $0x8] sm:$0xff] %v4808_v28  ;;  %v4809_v56 = vadd.f32 %v4800_v42, %v4789_v52  ;;  %v4810_v35 = vadd.f32 %v4804_v38, %v4790_v54 }
0x14b6   :  { %v6104_v46 = vpop.eup %6103 }
0x14b7   :  { %4817 = vst [vmem:[#allocation20 + $0x10] sm:$0xff] %v4809_v56  ;;  %4818 = vst [vmem:[#allocation20 + $0x18] sm:$0xff] %v4810_v35  ;;  %v4771_v48 = vmul.f32 %v6104_v46, %v4731_v50  ;;  %v4772_v51 = vmul.f32 %v6104_v46, %v4732_v60 }
0x14b8   :  { %v6106_v34 = vpop.eup %6105 }
0x14b9   :  { %v4791_v57 = vmul.f32 %v4780_v12, %v4771_v48  ;;  %v4792_v1 = vmul.f32 %v4784_v26, %v4772_v51  ;;  %v4773_v23 = vmul.f32 %v6106_v34, %v4733_v61  ;;  %v4774_v39 = vmul.f32 %v6106_v34, %v4734_v10 }
0x14bb   :  { %v4811_v20 = vadd.f32 %v4800_v42, %v4791_v57  ;;  %v4812_v19 = vadd.f32 %v4804_v38, %v4792_v1  ;;  %v4793_v7 = vmul.f32 %v4780_v12, %v4773_v23  ;;  %v4794_v24 = vmul.f32 %v4784_v26, %v4774_v39 }
0x14bd   :  { %4819 = vst [vmem:[#allocation20 + $0x20] sm:$0xff] %v4811_v20  ;;  %4820 = vst [vmem:[#allocation20 + $0x28] sm:$0xff] %v4812_v19  ;;  %v4813_v63 = vadd.f32 %v4800_v42, %v4793_v7  ;;  %v4814_v13 = vadd.f32 %v4804_v38, %v4794_v24 }
0x14bf   :  { %4821 = vst [vmem:[#allocation20 + $0x30] sm:$0xff] %v4813_v63  ;;  %4822 = vst [vmem:[#allocation20 + $0x38] sm:$0xff] %v4814_v13 }
0x14c0   :  { %6368 = shalt.err (!%p6365_p8)
}
0x14c1   :  { %s7545_s10 = sld [smem:[#allocation38_spill]] }
0x14c7   :  { %s6369_s18 = scalar_lea.hbm %s7545_s10, 1024 }
0x14c8   :  { %p6370_p9 = scmp.ne.s32.totalorder %s7545_s10, %s6369_s18  ;;  %p6373_p10 = scmp.lt.u32.totalorder %s6369_s18, %s7545_s10 }
0x14ca   :  { %p6375_p11 = pnand %p6373_p10, %p6370_p9 }
0x14cc   :  { %6378 = shalt.err (!%p6375_p11)
}
0x14cd   :  { %4834 = dma.vmem_to_hbm [thread:$0]  %s4829_s2, 1024, %s7545_s10, [#allocation4], %s7522_s29, %s7522_s29, %s7521_s30  }
0x14ce   :  { %6391 = dma.done.wait [#allocation4], 1024  }
0x14cf   :  { %6392 = vsyncadd [#allocation4], 4294966272 }
0x14d0   :  { %4838 = vsyncpa [#allocation3], 1 }
0x14d1   :  { %4839 = vsyncpa [#allocation6], 1 }
0x14d2   :  { %4840 = vsyncpa [#allocation9], 1 }
0x14d3   :  { %4841 = vsyncpa [#allocation12], 1 }
0x14d4   :  { %4842 = vsyncpa [#allocation15], 1 }
0x14d5   :  { %4843 = vsyncpa [#allocation18], 1 }
0x14d6   :  { %4844 = vsyncpa [#allocation4], 1 }

</bundles_post_ra>
